<compile_context>
chip_gen: v5e
topology: v5e:2x2
jax: 0.10.0
libtpu: 0.0.40
codegen_flags: <defaults>
</compile_context>

<pallas_src>
import jax
import jax.numpy as jnp
from jax.experimental import pallas as pl
from jax.experimental.pallas import tpu as pltpu


def nfm_kernel(embed_ref, fv_ref, fb_ref,
               w1_ref, b1_ref, w2_ref, b2_ref,
               wp_ref, gbias_ref, out_ref):
    # Bi-interaction pooling (FM hot path).  Upcast (possibly bf16) embeds;
    # everything downstream is f32.
    embed = embed_ref[...].astype(jnp.float32)        # (TB, F, K)
    fv = fv_ref[...]                                  # (TB, F)   f32
    scaled = embed * fv[:, :, None]                   # (TB, F, K)
    s = jnp.sum(scaled, axis=1)                       # (TB, K)
    sq = jnp.sum(scaled * scaled, axis=1)             # (TB, K)
    fm = 0.5 * (s * s - sq)                           # (TB, K)

    # Deep layers: Linear -> ReLU (batch_norm=False; dropout identity in eval).
    h = jnp.dot(fm, w1_ref[...], preferred_element_type=jnp.float32) + b1_ref[...]
    h = jnp.maximum(h, 0.0)
    h = jnp.dot(h, w2_ref[...], preferred_element_type=jnp.float32) + b2_ref[...]
    h = jnp.maximum(h, 0.0)

    # Prediction head Linear(H2 -> 1, bias=False): a 1-lane-wide MXU matmul is
    # 255/256 wasted, so do it as a VPU multiply + lane reduce instead.
    pred = jnp.sum(h * wp_ref[...], axis=1, keepdims=True)           # (TB, 1)

    # First-order term: sum_f bias(feature_f) * value_f, plus global bias.
    feat_bias = jnp.sum(fb_ref[...] * fv, axis=1, keepdims=True)     # (TB, 1)
    out_ref[...] = pred + feat_bias + gbias_ref[0, 0]


def nfm_forward(features, feature_values, params, *, block_b=128,
                embed_dtype=None):
    """features: (B, F) int32; feature_values: (B, F) f32.  Returns (B,) f32."""
    emb_table = params["embeddings"]
    bias_table = params["biases"]
    gbias = params["bias_"].reshape(1, 1).astype(jnp.float32)
    w1, b1 = params["w1"], params["b1"]
    w2, b2 = params["w2"], params["b2"]
    wp_row = params["wp"].reshape(1, -1)     # (1, H2) lane row for the reduce

    B, F = features.shape
    K = emb_table.shape[1]
    H1, H2 = w1.shape[1], w2.shape[1]

    # Batch tile: multiple of 8 sublanes; pad B up to a whole number of tiles.
    block_b = max(8, (int(block_b) // 8) * 8)
    num_blocks = -(-B // block_b)
    B_pad = num_blocks * block_b
    if B_pad != B:
        features = jnp.pad(features, ((0, B_pad - B), (0, 0)))
        feature_values = jnp.pad(feature_values, ((0, B_pad - B), (0, 0)))

    # Glue: embedding gathers kept in plain JAX.
    # TODO(synk): fuse this gather into the kernel to halve HBM traffic.
    embed = jnp.take(emb_table, features, axis=0)             # (B_pad, F, K)
    if embed_dtype is not None:
        embed = embed.astype(embed_dtype)                     # e.g. bf16 DMA
    fb = jnp.take(bias_table, features, axis=0)[..., 0]       # (B_pad, F)
    fv = feature_values.astype(jnp.float32)

    cost = pl.CostEstimate(
        flops=int(B_pad * (4 * F * K + 2 * K * H1 + 2 * H1 * H2 + 2 * H2 + 2 * F)),
        transcendentals=0,
        bytes_accessed=int(embed.size * embed.dtype.itemsize
                           + (fv.size + fb.size) * 4
                           + (w1.size + b1.size + w2.size + b2.size
                              + wp_row.size + 1) * 4
                           + B_pad * 4),
    )

    out = pl.pallas_call(
        nfm_kernel,
        grid=(num_blocks,),
        in_specs=[
            pl.BlockSpec((block_b, F, K), lambda i: (i, 0, 0)),   # embed tile
            pl.BlockSpec((block_b, F), lambda i: (i, 0)),         # feature vals
            pl.BlockSpec((block_b, F), lambda i: (i, 0)),         # feature bias
            pl.BlockSpec((K, H1), lambda i: (0, 0)),              # w1 (resident)
            pl.BlockSpec((1, H1), lambda i: (0, 0)),              # b1 (resident)
            pl.BlockSpec((H1, H2), lambda i: (0, 0)),             # w2 (resident)
            pl.BlockSpec((1, H2), lambda i: (0, 0)),              # b2 (resident)
            pl.BlockSpec((1, H2), lambda i: (0, 0)),              # wp row
            pl.BlockSpec(memory_space=pltpu.MemorySpace.SMEM),    # global bias
        ],
        out_specs=pl.BlockSpec((block_b, 1), lambda i: (i, 0)),
        out_shape=jax.ShapeDtypeStruct((B_pad, 1), jnp.float32),
        compiler_params=pltpu.CompilerParams(
            dimension_semantics=("parallel",),
            vmem_limit_bytes=32 * 1024 * 1024),
        cost_estimate=cost,
    )(embed, fv, fb, w1, b1, w2, b2, wp_row, gbias)
    return out.reshape(-1)[:B]


def init_params(key, num_features, num_factors, layers):
    k_emb, k_w1, k_w2, k_wp = jax.random.split(key, 4)
    h1, h2 = layers

    def xavier_normal(k, fan_in, fan_out, shape):
        std = (2.0 / (fan_in + fan_out)) ** 0.5
        return std * jax.random.normal(k, shape, dtype=jnp.float32)

    return {
        "embeddings": 0.01 * jax.random.normal(
            k_emb, (num_features, num_factors), dtype=jnp.float32),
        "biases": jnp.zeros((num_features, 1), dtype=jnp.float32),
        "bias_": jnp.zeros((1, 1), dtype=jnp.float32),
        # nn.Linear(in, out).weight is (out, in); stored transposed (in, out).
        "w1": xavier_normal(k_w1, num_factors, h1, (num_factors, h1)),
        "b1": jnp.zeros((1, h1), dtype=jnp.float32),
        "w2": xavier_normal(k_w2, h1, h2, (h1, h2)),
        "b2": jnp.zeros((1, h2), dtype=jnp.float32),
        "wp": xavier_normal(k_wp, h2, 1, (h2, 1)),
    }


def nfm_reference(features, feature_values, params):
    embed = jnp.take(params["embeddings"], features, axis=0)
    fv = feature_values[..., None]
    scaled = embed * fv
    fm = 0.5 * (jnp.sum(scaled, axis=1) ** 2 - jnp.sum(scaled ** 2, axis=1))
    h = jnp.maximum(fm @ params["w1"] + params["b1"], 0.0)
    h = jnp.maximum(h @ params["w2"] + params["b2"], 0.0)
    pred = h @ params["wp"]
    fb = jnp.take(params["biases"], features, axis=0)
    feat_bias = jnp.sum(fb * fv, axis=1)
    return (pred + feat_bias + params["bias_"]).reshape(-1)


if __name__ == "__main__":
    num_features = 64     # feature-id vocabulary
    num_factors = 32      # K
    layers = [32, 16]     # H1, H2
    B, F = 512, 8         # batch (4 grid steps at block_b=128), fields

    key = jax.random.PRNGKey(0)
    k_params, k_feat, k_val, k_b, k_gb = jax.random.split(key, 5)

    params = init_params(k_params, num_features, num_factors, layers)
    # Use non-zero biases in the test so the first-order / global-bias paths
    # are actually exercised (module forward works for any parameter values).
    params["biases"] = 0.01 * jax.random.normal(k_b, (num_features, 1), jnp.float32)
    params["bias_"] = 0.01 * jax.random.normal(k_gb, (1, 1), jnp.float32)

    features = jax.random.randint(k_feat, (B, F), 0, num_features, dtype=jnp.int32)
    feature_values = jax.random.uniform(k_val, (B, F), dtype=jnp.float32)

    # f32 path (matches the PyTorch eval-mode forward).
    out = jax.block_until_ready(
        nfm_forward(features, feature_values, params, block_b=128))
    ref = jax.block_until_ready(nfm_reference(features, feature_values, params))
    assert out.shape == (B,)
    assert jnp.allclose(out, ref, atol=5e-5, rtol=1e-3)

    # bf16-embed path (halves HBM traffic of the dominant tensor); compared
    # against a reference using the identically-rounded embeddings.
    out_bf = jax.block_until_ready(
        nfm_forward(features, feature_values, params, block_b=128,
                    embed_dtype=jnp.bfloat16))
    params_r = dict(
        params,
        embeddings=params["embeddings"].astype(jnp.bfloat16).astype(jnp.float32))
    ref_bf = jax.block_until_ready(
        nfm_reference(features, feature_values, params_r))
    assert jnp.allclose(out_bf, ref_bf, atol=5e-5, rtol=1e-3)

    print("KERNEL_OK")
</pallas_src>

<mosaic_0001>
module attributes {stable_mosaic.version = 11 : i64} {
  func.func @nfm_kernel(%arg0: i32, %arg1: memref<128x8x32xf32, #tpu.memory_space<vmem>>, %arg2: memref<128x8xf32, #tpu.memory_space<vmem>>, %arg3: memref<128x8xf32, #tpu.memory_space<vmem>>, %arg4: memref<32x32xf32, #tpu.memory_space<vmem>>, %arg5: memref<1x32xf32, #tpu.memory_space<vmem>>, %arg6: memref<32x16xf32, #tpu.memory_space<vmem>>, %arg7: memref<1x16xf32, #tpu.memory_space<vmem>>, %arg8: memref<1x16xf32, #tpu.memory_space<vmem>>, %arg9: memref<1x1xf32, #tpu.memory_space<smem>>, %arg10: memref<128x1xf32, #tpu.memory_space<vmem>>) attributes {dimension_semantics = [#tpu.dimension_semantics<parallel>], iteration_bounds = array<i64: 4>, scalar_prefetch = 0 : i64, scratch_operands = 0 : i64, tpu.core_type = #tpu.core_type<tc>, window_params = [{transform_indices = @transform_0, window_bounds = array<i64: 128, 8, 32>}, {transform_indices = @transform_1, window_bounds = array<i64: 128, 8>}, {transform_indices = @transform_2, window_bounds = array<i64: 128, 8>}, {pipeline_mode = #tpu.pipeline_mode<synchronous>, transform_indices = @transform_3, window_bounds = array<i64: 32, 32>}, {pipeline_mode = #tpu.pipeline_mode<synchronous>, transform_indices = @transform_4, window_bounds = array<i64: 1, 32>}, {pipeline_mode = #tpu.pipeline_mode<synchronous>, transform_indices = @transform_5, window_bounds = array<i64: 32, 16>}, {pipeline_mode = #tpu.pipeline_mode<synchronous>, transform_indices = @transform_6, window_bounds = array<i64: 1, 16>}, {pipeline_mode = #tpu.pipeline_mode<synchronous>, transform_indices = @transform_7, window_bounds = array<i64: 1, 16>}, {transform_indices = @transform_8, window_bounds = array<i64: 1, 1>}, {transform_indices = @transform_9, window_bounds = array<i64: 128, 1>}]} {
    %c0 = arith.constant 0 : index
    %c0_0 = arith.constant 0 : index
    %c0_1 = arith.constant 0 : index
    %0 = vector.load %arg1[%c0, %c0_0, %c0_1] : memref<128x8x32xf32, #tpu.memory_space<vmem>>, vector<128x8x32xf32>
    %c0_2 = arith.constant 0 : index
    %c0_3 = arith.constant 0 : index
    %1 = vector.load %arg2[%c0_2, %c0_3] : memref<128x8xf32, #tpu.memory_space<vmem>>, vector<128x8xf32>
    %2 = vector.shape_cast %1 : vector<128x8xf32> to vector<128x8x1xf32>
    %3 = vector.broadcast %2 : vector<128x8x1xf32> to vector<128x8x32xf32>
    %4 = arith.mulf %0, %3 : vector<128x8x32xf32>
    %cst = arith.constant dense<0.000000e+00> : vector<128x32xf32>
    %5 = vector.multi_reduction <add>, %4, %cst [1] : vector<128x8x32xf32> to vector<128x32xf32>
    %6 = arith.mulf %4, %4 : vector<128x8x32xf32>
    %cst_4 = arith.constant dense<0.000000e+00> : vector<128x32xf32>
    %7 = vector.multi_reduction <add>, %6, %cst_4 [1] : vector<128x8x32xf32> to vector<128x32xf32>
    %8 = arith.mulf %5, %5 : vector<128x32xf32>
    %9 = arith.subf %8, %7 : vector<128x32xf32>
    %cst_5 = arith.constant 5.000000e-01 : f32
    %10 = vector.broadcast %cst_5 : f32 to vector<128x32xf32>
    %11 = arith.mulf %10, %9 : vector<128x32xf32>
    %c0_6 = arith.constant 0 : index
    %c0_7 = arith.constant 0 : index
    %12 = vector.load %arg4[%c0_6, %c0_7] : memref<32x32xf32, #tpu.memory_space<vmem>>, vector<32x32xf32>
    %cst_8 = arith.constant dense<0.000000e+00> : vector<128x32xf32>
    %13 = tpu.matmul %11, %12, %cst_8 {dimension_numbers = #tpu.dot_dimension_numbers<[1], [0], [0], [1], [0, 0, 1, 1], [], []>} : vector<128x32xf32>, vector<32x32xf32>, vector<128x32xf32> -> vector<128x32xf32>
    %c0_9 = arith.constant 0 : index
    %c0_10 = arith.constant 0 : index
    %14 = vector.load %arg5[%c0_9, %c0_10] : memref<1x32xf32, #tpu.memory_space<vmem>>, vector<1x32xf32>
    %15 = vector.broadcast %14 : vector<1x32xf32> to vector<128x32xf32>
    %16 = arith.addf %13, %15 : vector<128x32xf32>
    %cst_11 = arith.constant 0.000000e+00 : f32
    %17 = vector.broadcast %cst_11 : f32 to vector<128x32xf32>
    %18 = arith.maximumf %16, %17 : vector<128x32xf32>
    %c0_12 = arith.constant 0 : index
    %c0_13 = arith.constant 0 : index
    %19 = vector.load %arg6[%c0_12, %c0_13] : memref<32x16xf32, #tpu.memory_space<vmem>>, vector<32x16xf32>
    %cst_14 = arith.constant dense<0.000000e+00> : vector<128x16xf32>
    %20 = tpu.matmul %18, %19, %cst_14 {dimension_numbers = #tpu.dot_dimension_numbers<[1], [0], [0], [1], [0, 0, 1, 1], [], []>} : vector<128x32xf32>, vector<32x16xf32>, vector<128x16xf32> -> vector<128x16xf32>
    %c0_15 = arith.constant 0 : index
    %c0_16 = arith.constant 0 : index
    %21 = vector.load %arg7[%c0_15, %c0_16] : memref<1x16xf32, #tpu.memory_space<vmem>>, vector<1x16xf32>
    %22 = vector.broadcast %21 : vector<1x16xf32> to vector<128x16xf32>
    %23 = arith.addf %20, %22 : vector<128x16xf32>
    %cst_17 = arith.constant 0.000000e+00 : f32
    %24 = vector.broadcast %cst_17 : f32 to vector<128x16xf32>
    %25 = arith.maximumf %23, %24 : vector<128x16xf32>
    %c0_18 = arith.constant 0 : index
    %c0_19 = arith.constant 0 : index
    %26 = vector.load %arg8[%c0_18, %c0_19] : memref<1x16xf32, #tpu.memory_space<vmem>>, vector<1x16xf32>
    %27 = vector.broadcast %26 : vector<1x16xf32> to vector<128x16xf32>
    %28 = arith.mulf %25, %27 : vector<128x16xf32>
    %cst_20 = arith.constant dense<0.000000e+00> : vector<128xf32>
    %29 = vector.multi_reduction <add>, %28, %cst_20 [1] : vector<128x16xf32> to vector<128xf32>
    %30 = vector.shape_cast %29 : vector<128xf32> to vector<128x1xf32>
    %c0_21 = arith.constant 0 : index
    %c0_22 = arith.constant 0 : index
    %31 = vector.load %arg3[%c0_21, %c0_22] : memref<128x8xf32, #tpu.memory_space<vmem>>, vector<128x8xf32>
    %32 = arith.mulf %31, %1 : vector<128x8xf32>
    %cst_23 = arith.constant dense<0.000000e+00> : vector<128xf32>
    %33 = vector.multi_reduction <add>, %32, %cst_23 [1] : vector<128x8xf32> to vector<128xf32>
    %34 = vector.shape_cast %33 : vector<128xf32> to vector<128x1xf32>
    %35 = arith.addf %30, %34 : vector<128x1xf32>
    %c0_24 = arith.constant 0 : index
    %c0_25 = arith.constant 0 : index
    %36 = memref.load %arg9[%c0_24, %c0_25] : memref<1x1xf32, #tpu.memory_space<smem>>
    %37 = vector.broadcast %36 : f32 to vector<128x1xf32>
    %38 = arith.addf %35, %37 : vector<128x1xf32>
    %c0_26 = arith.constant 0 : index
    %c0_27 = arith.constant 0 : index
    %39 = vector.load %arg10[%c0_26, %c0_27] : memref<128x1xf32, #tpu.memory_space<vmem>>, vector<128x1xf32>
    tpu.vector_store %arg10[%c0_26, %c0_27], %38 {strides = array<i32>} : memref<128x1xf32, #tpu.memory_space<vmem>>, vector<128x1xf32>,
    return
  }
  func.func @transform_0(%arg0: i32) -> (i32, i32, i32) {
    %c0_i32 = arith.constant 0 : i32
    %c0_i32_0 = arith.constant 0 : i32
    %c0_i32_1 = arith.constant 0 : i32
    return %arg0, %c0_i32, %c0_i32_0 : i32, i32, i32
  }
  func.func @transform_1(%arg0: i32) -> (i32, i32) {
    %c0_i32 = arith.constant 0 : i32
    %c0_i32_0 = arith.constant 0 : i32
    return %arg0, %c0_i32 : i32, i32
  }
  func.func @transform_2(%arg0: i32) -> (i32, i32) {
    %c0_i32 = arith.constant 0 : i32
    %c0_i32_0 = arith.constant 0 : i32
    return %arg0, %c0_i32 : i32, i32
  }
  func.func @transform_3(%arg0: i32) -> (i32, i32) {
    %c0_i32 = arith.constant 0 : i32
    %c0_i32_0 = arith.constant 0 : i32
    %c0_i32_1 = arith.constant 0 : i32
    return %c0_i32, %c0_i32_0 : i32, i32
  }
  func.func @transform_4(%arg0: i32) -> (i32, i32) {
    %c0_i32 = arith.constant 0 : i32
    %c0_i32_0 = arith.constant 0 : i32
    %c0_i32_1 = arith.constant 0 : i32
    return %c0_i32, %c0_i32_0 : i32, i32
  }
  func.func @transform_5(%arg0: i32) -> (i32, i32) {
    %c0_i32 = arith.constant 0 : i32
    %c0_i32_0 = arith.constant 0 : i32
    %c0_i32_1 = arith.constant 0 : i32
    return %c0_i32, %c0_i32_0 : i32, i32
  }
  func.func @transform_6(%arg0: i32) -> (i32, i32) {
    %c0_i32 = arith.constant 0 : i32
    %c0_i32_0 = arith.constant 0 : i32
    %c0_i32_1 = arith.constant 0 : i32
    return %c0_i32, %c0_i32_0 : i32, i32
  }
  func.func @transform_7(%arg0: i32) -> (i32, i32) {
    %c0_i32 = arith.constant 0 : i32
    %c0_i32_0 = arith.constant 0 : i32
    %c0_i32_1 = arith.constant 0 : i32
    return %c0_i32, %c0_i32_0 : i32, i32
  }
  func.func @transform_8(%arg0: i32) -> (i32, i32) {
    %c0_i32 = arith.constant 0 : i32
    %c0_i32_0 = arith.constant 0 : i32
    %c0_i32_1 = arith.constant 0 : i32
    return %c0_i32, %c0_i32_0 : i32, i32
  }
  func.func @transform_9(%arg0: i32) -> (i32, i32) {
    %c0_i32 = arith.constant 0 : i32
    %c0_i32_0 = arith.constant 0 : i32
    return %arg0, %c0_i32 : i32, i32
  }
}

</mosaic_0001>

<bundles_post_ra>
// kernel: tpu_custom_call.1
= control target key start
LH: loop header
LB: loop body
LE: loop exit
PB: predicated region body
PF: predicated region fallthrough
CT: control target
= control target key end

     0   :  { %s4789_s11 = smov 0   ;;  %s6340_s0 = inlined_call_operand.vmem [shape: f32[512,8,32], index: 0, kind: input, shape index: {}]   ;;  %s6341_s1 = inlined_call_operand.vmem [shape: f32[512,8], index: 1, kind: input, shape index: {}]   ;;  %s6342_s2 = inlined_call_operand.vmem [shape: f32[512,8], index: 2, kind: input, shape index: {}]   ;;  %s6343_s3 = inlined_call_operand.vmem [shape: f32[32,32], index: 3, kind: input, shape index: {}]   ;;  %s6344_s4 = inlined_call_operand.vmem [shape: f32[1,32], index: 4, kind: input, shape index: {}]   ;;  %s6345_s5 = inlined_call_operand.vmem [shape: f32[32,16], index: 5, kind: input, shape index: {}]   ;;  %s6346_s6 = inlined_call_operand.vmem [shape: f32[1,16], index: 6, kind: input, shape index: {}]   ;;  %s6347_s7 = inlined_call_operand.vmem [shape: f32[1,16], index: 7, kind: input, shape index: {}]   ;;  %s6348_s8 = inlined_call_operand.<no memory space> [shape: f32[1,1], index: 8, kind: input, shape index: {}]   ;;  %s6349_s9 = inlined_call_operand.vmem [shape: f32[512,1], index: 9, kind: output, shape index: {}]  }
   0x1   :  { %14 = sst [smem:[#allocation2]] %s6348_s8 }
   0x2 LB: > { %s4640_s12 = sadd.s32 4294967295, %s4734_s11   ;;  %p4644_p0 = scmp.ge.s32.totalorder %s4734_s11, 1  ;;  %s4734_s11 = sphi %s4789_s11, %s20_s11  }
   0x3   : > { %p311_p1 = scmp.lt.s32.totalorder %s4734_s11, 5 }
   0x5   : > { %p312_p2 = pnand %p4644_p0, %p311_p1 }
   0x6   : > { %s4647_s13 = sshll.u32 (!%p312_p2), %s4640_s12, 4  ;;  %s4645_s17 = sshll.u32 (!%p312_p2), %s4640_s12, 7 }
   0x7   : > { %315 = sbr.rel (%p312_p2) target bundleno = 1209 (0x4b9), region = 56  ;;  %p364_p3 = scmp.lt.s32.totalorder (!%p312_p2), %s4647_s13, 63 }
   0x8   : > { %p358_p4 = scmp.lt.s32.totalorder (!%p312_p2), %s4645_s17, 511 }
   0xc   : > { %v526_v0 = vlaneseq  ;;  %s6351_s13 = smov (!%p364_p3, %s4647_s13), 63  ;;  %s6353_s17 = smov (!%p358_p4, %s4645_s17), 511  ;;  %vm1549_vm0 = vcmask 261120   ;;  %vm3990_vm1 = vcmask 1041409   ;;  %vm3992_vm2 = vcmask 1042434  }
   0xd   : > { %s4799_s8 = sshll.u32 %s6351_s13, 3  ;;  %s4646_s18 = sshll.u32 %s6353_s17, 3  ;;  %vm3994_vm3 = vcmask 1043459   ;;  %vm3996_vm4 = vcmask 1044484   ;;  %vm3998_vm5 = vcmask 1045509   ;;  %vm4000_vm6 = vcmask 1046534  }
   0xe   : > { %v527_v1 = vshrl.u32 %v526_v0, 7  ;;  %s4805_s16 = scalar_lea.vmem %s6341_s1, %s4799_s8  ;;  %s4817_s21 = scalar_lea.vmem %s6340_s0, %s4646_s18  ;;  %vm4002_vm7 = vcmask 1047559   ;;  %vm4460_vm8 = vcmask 64512   ;;  %vm4379_vm9 = vcmask 130048  }
   0xf   : > { %v509_v2 = vld [vmem:[%s4805_s16] sm:$0xff]  ;;  %v510_v9 = vld [vmem:[%s4805_s16 + $0x8] sm:$0xff]  ;;  %v511_v19 = vld [vmem:[%s4805_s16 + $0x10] sm:$0xff]  ;;  %s5854_s26 = scalar_lea.vmem %s6342_s2, %s4799_s8  ;;  %s6216_s15 = scalar_lea.vmem %s6349_s9, %s4799_s8  ;;  %vm4543_vm10 = vcmask 7168  }
  0x10   : > { %4705 = vset.pattern.permute.xlu2 %v527_v1  ;;  %4704 = vset.pattern.permute.xlu1 %v527_v1  ;;  %v553_v3 = vperm.slane %v509_v2, 4  ;;  %v539_v4 = vperm.slane %v509_v2, 2  ;;  %v525_v5 = vperm.slane %v509_v2, 0  ;;  %v560_v6 = vperm.slane %v509_v2, 5  ;;  %v512_v29 = vld [vmem:[%s4805_s16 + $0x18] sm:$0xff]  ;;  %v513_v36 = vld [vmem:[%s4805_s16 + $0x20] sm:$0xff] }
  0x11   : > { %4703 = vset.pattern.permute.xlu0 %v527_v1  ;;  %v546_v7 = vperm.slane %v509_v2, 3  ;;  %v532_v8 = vperm.slane %v509_v2, 1  ;;  %v581_v10 = vperm.slane %v510_v9, 0  ;;  %v574_v11 = vperm.slane %v509_v2, 7  ;;  %v385_v43 = vld [vmem:[%s4817_s21 + $0x20] sm:$0xff]  ;;  %v386_v55 = vld [vmem:[%s4817_s21 + $0x28] sm:$0xff] }
  0x12   : > { %v567_v12 = vperm.slane %v509_v2, 6  ;;  %v602_v13 = vperm.slane %v510_v9, 3  ;;  %v595_v14 = vperm.slane %v510_v9, 2  ;;  %v588_v15 = vperm.slane %v510_v9, 1  ;;  %v4824_v56 = vld [vmem:[%s4805_s16 + $0x28] sm:$0xff] }
  0x13   : > { %v623_v16 = vperm.slane %v510_v9, 6  ;;  %v616_v17 = vperm.slane %v510_v9, 5  ;;  %v609_v18 = vperm.slane %v510_v9, 4  ;;  %v644_v20 = vperm.slane %v511_v19, 1 }
  0x14   : > { %v637_v21 = vperm.slane %v511_v19, 0  ;;  %v630_v22 = vperm.slane %v510_v9, 7  ;;  %v665_v23 = vperm.slane %v511_v19, 4  ;;  %v658_v24 = vperm.slane %v511_v19, 3 }
  0x15   : > { %v651_v25 = vperm.slane %v511_v19, 2  ;;  %v686_v26 = vperm.slane %v511_v19, 7  ;;  %v679_v27 = vperm.slane %v511_v19, 6  ;;  %v672_v28 = vperm.slane %v511_v19, 5 }
  0x16   : > { %v707_v30 = vperm.slane %v512_v29, 2  ;;  %v700_v31 = vperm.slane %v512_v29, 1  ;;  %v693_v32 = vperm.slane %v512_v29, 0  ;;  %v728_v33 = vperm.slane %v512_v29, 5 }
  0x17   : > { %v721_v34 = vperm.slane %v512_v29, 4  ;;  %v714_v35 = vperm.slane %v512_v29, 3  ;;  %v749_v37 = vperm.slane %v513_v36, 0  ;;  %v742_v38 = vperm.slane %v512_v29, 7 }
  0x18   : > { %558 = vperm.xlu2 %4705, %v553_v3   ;;  %544 = vperm.xlu1 %4704, %v539_v4   ;;  %v735_v39 = vperm.slane %v512_v29, 6  ;;  %v770_v40 = vperm.slane %v513_v36, 3  ;;  %v763_v41 = vperm.slane %v513_v36, 2  ;;  %v756_v42 = vperm.slane %v513_v36, 1 }
  0x19   : > { %530 = vperm.xlu0 %4703, %v525_v5   ;;  %v791_v46 = vperm.slane %v513_v36, 6  ;;  %v784_v47 = vperm.slane %v513_v36, 5  ;;  %v777_v50 = vperm.slane %v513_v36, 4  ;;  %v812_v63 = vperm.slane %v4824_v56, 1 }
  0x1a   : > { %v805_v0 = vperm.slane %v4824_v56, 0  ;;  %v798_v3 = vperm.slane %v513_v36, 7  ;;  %v854_v36 = vperm.slane %v4824_v56, 7 }
  0x20   : > { %565 = vperm.xlu2 %4705, %v560_v6   ;;  %551 = vperm.xlu1 %4704, %v546_v7  }
  0x21   : > { %537 = vperm.xlu0 %4703, %v532_v8  }
  0x28   : > { %586 = vperm.xlu2 %4705, %v581_v10   ;;  %579 = vperm.xlu1 %4704, %v574_v11  }
  0x29   : > { %572 = vperm.xlu0 %4703, %v567_v12   ;;  %v389_v12 = vld [vmem:[%s4817_s21 + $0x40] sm:$0xff] }
  0x30   : > { %607 = vperm.xlu2 %4705, %v602_v13   ;;  %600 = vperm.xlu1 %4704, %v595_v14  }
  0x31   : > { %593 = vperm.xlu0 %4703, %v588_v15  }
  0x38   : > { %628 = vperm.xlu2 %4705, %v623_v16   ;;  %621 = vperm.xlu1 %4704, %v616_v17  }
  0x39   : > { %614 = vperm.xlu0 %4703, %v609_v18  }
  0x40   : > { %649 = vperm.xlu2 %4705, %v644_v20   ;;  %642 = vperm.xlu1 %4704, %v637_v21   ;;  %v833_v20 = vperm.slane %v4824_v56, 4  ;;  %v826_v21 = vperm.slane %v4824_v56, 3 }
  0x41   : > { %635 = vperm.xlu0 %4703, %v630_v22  }
  0x48   : > { %670 = vperm.xlu2 %4705, %v665_v23   ;;  %663 = vperm.xlu1 %4704, %v658_v24   ;;  %v819_v24 = vperm.slane %v4824_v56, 2 }
  0x49   : > { %656 = vperm.xlu0 %4703, %v651_v25  }
  0x50   : > { %691 = vperm.xlu2 %4705, %v686_v26   ;;  %684 = vperm.xlu1 %4704, %v679_v27   ;;  %v4836_v26 = vld [vmem:[%s4805_s16 + $0x30] sm:$0xff] }
  0x51   : > { %677 = vperm.xlu0 %4703, %v672_v28  }
  0x58   : > { %712 = vperm.xlu2 %4705, %v707_v30   ;;  %705 = vperm.xlu1 %4704, %v700_v31  }
  0x59   : > { %698 = vperm.xlu0 %4703, %v693_v32  }
  0x60   : > { %733 = vperm.xlu2 %4705, %v728_v33   ;;  %726 = vperm.xlu1 %4704, %v721_v34   ;;  %v392_v33 = vld [vmem:[%s4817_s21 + $0x58] sm:$0xff]  ;;  %v383_v34 = vld [vmem:[%s4817_s21 + $0x10] sm:$0xff] }
  0x61   : > { %719 = vperm.xlu0 %4703, %v714_v35   ;;  %v381_v35 = vld [vmem:[%s4817_s21] sm:$0xff] }
  0x68   : > { %754 = vperm.xlu2 %4705, %v749_v37   ;;  %747 = vperm.xlu1 %4704, %v742_v38   ;;  %v847_v37 = vperm.slane %v4824_v56, 6  ;;  %v840_v38 = vperm.slane %v4824_v56, 5 }
  0x69   : > { %740 = vperm.xlu0 %4703, %v735_v39   ;;  %v875_v39 = vperm.slane %v4836_v26, 2 }
  0x70   : > { %775 = vperm.xlu2 %4705, %v770_v40   ;;  %768 = vperm.xlu1 %4704, %v763_v41  }
  0x71   : > { %761 = vperm.xlu0 %4703, %v756_v42  }
  0x72   : > { %v559_v44 = vpop.permute.xlu2 %558 }
  0x73   : > { %v1425_v45 = vmul.f32 %v559_v44, %v385_v43  ;;  %v868_v44 = vperm.slane %v4836_v26, 1 }
  0x75   : > { %v1578_v48 = vsel %vm1549_vm0, %v1425_v45, 0.0  ;;  %v2450_v49 = vmul.f32 %v1425_v45, %v1425_v45  ;;  %v861_v45 = vperm.slane %v4836_v26, 0 }
  0x76   : > { %v1579_v51 = vrot.slane %v1578_v48, 4 }
  0x77   : > { %v2602_v52 = vsel %vm1549_vm0, %v2450_v49, 0.0 }
  0x78   : > { %v1580_v53 = vadd.f32 %v1579_v51, %v1578_v48  ;;  %v2603_v54 = vrot.slane %v2602_v52, 4  ;;  %796 = vperm.xlu2 %4705, %v791_v46   ;;  %789 = vperm.xlu1 %4704, %v784_v47  }
  0x79   : > { %782 = vperm.xlu0 %4703, %v777_v50  }
  0x7a   : > { %v1581_v57 = vrot.slane %v1580_v53, 2  ;;  %v2604_v58 = vadd.f32 %v2603_v54, %v2602_v52  ;;  %v566_v59 = vpop.permute.xlu2 %565 }
  0x7b   : > { %v1426_v60 = vmul.f32 %v566_v59, %v386_v55 }
  0x7c   : > { %v1582_v61 = vadd.f32 %v1581_v57, %v1580_v53  ;;  %v2605_v62 = vrot.slane %v2604_v58, 2 }
  0x7d   : > { %v1585_v1 = vsel %vm1549_vm0, %v1426_v60, 0.0  ;;  %v2451_v2 = vmul.f32 %v1426_v60, %v1426_v60 }
  0x7e   : > { %v1583_v4 = vrot.slane %v1582_v61, 1  ;;  %v2606_v5 = vadd.f32 %v2605_v62, %v2604_v58  ;;  %v1586_v6 = vrot.slane %v1585_v1, 4 }
  0x7f   : > { %v2609_v7 = vsel %vm1549_vm0, %v2451_v2, 0.0 }
  0x80   : > { %v1584_v8 = vadd.f32 %v1583_v4, %v1582_v61  ;;  %v2607_v9 = vrot.slane %v2606_v5, 1  ;;  %v1587_v10 = vadd.f32 %v1586_v6, %v1585_v1  ;;  %v2610_v11 = vrot.slane %v2609_v7, 4  ;;  %817 = vperm.xlu2 %4705, %v812_v63   ;;  %810 = vperm.xlu1 %4704, %v805_v0  }
  0x81   : > { %803 = vperm.xlu0 %4703, %v798_v3  }
  0x82   : > { %v1588_v13 = vrot.slane %v1587_v10, 2  ;;  %v587_v14 = vpop.permute.xlu2 %586  ;;  %v2608_v15 = vadd.f32 %v2607_v9, %v2606_v5  ;;  %v3474_v16 = vmul.f32 %v1584_v8, %v1584_v8  ;;  %v2611_v17 = vadd.f32 %v2610_v11, %v2609_v7  ;;  %v395_v11 = vld [vmem:[%s4817_s21 + $0x70] sm:$0xff] }
  0x83   : > { %v1429_v18 = vmul.f32 %v587_v14, %v389_v12 }
  0x84   : > { %v1589_v19 = vadd.f32 %v1588_v13, %v1587_v10  ;;  %v3602_v27 = vsub.f32 %v3474_v16, %v2608_v15  ;;  %v2612_v28 = vrot.slane %v2611_v17, 2 }
  0x85   : > { %v1606_v22 = vsel %vm1549_vm0, %v1429_v18, 0.0  ;;  %v2454_v23 = vmul.f32 %v1429_v18, %v1429_v18 }
  0x86   : > { %v1607_v25 = vrot.slane %v1606_v22, 4  ;;  %v1590_v30 = vrot.slane %v1589_v19, 1  ;;  %v4848_v46 = vmul.f32 0.5, %v3602_v27  ;;  %v4850_v47 = vadd.f32 %v2612_v28, %v2611_v17 }
  0x87   : > { %v2630_v29 = vsel %vm1549_vm0, %v2454_v23, 0.0 }
  0x88   : > { %v1608_v31 = vadd.f32 %v1607_v25, %v1606_v22  ;;  %v2631_v32 = vrot.slane %v2630_v29, 4  ;;  %838 = vperm.xlu2 %4705, %v833_v20   ;;  %831 = vperm.xlu1 %4704, %v826_v21   ;;  %v4852_v51 = vadd.f32 %v1590_v30, %v1589_v19  ;;  %v2614_v21 = vrot.slane %v4850_v47, 1 }
  0x89   : > { %824 = vperm.xlu0 %4703, %v819_v24  }
  0x8a   : > { %v1609_v40 = vrot.slane %v1608_v31, 2  ;;  %v2632_v41 = vadd.f32 %v2631_v32, %v2630_v29  ;;  %v608_v42 = vpop.permute.xlu2 %607  ;;  %v545_v43 = vpop.permute.xlu1 %544 }
  0x8b   : > { %v1432_v48 = vmul.f32 %v608_v42, %v392_v33  ;;  %v1423_v49 = vmul.f32 %v545_v43, %v383_v34  ;;  %v531_v50 = vpop.permute.xlu0 %530 }
  0x8c   : > { %v1610_v52 = vadd.f32 %v1609_v40, %v1608_v31  ;;  %v2633_v53 = vrot.slane %v2632_v41, 2  ;;  %v1421_v54 = vmul.f32 %v531_v50, %v381_v35 }
  0x8d   : > { %v1627_v55 = vsel %vm1549_vm0, %v1432_v48, 0.0  ;;  %v2457_v56 = vmul.f32 %v1432_v48, %v1432_v48  ;;  %v1564_v57 = vsel %vm1549_vm0, %v1423_v49, 0.0  ;;  %v2448_v58 = vmul.f32 %v1423_v49, %v1423_v49 }
  0x8e   : > { %v1611_v59 = vrot.slane %v1610_v52, 1  ;;  %v2634_v60 = vadd.f32 %v2633_v53, %v2632_v41  ;;  %v1628_v61 = vrot.slane %v1627_v55, 4  ;;  %v1565_v62 = vrot.slane %v1564_v57, 4  ;;  %v384_v53 = vld [vmem:[%s4817_s21 + $0x18] sm:$0xff] }
  0x8f   : > { %v2651_v63 = vsel %vm1549_vm0, %v2457_v56, 0.0  ;;  %v2588_v0 = vsel %vm1549_vm0, %v2448_v58, 0.0  ;;  %v1550_v1 = vsel %vm1549_vm0, %v1421_v54, 0.0  ;;  %v2446_v2 = vmul.f32 %v1421_v54, %v1421_v54 }
  0x90   : > { %v1612_v3 = vadd.f32 %v1611_v59, %v1610_v52  ;;  %v2635_v4 = vrot.slane %v2634_v60, 1  ;;  %v1629_v5 = vadd.f32 %v1628_v61, %v1627_v55  ;;  %v2652_v6 = vrot.slane %v2651_v63, 4  ;;  %859 = vperm.xlu2 %4705, %v854_v36   ;;  %852 = vperm.xlu1 %4704, %v847_v37   ;;  %v382_v59 = vld [vmem:[%s4817_s21 + $0x8] sm:$0xff] }
  0x91   : > { %v1566_v7 = vadd.f32 %v1565_v62, %v1564_v57  ;;  %v2589_v8 = vrot.slane %v2588_v0, 4  ;;  %v1551_v9 = vrot.slane %v1550_v1, 4  ;;  %v2574_v10 = vsel %vm1549_vm0, %v2446_v2, 0.0  ;;  %845 = vperm.xlu0 %4703, %v840_v38  }
  0x92   : > { %v2636_v12 = vadd.f32 %v2635_v4, %v2634_v60  ;;  %v3478_v13 = vmul.f32 %v1612_v3, %v1612_v3  ;;  %v1630_v14 = vrot.slane %v1629_v5, 2  ;;  %v2653_v15 = vadd.f32 %v2652_v6, %v2651_v63  ;;  %v629_v16 = vpop.permute.xlu2 %628  ;;  %v552_v38 = vpop.permute.xlu1 %551 }
  0x93   : > { %v1567_v17 = vrot.slane %v1566_v7, 2  ;;  %v2590_v18 = vadd.f32 %v2589_v8, %v2588_v0  ;;  %v1552_v19 = vadd.f32 %v1551_v9, %v1550_v1  ;;  %v2575_v20 = vrot.slane %v2574_v10, 4  ;;  %v538_v58 = vpop.permute.xlu0 %537 }
  0x94   : > { %v1631_v22 = vadd.f32 %v1630_v14, %v1629_v5  ;;  %v2654_v23 = vrot.slane %v2653_v15, 2  ;;  %v1435_v24 = vmul.f32 %v629_v16, %v395_v11  ;;  %v3606_v30 = vsub.f32 %v3478_v13, %v2636_v12  ;;  %v398_v16 = vld [vmem:[%s4817_s21 + $0x88] sm:$0xff] }
  0x95   : > { %v1568_v25 = vadd.f32 %v1567_v17, %v1566_v7  ;;  %v2591_v27 = vrot.slane %v2590_v18, 2  ;;  %v1553_v28 = vrot.slane %v1552_v19, 2  ;;  %v2576_v29 = vadd.f32 %v2575_v20, %v2574_v10 }
  0x96   : > { %v1632_v31 = vrot.slane %v1631_v22, 1  ;;  %v2655_v32 = vadd.f32 %v2654_v23, %v2653_v15  ;;  %v1648_v33 = vsel %vm1549_vm0, %v1435_v24, 0.0  ;;  %v2460_v43 = vmul.f32 %v1435_v24, %v1435_v24 }
  0x97   : > { %v1569_v34 = vrot.slane %v1568_v25, 1  ;;  %v2592_v35 = vadd.f32 %v2591_v27, %v2590_v18  ;;  %v1554_v36 = vadd.f32 %v1553_v28, %v1552_v19  ;;  %v2577_v37 = vrot.slane %v2576_v29, 2 }
  0x98   : > { %v1633_v40 = vadd.f32 %v1632_v31, %v1631_v22  ;;  %v2656_v41 = vrot.slane %v2655_v32, 1  ;;  %v1649_v42 = vrot.slane %v1648_v33, 4  ;;  %880 = vperm.xlu2 %4705, %v875_v39   ;;  %873 = vperm.xlu1 %4704, %v868_v44   ;;  %v2672_v57 = vsel %vm1549_vm0, %v2460_v43, 0.0  ;;  %v388_v22 = vld [vmem:[%s4817_s21 + $0x38] sm:$0xff] }
  0x99   : > { %v1570_v48 = vadd.f32 %v1569_v34, %v1568_v25  ;;  %v2593_v49 = vrot.slane %v2592_v35, 1  ;;  %v1555_v50 = vrot.slane %v1554_v36, 1  ;;  %v2578_v52 = vadd.f32 %v2577_v37, %v2576_v29  ;;  %866 = vperm.xlu0 %4703, %v861_v45  }
  0x9a   : > { %v2657_v54 = vadd.f32 %v2656_v41, %v2655_v32  ;;  %v3481_v55 = vmul.f32 %v1633_v40, %v1633_v40  ;;  %v1650_v56 = vadd.f32 %v1649_v42, %v1648_v33  ;;  %v4873_v44 = vadd.f32 %v2614_v21, %v4850_v47  ;;  %v650_v15 = vpop.permute.xlu2 %649  ;;  %v580_v21 = vpop.permute.xlu1 %579 }
  0x9b   : > { %v2594_v60 = vadd.f32 %v2593_v49, %v2592_v35  ;;  %v3472_v39 = vmul.f32 %v1570_v48, %v1570_v48  ;;  %v1556_v61 = vadd.f32 %v1555_v50, %v1554_v36  ;;  %v2579_v62 = vrot.slane %v2578_v52, 1 }
  0x9c   : > { %v1651_v63 = vrot.slane %v1650_v56, 2  ;;  %v2673_v0 = vrot.slane %v2672_v57, 4  ;;  %v1424_v1 = vmul.f32 %v552_v38, %v384_v53  ;;  %v4877_v45 = vmul.f32 %v4852_v51, %v4852_v51 }
  0x9d   : > { %v4879_v2 = vmul.f32 0.5, %v3606_v30  ;;  %v3609_v3 = vsub.f32 %v3481_v55, %v2657_v54  ;;  %v1422_v4 = vmul.f32 %v538_v58, %v382_v59  ;;  %v3600_v5 = vsub.f32 %v3472_v39, %v2594_v60  ;;  %v573_v54 = vpop.permute.xlu0 %572 }
  0x9e   : > { %v1652_v6 = vadd.f32 %v1651_v63, %v1650_v56  ;;  %v2674_v7 = vadd.f32 %v2673_v0, %v2672_v57  ;;  %v1571_v8 = vsel %vm1549_vm0, %v1424_v1, 0.0  ;;  %v4882_v47 = vadd.f32 %v2579_v62, %v2578_v52  ;;  %v3857_v62 = vld [vmem:[%s6343_s3 + $0x18] sm:$0xff] }
  0x9f   : > { %v4884_v9 = vmul.f32 %v1556_v61, %v1556_v61  ;;  %v1572_v10 = vrot.slane %v1571_v8, 4  ;;  %v2449_v11 = vmul.f32 %v1424_v1, %v1424_v1  ;;  %v1557_v13 = vsel %vm1549_vm0, %v1422_v4, 0.0  ;;  %4153 = vmatpush.msra.mxu0 %v3857_v62  ;;  %4687 = vmatpush.msra.mxu2 %v3857_v62 }
  0xa0   : > { %v1653_v12 = vrot.slane %v1652_v6, 1  ;;  %v2675_v51 = vrot.slane %v2674_v7, 2  ;;  %v2447_v14 = vmul.f32 %v1422_v4, %v1422_v4  ;;  %v4888_v17 = vmul.f32 0.5, %v3609_v3 }
  0xa1   : > { %v1573_v18 = vadd.f32 %v1572_v10, %v1571_v8  ;;  %v2595_v19 = vsel %vm1549_vm0, %v2449_v11, 0.0  ;;  %v1558_v20 = vrot.slane %v1557_v13, 4  ;;  %v4892_v23 = vmul.f32 0.5, %v3600_v5  ;;  %v387_v8 = vld [vmem:[%s4817_s21 + $0x30] sm:$0xff] }
  0xa2   : > { %v4894_v24 = vadd.f32 %v2675_v51, %v2674_v7  ;;  %v2596_v25 = vrot.slane %v2595_v19, 4  ;;  %v2581_v27 = vsel %vm1549_vm0, %v2447_v14, 0.0  ;;  %v1438_v31 = vmul.f32 %v650_v15, %v398_v16  ;;  %v3855_v16 = vld [vmem:[%s6343_s3 + $0x8] sm:$0xff] }
  0xa3   : > { %v1574_v28 = vrot.slane %v1573_v18, 2  ;;  %v1559_v29 = vadd.f32 %v1558_v20, %v1557_v13  ;;  %v2582_v30 = vrot.slane %v2581_v27, 4  ;;  %v3598_v32 = vsub.f32 %v4884_v9, %v4882_v47  ;;  %v3856_v47 = vld [vmem:[%s6343_s3 + $0x10] sm:$0xff] }
  0xa4   : > { %v1654_v33 = vadd.f32 %v1653_v12, %v1652_v6  ;;  %v2597_v34 = vadd.f32 %v2596_v25, %v2595_v19  ;;  %v1428_v35 = vmul.f32 %v580_v21, %v388_v22  ;;  %v1669_v40 = vsel %vm1549_vm0, %v1438_v31, 0.0  ;;  %4154 = vmatpush.msra.mxu0 %v3856_v47  ;;  %4688 = vmatpush.msra.mxu2 %v3856_v47 }
  0xa5   : > { %v1575_v36 = vadd.f32 %v1574_v28, %v1573_v18  ;;  %v1560_v37 = vrot.slane %v1559_v29, 2  ;;  %v2583_v38 = vadd.f32 %v2582_v30, %v2581_v27  ;;  %v2677_v41 = vrot.slane %v4894_v24, 1 }
  0xa6   : > { %v2598_v42 = vrot.slane %v2597_v34, 2  ;;  %v1670_v43 = vrot.slane %v1669_v40, 4  ;;  %v2463_v48 = vmul.f32 %v1438_v31, %v1438_v31  ;;  %v1599_v53 = vsel %vm1549_vm0, %v1428_v35, 0.0  ;;  %4155 = vmatpush.msra.mxu0 %v3855_v16  ;;  %4689 = vmatpush.msra.mxu2 %v3855_v16 }
  0xa7   : > { %v1576_v49 = vrot.slane %v1575_v36, 1  ;;  %v1561_v50 = vadd.f32 %v1560_v37, %v1559_v29  ;;  %v2584_v52 = vrot.slane %v2583_v38, 2  ;;  %v1600_v58 = vrot.slane %v1599_v53, 4  ;;  %v3854_v29 = vld [vmem:[%s6343_s3] sm:$0xff] }
  0xa8   : > { %v2599_v55 = vadd.f32 %v2598_v42, %v2597_v34  ;;  %v1671_v56 = vadd.f32 %v1670_v43, %v1669_v40  ;;  %v2693_v57 = vsel %vm1549_vm0, %v2463_v48, 0.0  ;;  %v2453_v3 = vmul.f32 %v1428_v35, %v1428_v35  ;;  %4156 = vmatpush.msra.mxu0 %v3854_v29  ;;  %4690 = vmatpush.msra.mxu2 %v3854_v29  ;;  %v601_v43 = vpop.permute.xlu1 %600  ;;  %v391_v48 = vld [vmem:[%s4817_s21 + $0x50] sm:$0xff] }
  0xa9   : > { %v1577_v59 = vadd.f32 %v1576_v49, %v1575_v36  ;;  %v1562_v60 = vrot.slane %v1561_v50, 1  ;;  %v2585_v39 = vadd.f32 %v2584_v52, %v2583_v38  ;;  %v2694_v61 = vrot.slane %v2693_v57, 4  ;;  %v671_v36 = vpop.permute.xlu2 %670  ;;  %v390_v49 = vld [vmem:[%s4817_s21 + $0x48] sm:$0xff] }
  0xaa   : > { %v2600_v63 = vrot.slane %v2599_v55, 1  ;;  %v1672_v0 = vrot.slane %v1671_v56, 2  ;;  %v1601_v1 = vadd.f32 %v1600_v58, %v1599_v53  ;;  %v2623_v12 = vsel %vm1549_vm0, %v2453_v3, 0.0 }
  0xab   : > { %v3473_v4 = vmul.f32 %v1577_v59, %v1577_v59  ;;  %v1563_v5 = vadd.f32 %v1562_v60, %v1561_v50  ;;  %v2586_v6 = vrot.slane %v2585_v39, 1  ;;  %v2695_v7 = vadd.f32 %v2694_v61, %v2693_v57 }
  0xac   : > { %v2601_v9 = vadd.f32 %v2600_v63, %v2599_v55  ;;  %v1673_v10 = vadd.f32 %v1672_v0, %v1671_v56  ;;  %v1602_v11 = vrot.slane %v1601_v1, 2  ;;  %v2624_v15 = vrot.slane %v2623_v12, 4  ;;  %v4935_v55 = vld [vmem:[%s4805_s16 + $0x38] sm:$0xff] }
  0xad   : > { %v2587_v51 = vadd.f32 %v2586_v6, %v2585_v39  ;;  %v3471_v13 = vmul.f32 %v1563_v5, %v1563_v5  ;;  %v2696_v14 = vrot.slane %v2695_v7, 2  ;;  %v1427_v21 = vmul.f32 %v573_v54, %v387_v8 }
  0xae   : > { %v3601_v18 = vsub.f32 %v3473_v4, %v2601_v9  ;;  %v1674_v19 = vrot.slane %v1673_v10, 1  ;;  %v1603_v20 = vadd.f32 %v1602_v11, %v1601_v1  ;;  %v2625_v27 = vadd.f32 %v2624_v15, %v2623_v12 }
  0xaf   : > { %v3599_v22 = vsub.f32 %v3471_v13, %v2587_v51  ;;  %v2697_v25 = vadd.f32 %v2696_v14, %v2695_v7  ;;  %v896_v28 = vperm.slane %v4836_v26, 5  ;;  %v4918_v30 = vmul.f32 0.5, %v3598_v32  ;;  %v401_v32 = vld [vmem:[%s4817_s21 + $0xa0] sm:$0xff] }
  0xb0   : > { %v4920_v31 = vmul.f32 %v1654_v33, %v1654_v33  ;;  %v1675_v34 = vadd.f32 %v1674_v19, %v1673_v10  ;;  %v1592_v35 = vsel %vm1549_vm0, %v1427_v21, 0.0  ;;  %v4924_v37 = vadd.f32 %v2677_v41, %v4894_v24  ;;  %v594_v33 = vpop.permute.xlu0 %593 }
  0xb1   : > { %v4926_v38 = vmul.f32 0.5, %v3601_v18  ;;  %v2698_v40 = vrot.slane %v2697_v25, 1  ;;  %v1593_v42 = vrot.slane %v1592_v35, 4  ;;  %901 = vperm.xlu2 %4705, %v896_v28   ;;  %v4931_v50 = vmul.f32 0.5, %v3599_v22 }
  0xb2   : > { %v1604_v52 = vrot.slane %v1603_v20, 1  ;;  %v2452_v53 = vmul.f32 %v1427_v21, %v1427_v21  ;;  %v889_v54 = vperm.slane %v4836_v26, 4  ;;  %v3487_v24 = vmul.f32 %v1675_v34, %v1675_v34 }
  0xb3   : > { %v2626_v41 = vrot.slane %v2625_v27, 2  ;;  %v1594_v56 = vadd.f32 %v1593_v42, %v1592_v35  ;;  %v882_v57 = vperm.slane %v4836_v26, 3  ;;  %v1441_v59 = vmul.f32 %v671_v36, %v401_v32 }
  0xb4   : > { %v2616_v58 = vsel %vm1549_vm0, %v2452_v53, 0.0  ;;  %894 = vperm.xlu1 %4704, %v889_v54   ;;  %v1431_v60 = vmul.f32 %v601_v43, %v391_v48  ;;  %v1430_v39 = vmul.f32 %v594_v33, %v390_v49  ;;  %v2699_v61 = vadd.f32 %v2698_v40, %v2697_v25  ;;  %v404_v53 = vld [vmem:[%s4817_s21 + $0xb8] sm:$0xff] }
  0xb5   : > { %v1595_v62 = vrot.slane %v1594_v56, 2  ;;  %v2617_v63 = vrot.slane %v2616_v58, 4  ;;  %887 = vperm.xlu0 %4703, %v882_v57   ;;  %v917_v0 = vperm.slane %v4935_v55, 0  ;;  %v1690_v1 = vsel %vm1549_vm0, %v1441_v59, 0.0 }
  0xb6   : > { %v2466_v3 = vmul.f32 %v1441_v59, %v1441_v59  ;;  %v1620_v4 = vsel %vm1549_vm0, %v1431_v60, 0.0  ;;  %v2456_v5 = vmul.f32 %v1431_v60, %v1431_v60  ;;  %v4942_v6 = vadd.f32 %v1604_v52, %v1603_v20 }
  0xb7   : > { %v1596_v7 = vadd.f32 %v1595_v62, %v1594_v56  ;;  %v2618_v8 = vadd.f32 %v2617_v63, %v2616_v58  ;;  %v1691_v47 = vrot.slane %v1690_v1, 4  ;;  %v1621_v10 = vrot.slane %v1620_v4, 4 }
  0xb8   : > { %v2714_v9 = vsel %vm1549_vm0, %v2466_v3, 0.0  ;;  %v2644_v11 = vsel %vm1549_vm0, %v2456_v5, 0.0  ;;  %v1613_v12 = vsel %vm1549_vm0, %v1430_v39, 0.0  ;;  %v3615_v51 = vsub.f32 %v3487_v24, %v2699_v61  ;;  %v622_v5 = vpop.permute.xlu1 %621 }
  0xb9   : > { %v1597_v13 = vrot.slane %v1596_v7, 1  ;;  %v1692_v14 = vadd.f32 %v1691_v47, %v1690_v1  ;;  %v2715_v15 = vrot.slane %v2714_v9, 4  ;;  %922 = vperm.xlu2 %4705, %v917_v0   ;;  %v1622_v16 = vadd.f32 %v1621_v10, %v1620_v4 }
  0xba   : > { %v2645_v18 = vrot.slane %v2644_v11, 4  ;;  %v1614_v19 = vrot.slane %v1613_v12, 4  ;;  %v2455_v20 = vmul.f32 %v1430_v39, %v1430_v39  ;;  %v4947_v21 = vadd.f32 %v2626_v41, %v2625_v27  ;;  %v692_v27 = vpop.permute.xlu2 %691 }
  0xbb   : > { %v2619_v22 = vrot.slane %v2618_v8, 2  ;;  %v1693_v25 = vrot.slane %v1692_v14, 2  ;;  %v2716_v28 = vadd.f32 %v2715_v15, %v2714_v9  ;;  %v1623_v29 = vrot.slane %v1622_v16, 2 }
  0xbc   : > { %v2646_v34 = vadd.f32 %v2645_v18, %v2644_v11  ;;  %v1615_v35 = vadd.f32 %v1614_v19, %v1613_v12  ;;  %v2637_v36 = vsel %vm1549_vm0, %v2455_v20, 0.0  ;;  %v4950_v40 = vmul.f32 0.5, %v3615_v51 }
  0xbd   : > { %v1598_v42 = vadd.f32 %v1597_v13, %v1596_v7  ;;  %v1694_v32 = vadd.f32 %v1693_v25, %v1692_v14  ;;  %v2717_v43 = vrot.slane %v2716_v28, 2  ;;  %v1624_v48 = vadd.f32 %v1623_v29, %v1622_v16  ;;  %v394_v7 = vld [vmem:[%s4817_s21 + $0x68] sm:$0xff]  ;;  %v615_v25 = vpop.permute.xlu0 %614 }
  0xbe   : > { %v2647_v33 = vrot.slane %v2646_v34, 2  ;;  %v1616_v49 = vrot.slane %v1615_v35, 2  ;;  %v2638_v52 = vrot.slane %v2637_v36, 4  ;;  %v2620_v54 = vadd.f32 %v2619_v22, %v2618_v8 }
  0xbf   : > { %v1695_v24 = vrot.slane %v1694_v32, 1  ;;  %v2718_v41 = vadd.f32 %v2717_v43, %v2716_v28  ;;  %v910_v56 = vperm.slane %v4836_v26, 7  ;;  %v1625_v57 = vrot.slane %v1624_v48, 1  ;;  %v393_v28 = vld [vmem:[%s4817_s21 + $0x60] sm:$0xff] }
  0xc0   : > { %v2648_v58 = vadd.f32 %v2647_v33, %v2646_v34  ;;  %v1617_v59 = vadd.f32 %v1616_v49, %v1615_v35  ;;  %v2639_v60 = vadd.f32 %v2638_v52, %v2637_v36  ;;  %v903_v62 = vperm.slane %v4836_v26, 6 }
  0xc1   : > { %v1696_v39 = vadd.f32 %v1695_v24, %v1694_v32  ;;  %v2719_v61 = vrot.slane %v2718_v41, 1  ;;  %915 = vperm.xlu1 %4704, %v910_v56   ;;  %v1444_v63 = vmul.f32 %v692_v27, %v404_v53  ;;  %v1626_v0 = vadd.f32 %v1625_v57, %v1624_v48 }
  0xc2   : > { %v2649_v1 = vrot.slane %v2648_v58, 1  ;;  %v1618_v3 = vrot.slane %v1617_v59, 1  ;;  %v2640_v4 = vrot.slane %v2639_v60, 2  ;;  %908 = vperm.xlu0 %4703, %v903_v62   ;;  %v2621_v14 = vrot.slane %v2620_v54, 1 }
  0xc3   : > { %v2720_v8 = vadd.f32 %v2719_v61, %v2718_v41  ;;  %v3490_v47 = vmul.f32 %v1696_v39, %v1696_v39  ;;  %v1711_v9 = vsel %vm1549_vm0, %v1444_v63, 0.0  ;;  %v2469_v10 = vmul.f32 %v1444_v63, %v1444_v63 }
  0xc4   : > { %v2650_v11 = vadd.f32 %v2649_v1, %v2648_v58  ;;  %v3480_v12 = vmul.f32 %v1626_v0, %v1626_v0  ;;  %v1619_v51 = vadd.f32 %v1618_v3, %v1617_v59  ;;  %v2641_v13 = vadd.f32 %v2640_v4, %v2639_v60  ;;  %v713_v0 = vpop.permute.xlu2 %712  ;;  %v407_v1 = vld [vmem:[%s4817_s21 + $0xd0] sm:$0xff] }
  0xc5   : > { %v1712_v26 = vrot.slane %v1711_v9, 4  ;;  %v2735_v15 = vsel %vm1549_vm0, %v2469_v10, 0.0  ;;  %v1434_v16 = vmul.f32 %v622_v5, %v394_v7  ;;  %v4958_v18 = vmul.f32 %v1598_v42, %v1598_v42 }
  0xc6   : > { %v2642_v19 = vrot.slane %v2641_v13, 1  ;;  %v3479_v20 = vmul.f32 %v1619_v51, %v1619_v51  ;;  %v2736_v22 = vrot.slane %v2735_v15, 4  ;;  %v3618_v29 = vsub.f32 %v3490_v47, %v2720_v8  ;;  %v643_v8 = vpop.permute.xlu1 %642  ;;  %v397_v47 = vld [vmem:[%s4817_s21 + $0x80] sm:$0xff] }
  0xc7   : > { %v1713_v34 = vadd.f32 %v1712_v26, %v1711_v9  ;;  %v1641_v35 = vsel %vm1549_vm0, %v1434_v16, 0.0  ;;  %v2459_v36 = vmul.f32 %v1434_v16, %v1434_v16  ;;  %v3608_v32 = vsub.f32 %v3480_v12, %v2650_v11 }
  0xc8   : > { %v2643_v43 = vadd.f32 %v2642_v19, %v2641_v13  ;;  %v2737_v48 = vadd.f32 %v2736_v22, %v2735_v15  ;;  %v1642_v33 = vrot.slane %v1641_v35, 4  ;;  %v1433_v27 = vmul.f32 %v615_v25, %v393_v28 }
  0xc9   : > { %v1714_v49 = vrot.slane %v1713_v34, 2  ;;  %v2665_v52 = vsel %vm1549_vm0, %v2459_v36, 0.0  ;;  %v938_v42 = vperm.slane %v4935_v55, 3  ;;  %v931_v60 = vperm.slane %v4935_v55, 2 }
  0xca   : > { %v3607_v53 = vsub.f32 %v3479_v20, %v2643_v43  ;;  %v2738_v24 = vrot.slane %v2737_v48, 2  ;;  %v1643_v41 = vadd.f32 %v1642_v33, %v1641_v35  ;;  %v2666_v56 = vrot.slane %v2665_v52, 4 }
  0xcb   : > { %v1715_v57 = vadd.f32 %v1714_v49, %v1713_v34  ;;  %v1634_v58 = vsel %vm1549_vm0, %v1433_v27, 0.0  ;;  %v2458_v59 = vmul.f32 %v1433_v27, %v1433_v27  ;;  %943 = vperm.xlu2 %4705, %v938_v42   ;;  %v4966_v39 = vadd.f32 %v2621_v14, %v2620_v54  ;;  %936 = vperm.xlu1 %4704, %v931_v60  }
  0xcc   : > { %v4968_v61 = vmul.f32 0.5, %v3618_v29  ;;  %v1644_v62 = vrot.slane %v1643_v41, 2  ;;  %v2667_v63 = vadd.f32 %v2666_v56, %v2665_v52  ;;  %v4971_v3 = vadd.f32 %v2738_v24, %v2737_v48  ;;  %v396_v24 = vld [vmem:[%s4817_s21 + $0x78] sm:$0xff] }
  0xcd   : > { %v1635_v4 = vrot.slane %v1634_v58, 4  ;;  %v2658_v5 = vsel %vm1549_vm0, %v2458_v59, 0.0  ;;  %v924_v7 = vperm.slane %v4935_v55, 1  ;;  %v4976_v9 = vmul.f32 0.5, %v3608_v32 }
  0xce   : > { %v1645_v54 = vadd.f32 %v1644_v62, %v1643_v41  ;;  %v2668_v10 = vrot.slane %v2667_v63, 2  ;;  %v2659_v11 = vrot.slane %v2658_v5, 4  ;;  %v4978_v12 = vmul.f32 0.5, %v3607_v53  ;;  %v636_v53 = vpop.permute.xlu0 %635 }
  0xcf   : > { %v1716_v51 = vrot.slane %v1715_v57, 1  ;;  %v1636_v13 = vadd.f32 %v1635_v4, %v1634_v58  ;;  %929 = vperm.xlu0 %4703, %v924_v7   ;;  %v1447_v14 = vmul.f32 %v713_v0, %v407_v1  ;;  %v1437_v19 = vmul.f32 %v643_v8, %v397_v47 }
  0xd0   : > { %v1646_v26 = vrot.slane %v1645_v54, 1  ;;  %v2669_v15 = vadd.f32 %v2668_v10, %v2667_v63  ;;  %v2660_v16 = vadd.f32 %v2659_v11, %v2658_v5  ;;  %v2740_v20 = vrot.slane %v4971_v3, 1 }
  0xd1   : > { %v1637_v22 = vrot.slane %v1636_v13, 2  ;;  %v1732_v25 = vsel %vm1549_vm0, %v1447_v14, 0.0  ;;  %v2472_v28 = vmul.f32 %v1447_v14, %v1447_v14  ;;  %v1662_v48 = vsel %vm1549_vm0, %v1437_v19, 0.0 }
  0xd2   : > { %v1647_v29 = vadd.f32 %v1646_v26, %v1645_v54  ;;  %v2670_v34 = vrot.slane %v2669_v15, 1  ;;  %v2661_v35 = vrot.slane %v2660_v16, 2  ;;  %v1733_v36 = vrot.slane %v1732_v25, 4 }
  0xd3   : > { %v1638_v32 = vadd.f32 %v1637_v22, %v1636_v13  ;;  %v2756_v43 = vsel %vm1549_vm0, %v2472_v28, 0.0  ;;  %v2462_v33 = vmul.f32 %v1437_v19, %v1437_v19  ;;  %v1717_v49 = vadd.f32 %v1716_v51, %v1715_v57 }
  0xd4   : > { %v2671_v52 = vadd.f32 %v2670_v34, %v2669_v15  ;;  %v2662_v27 = vadd.f32 %v2661_v35, %v2660_v16  ;;  %v1734_v42 = vadd.f32 %v1733_v36, %v1732_v25  ;;  %v2757_v56 = vrot.slane %v2756_v43, 4 }
  0xd5   : > { %v1639_v41 = vrot.slane %v1638_v32, 1  ;;  %v1663_v58 = vrot.slane %v1662_v48, 4  ;;  %v2686_v59 = vsel %vm1549_vm0, %v2462_v33, 0.0  ;;  %v3483_v60 = vmul.f32 %v1647_v29, %v1647_v29 }
  0xd6   : > { %v2663_v62 = vrot.slane %v2662_v27, 1  ;;  %v1735_v63 = vrot.slane %v1734_v42, 2  ;;  %v2687_v0 = vrot.slane %v2686_v59, 4  ;;  %v2758_v4 = vadd.f32 %v2757_v56, %v2756_v43 }
  0xd7   : > { %v1640_v1 = vadd.f32 %v1639_v41, %v1638_v32  ;;  %v1664_v5 = vadd.f32 %v1663_v58, %v1662_v48  ;;  %v1436_v7 = vmul.f32 %v636_v53, %v396_v24  ;;  %v4986_v57 = vmul.f32 %v1717_v49, %v1717_v49 }
  0xd8   : > { %v2664_v8 = vadd.f32 %v2663_v62, %v2662_v27  ;;  %v1736_v47 = vadd.f32 %v1735_v63, %v1734_v42  ;;  %v2688_v54 = vadd.f32 %v2687_v0, %v2686_v59  ;;  %v2759_v11 = vrot.slane %v2758_v4, 2 }
  0xd9   : > { %v3482_v10 = vmul.f32 %v1640_v1, %v1640_v1  ;;  %v1665_v51 = vrot.slane %v1664_v5, 2  ;;  %v1655_v13 = vsel %vm1549_vm0, %v1436_v7, 0.0  ;;  %v2461_v16 = vmul.f32 %v1436_v7, %v1436_v7 }
  0xda   : > { %v1737_v14 = vrot.slane %v1736_v47, 1  ;;  %v2689_v26 = vrot.slane %v2688_v54, 2  ;;  %v1656_v15 = vrot.slane %v1655_v13, 4  ;;  %v3611_v19 = vsub.f32 %v3483_v60, %v2671_v52 }
  0xdb   : > { %v2760_v22 = vadd.f32 %v2759_v11, %v2758_v4  ;;  %v1666_v25 = vadd.f32 %v1665_v51, %v1664_v5  ;;  %v2628_v28 = vrot.slane %v4947_v21, 1  ;;  %v2679_v36 = vsel %vm1549_vm0, %v2461_v16, 0.0  ;;  %v734_v5 = vpop.permute.xlu2 %733  ;;  %v400_v51 = vld [vmem:[%s4817_s21 + $0x98] sm:$0xff]  ;;  %v399_v16 = vld [vmem:[%s4817_s21 + $0x90] sm:$0xff] }
  0xdc   : > { %v1738_v29 = vadd.f32 %v1737_v14, %v1736_v47  ;;  %v2690_v34 = vadd.f32 %v2689_v26, %v2688_v54  ;;  %v1657_v35 = vadd.f32 %v1656_v15, %v1655_v13  ;;  %v3610_v32 = vsub.f32 %v3482_v10, %v2664_v8  ;;  %v657_v15 = vpop.permute.xlu0 %656 }
  0xdd   : > { %v2761_v43 = vrot.slane %v2760_v22, 1  ;;  %v1667_v48 = vrot.slane %v1666_v25, 1  ;;  %v2680_v33 = vrot.slane %v2679_v36, 4  ;;  %v2629_v53 = vadd.f32 %v2628_v28, %v4947_v21 }
  0xde   : > { %v3496_v49 = vmul.f32 %v1738_v29, %v1738_v29  ;;  %v2691_v27 = vrot.slane %v2690_v34, 1  ;;  %v1658_v42 = vrot.slane %v1657_v35, 2  ;;  %v3477_v56 = vmul.f32 %v4942_v6, %v4942_v6 }
  0xdf   : > { %v2762_v24 = vadd.f32 %v2761_v43, %v2760_v22  ;;  %v1668_v52 = vadd.f32 %v1667_v48, %v1666_v25  ;;  %v2681_v41 = vadd.f32 %v2680_v33, %v2679_v36  ;;  %v3603_v60 = vsub.f32 %v4877_v45, %v4873_v44 }
  0xe0   : > { %v2692_v58 = vadd.f32 %v2691_v27, %v2690_v34  ;;  %v1659_v59 = vadd.f32 %v1658_v42, %v1657_v35  ;;  %v3604_v62 = vsub.f32 %v4958_v18, %v4966_v39  ;;  %v3605_v4 = vsub.f32 %v3477_v56, %v2629_v53 }
  0xe1   : > { %v3624_v63 = vsub.f32 %v3496_v49, %v2762_v24  ;;  %v3486_v0 = vmul.f32 %v1668_v52, %v1668_v52  ;;  %v2682_v1 = vrot.slane %v2681_v41, 2  ;;  %v4998_v21 = vmul.f32 0.5, %v3611_v19  ;;  %v5022_v19 = vld [vmem:[%s4805_s16 + $0x40] sm:$0xff] }
  0xe2   : > { %v5000_v7 = vmul.f32 0.5, %v3610_v32  ;;  %v1660_v8 = vrot.slane %v1659_v59, 1  ;;  %v3991_v6 = vsel %vm3990_vm1, %v4931_v50, %v4918_v30  ;;  %v3731_v18 = vmul.f32 0.5, %v3603_v60  ;;  %v410_v30 = vld [vmem:[%s4817_s21 + $0xe8] sm:$0xff]  ;;  %v664_v50 = vpop.permute.xlu1 %663 }
  0xe3   : > { %v3614_v44 = vsub.f32 %v3486_v0, %v2692_v58  ;;  %v5005_v45 = vadd.f32 %v2682_v1, %v2681_v41  ;;  %v3732_v39 = vmul.f32 0.5, %v3604_v62  ;;  %v5007_v47 = vmul.f32 0.5, %v3624_v63  ;;  %v755_v52 = vpop.permute.xlu2 %754  ;;  %v413_v41 = vld [vmem:[%s4817_s21 + $0x100] sm:$0xff] }
  0xe4   : > { %v5009_v54 = vadd.f32 %v1660_v8, %v1659_v59  ;;  %v3733_v10 = vmul.f32 0.5, %v3605_v4  ;;  %v3993_v11 = vsel %vm3992_vm2, %v4892_v23, %v3991_v6  ;;  %v959_v23 = vperm.slane %v4935_v55, 6 }
  0xe5   : > { %v5015_v13 = vmul.f32 0.5, %v3614_v44  ;;  %v2684_v14 = vrot.slane %v5005_v45, 1  ;;  %v3995_v26 = vsel %vm3994_vm3, %v4926_v38, %v3993_v11  ;;  %v952_v25 = vperm.slane %v4935_v55, 5 }
  0xe6   : > { %v3997_v22 = vsel %vm3996_vm4, %v4848_v46, %v3995_v26  ;;  %v945_v29 = vperm.slane %v4935_v55, 4  ;;  %v1450_v34 = vmul.f32 %v734_v5, %v410_v30  ;;  %v1440_v35 = vmul.f32 %v664_v50, %v400_v51  ;;  %964 = vperm.xlu2 %4705, %v959_v23  }
  0xe7   : > { %v3999_v28 = vsel %vm3998_vm5, %v3731_v18, %v3997_v22  ;;  %957 = vperm.xlu1 %4704, %v952_v25   ;;  %v1439_v36 = vmul.f32 %v657_v15, %v399_v16  ;;  %v980_v32 = vperm.slane %v5022_v19, 1  ;;  %v973_v46 = vperm.slane %v5022_v19, 0 }
  0xe8   : > { %v4001_v38 = vsel %vm4000_vm6, %v3732_v39, %v3999_v28  ;;  %950 = vperm.xlu0 %4703, %v945_v29   ;;  %v1753_v48 = vsel %vm1549_vm0, %v1450_v34, 0.0  ;;  %v2475_v33 = vmul.f32 %v1450_v34, %v1450_v34  ;;  %v1683_v49 = vsel %vm1549_vm0, %v1440_v35, 0.0 }
  0xe9   : > { %v4003_v43 = vsel %vm4002_vm7, %v3733_v10, %v4001_v38  ;;  %v1754_v27 = vrot.slane %v1753_v48, 4  ;;  %v1684_v42 = vrot.slane %v1683_v49, 4  ;;  %v2465_v53 = vmul.f32 %v1440_v35, %v1440_v35 }
  0xea   : > { %4653 = vmatmul.msk.f32.vlgmr.msra.gmra.mxu0 %vm1549_vm0, %v4003_v43  ;;  %v1676_v24 = vsel %vm1549_vm0, %v1439_v36, 0.0  ;;  %v2777_v56 = vsel %vm1549_vm0, %v2475_v33, 0.0  ;;  %v2464_v59 = vmul.f32 %v1439_v36, %v1439_v36  ;;  %v966_v60 = vperm.slane %v4935_v55, 7 }
  0xeb   : > { %v1677_v58 = vrot.slane %v1676_v24, 4  ;;  %v1755_v62 = vadd.f32 %v1754_v27, %v1753_v48  ;;  %v2778_v63 = vrot.slane %v2777_v56, 4  ;;  %v1685_v0 = vadd.f32 %v1684_v42, %v1683_v49 }
  0xec   : > { %v2707_v1 = vsel %vm1549_vm0, %v2465_v53, 0.0  ;;  %v2700_v8 = vsel %vm1549_vm0, %v2464_v59, 0.0  ;;  %v1453_v6 = vmul.f32 %v755_v52, %v413_v41  ;;  %v685_v41 = vpop.permute.xlu1 %684  ;;  %v402_v59 = vld [vmem:[%s4817_s21 + $0xa8] sm:$0xff] }
  0xed   : > { %v2708_v4 = vrot.slane %v2707_v1, 4  ;;  %v1678_v5 = vadd.f32 %v1677_v58, %v1676_v24  ;;  %v1756_v44 = vrot.slane %v1755_v62, 2  ;;  %v2779_v18 = vadd.f32 %v2778_v63, %v2777_v56  ;;  %v403_v56 = vld [vmem:[%s4817_s21 + $0xb0] sm:$0xff]  ;;  %v678_v58 = vpop.permute.xlu0 %677 }
  0xee   : > { %v1686_v39 = vrot.slane %v1685_v0, 2  ;;  %v2701_v10 = vrot.slane %v2700_v8, 4  ;;  %v1774_v50 = vsel %vm1549_vm0, %v1453_v6, 0.0  ;;  %v2478_v51 = vmul.f32 %v1453_v6, %v1453_v6  ;;  %985 = vperm.xlu2 %4705, %v980_v32  }
  0xef   : > { %v2709_v11 = vadd.f32 %v2708_v4, %v2707_v1  ;;  %v1679_v30 = vrot.slane %v1678_v5, 2  ;;  %v1757_v55 = vadd.f32 %v1756_v44, %v1755_v62  ;;  %v2780_v26 = vrot.slane %v2779_v18, 2  ;;  %978 = vperm.xlu1 %4704, %v973_v46  }
  0xf0   : > { %v1687_v15 = vadd.f32 %v1686_v39, %v1685_v0  ;;  %v2702_v16 = vadd.f32 %v2701_v10, %v2700_v8  ;;  %971 = vperm.xlu0 %4703, %v966_v60   ;;  %v1775_v25 = vrot.slane %v1774_v50, 4  ;;  %v2798_v28 = vsel %vm1549_vm0, %v2478_v51, 0.0 }
  0xf1   : > { %v2710_v22 = vrot.slane %v2709_v11, 2  ;;  %v1680_v23 = vadd.f32 %v1679_v30, %v1678_v5  ;;  %v1758_v29 = vrot.slane %v1757_v55, 1  ;;  %v2781_v34 = vadd.f32 %v2780_v26, %v2779_v18 }
  0xf2   : > { %v1688_v35 = vrot.slane %v1687_v15, 1  ;;  %v2703_v38 = vrot.slane %v2702_v16, 2  ;;  %v1776_v48 = vadd.f32 %v1775_v25, %v1774_v50  ;;  %v2799_v33 = vrot.slane %v2798_v28, 4 }
  0xf3   : > { %v2711_v36 = vadd.f32 %v2710_v22, %v2709_v11  ;;  %v1681_v43 = vrot.slane %v1680_v23, 1  ;;  %v1759_v49 = vadd.f32 %v1758_v29, %v1757_v55  ;;  %v2782_v27 = vrot.slane %v2781_v34, 1 }
  0xf4   : > { %v1689_v32 = vadd.f32 %v1688_v35, %v1687_v15  ;;  %v2704_v46 = vadd.f32 %v2703_v38, %v2702_v16  ;;  %v1777_v24 = vrot.slane %v1776_v48, 2  ;;  %v2800_v52 = vadd.f32 %v2799_v33, %v2798_v28 }
  0xf5   : > { %v2712_v42 = vrot.slane %v2711_v36, 1  ;;  %v1682_v53 = vadd.f32 %v1681_v43, %v1680_v23  ;;  %v2783_v60 = vadd.f32 %v2782_v27, %v2781_v34  ;;  %v3499_v62 = vmul.f32 %v1759_v49, %v1759_v49 }
  0xf6   : > { %v3489_v63 = vmul.f32 %v1689_v32, %v1689_v32  ;;  %v2705_v0 = vrot.slane %v2704_v46, 1  ;;  %v1778_v5 = vadd.f32 %v1777_v24, %v1776_v48  ;;  %v2801_v8 = vrot.slane %v2800_v52, 2 }
  0xf7   : > { %v2713_v1 = vadd.f32 %v2712_v42, %v2711_v36  ;;  %v5047_v4 = vmul.f32 %v1682_v53, %v1682_v53  ;;  %v3627_v6 = vsub.f32 %v3499_v62, %v2783_v60  ;;  %v1443_v18 = vmul.f32 %v685_v41, %v403_v56  ;;  %v416_v62 = vld [vmem:[%s4817_s21 + $0x118] sm:$0xff] }
  0xf8   : > { %v5049_v44 = vadd.f32 %v2705_v0, %v2704_v46  ;;  %v1442_v39 = vmul.f32 %v678_v58, %v402_v59  ;;  %v3485_v10 = vmul.f32 %v5009_v54, %v5009_v54  ;;  %v1779_v11 = vrot.slane %v1778_v5, 1 }
  0xf9   : > { %v2802_v30 = vadd.f32 %v2801_v8, %v2800_v52  ;;  %v1001_v50 = vperm.slane %v5022_v19, 4  ;;  %v5057_v51 = vsel %vm3990_vm1, %v4950_v40, %v5015_v13  ;;  %v3617_v55 = vsub.f32 %v3489_v63, %v2713_v1  ;;  %v776_v52 = vpop.permute.xlu2 %775 }
  0xfa   : > { %v1704_v26 = vsel %vm1549_vm0, %v1443_v18, 0.0  ;;  %v2468_v15 = vmul.f32 %v1443_v18, %v1443_v18  ;;  %v5060_v16 = vmul.f32 0.5, %v3627_v6  ;;  %v1780_v22 = vadd.f32 %v1779_v11, %v1778_v5 }
  0xfb   : > { %v2803_v23 = vrot.slane %v2802_v30, 1  ;;  %v1705_v25 = vrot.slane %v1704_v26, 4  ;;  %1006 = vperm.xlu2 %4705, %v1001_v50   ;;  %v3616_v54 = vsub.f32 %v5047_v4, %v5049_v44  ;;  %v1697_v29 = vsel %vm1549_vm0, %v1442_v39, 0.0  ;;  %v706_v50 = vpop.permute.xlu1 %705 }
  0xfc   : > { %v2728_v28 = vsel %vm1549_vm0, %v2468_v15, 0.0  ;;  %v2467_v34 = vmul.f32 %v1442_v39, %v1442_v39  ;;  %v3502_v13 = vmul.f32 %v1780_v22, %v1780_v22  ;;  %v1698_v36 = vrot.slane %v1697_v29, 4  ;;  %v405_v15 = vld [vmem:[%s4817_s21 + $0xc0] sm:$0xff] }
  0xfd   : > { %v2804_v40 = vadd.f32 %v2803_v23, %v2802_v30  ;;  %v1706_v35 = vadd.f32 %v1705_v25, %v1704_v26  ;;  %v2729_v38 = vrot.slane %v2728_v28, 4  ;;  %v994_v48 = vperm.slane %v5022_v19, 3  ;;  %v699_v26 = vpop.permute.xlu0 %698 }
  0xfe   : > { %v2721_v43 = vsel %vm1549_vm0, %v2467_v34, 0.0  ;;  %v987_v33 = vperm.slane %v5022_v19, 2  ;;  %v5069_v49 = vmul.f32 0.5, %v3617_v55  ;;  %v1699_v42 = vadd.f32 %v1698_v36, %v1697_v29  ;;  %v406_v55 = vld [vmem:[%s4817_s21 + $0xc8] sm:$0xff] }
  0xff   : > { %v1707_v27 = vrot.slane %v1706_v35, 2  ;;  %v2730_v32 = vadd.f32 %v2729_v38, %v2728_v28  ;;  %v2722_v46 = vrot.slane %v2721_v43, 4  ;;  %999 = vperm.xlu1 %4704, %v994_v48   ;;  %v2685_v53 = vadd.f32 %v2684_v14, %v5005_v45 }
 0x100   : > { %992 = vperm.xlu0 %4703, %v987_v33   ;;  %v3612_v24 = vsub.f32 %v4920_v31, %v4924_v37  ;;  %v1022_v41 = vperm.slane %v5022_v19, 7  ;;  %v3630_v56 = vsub.f32 %v3502_v13, %v2804_v40  ;;  %v1700_v63 = vrot.slane %v1699_v42, 2  ;;  %v419_v33 = vld [vmem:[%s4817_s21 + $0x130] sm:$0xff] }
 0x101   : > { %v1708_v58 = vadd.f32 %v1707_v27, %v1706_v35  ;;  %v2731_v59 = vrot.slane %v2730_v32, 2  ;;  %v2723_v60 = vadd.f32 %v2722_v46, %v2721_v43  ;;  %v3613_v0 = vsub.f32 %v3485_v10, %v2685_v53  ;;  %v797_v48 = vpop.permute.xlu2 %796 }
 0x102   : > { %v3740_v1 = vmul.f32 0.5, %v3612_v24  ;;  %v4004_v4 = vsel %vm3990_vm1, %v4978_v12, %v4879_v2  ;;  %v1701_v37 = vadd.f32 %v1700_v63, %v1699_v42  ;;  %v1456_v44 = vmul.f32 %v776_v52, %v416_v62 }
 0x103   : > { %v1709_v5 = vrot.slane %v1708_v58, 1  ;;  %v2732_v45 = vadd.f32 %v2731_v59, %v2730_v32  ;;  %v2724_v14 = vrot.slane %v2723_v60, 2  ;;  %v4005_v31 = vsel %vm3992_vm2, %v4976_v9, %v4004_v4  ;;  %1027 = vperm.xlu2 %4705, %v1022_v41  }
 0x104   : > { %v3741_v8 = vmul.f32 0.5, %v3613_v0  ;;  %v4006_v6 = vsel %vm3994_vm3, %v4888_v17, %v4005_v31  ;;  %v1702_v12 = vrot.slane %v1701_v37, 1  ;;  %v1795_v9 = vsel %vm1549_vm0, %v1456_v44, 0.0 }
 0x105   : > { %v1710_v18 = vadd.f32 %v1709_v5, %v1708_v58  ;;  %v2733_v39 = vrot.slane %v2732_v45, 1  ;;  %v2725_v10 = vadd.f32 %v2724_v14, %v2723_v60  ;;  %v4007_v2 = vsel %vm3996_vm4, %v5000_v7, %v4006_v6 }
 0x106   : > { %v4008_v11 = vsel %vm3998_vm5, %v4998_v21, %v4007_v2  ;;  %v2481_v30 = vmul.f32 %v1456_v44, %v1456_v44  ;;  %v5092_v22 = vmul.f32 0.5, %v3616_v54  ;;  %v5094_v17 = vmul.f32 0.5, %v3630_v56 }
 0x107   : > { %v5096_v23 = vadd.f32 %v2733_v39, %v2732_v45  ;;  %v4009_v7 = vsel %vm4000_vm6, %v3740_v1, %v4008_v11  ;;  %v2726_v25 = vrot.slane %v2725_v10, 1  ;;  %v1796_v21 = vrot.slane %v1795_v9, 4 }
 0x108   : > { %v4010_v28 = vsel %vm4002_vm7, %v3741_v8, %v4009_v7  ;;  %v2819_v29 = vsel %vm1549_vm0, %v2481_v30, 0.0  ;;  %v5101_v34 = vmul.f32 %v1710_v18, %v1710_v18  ;;  %v1446_v54 = vmul.f32 %v706_v50, %v406_v55  ;;  %v409_v30 = vld [vmem:[%s4817_s21 + $0xe0] sm:$0xff] }
 0x109   : > { %4654 = vmatmul.msk.f32.gmra.mxu0 %vm1549_vm0, %v4010_v28  ;;  %v2820_v40 = vrot.slane %v2819_v29, 4  ;;  %v1445_v13 = vmul.f32 %v699_v26, %v405_v15  ;;  %v1703_v35 = vadd.f32 %v1702_v12, %v1701_v37  ;;  %v1797_v38 = vadd.f32 %v1796_v21, %v1795_v9  ;;  %v727_v9 = vpop.permute.xlu1 %726 }
 0x10a   : > { %v1015_v36 = vperm.slane %v5022_v19, 6  ;;  %v1008_v43 = vperm.slane %v5022_v19, 5  ;;  %v1725_v32 = vsel %vm1549_vm0, %v1446_v54, 0.0  ;;  %v2471_v46 = vmul.f32 %v1446_v54, %v1446_v54 }
 0x10b   : > { %v2821_v27 = vadd.f32 %v2820_v40, %v2819_v29  ;;  %v1718_v42 = vsel %vm1549_vm0, %v1445_v13, 0.0  ;;  %v5109_v53 = vadd.f32 %v2726_v25, %v2725_v10  ;;  %v1798_v24 = vrot.slane %v1797_v38, 2 }
 0x10c   : > { %v1726_v52 = vrot.slane %v1725_v32, 4  ;;  %v1719_v41 = vrot.slane %v1718_v42, 4  ;;  %1020 = vperm.xlu1 %4704, %v1015_v36   ;;  %1013 = vperm.xlu0 %4703, %v1008_v43   ;;  %v2749_v58 = vsel %vm1549_vm0, %v2471_v46, 0.0  ;;  %v2470_v59 = vmul.f32 %v1445_v13, %v1445_v13 }
 0x10d   : > { %v2822_v56 = vrot.slane %v2821_v27, 2  ;;  %v1459_v19 = vmul.f32 %v797_v48, %v419_v33  ;;  %v3491_v60 = vmul.f32 %v1703_v35, %v1703_v35  ;;  %v1799_v62 = vadd.f32 %v1798_v24, %v1797_v38  ;;  %v720_v35 = vpop.permute.xlu0 %719 }
 0x10e   : > { %v1727_v63 = vadd.f32 %v1726_v52, %v1725_v32  ;;  %v2750_v0 = vrot.slane %v2749_v58, 4  ;;  %v1720_v4 = vadd.f32 %v1719_v41, %v1718_v42  ;;  %v2742_v5 = vsel %vm1549_vm0, %v2470_v59, 0.0  ;;  %v408_v42 = vld [vmem:[%s4817_s21 + $0xd8] sm:$0xff] }
 0x10f   : > { %v2823_v1 = vadd.f32 %v2822_v56, %v2821_v27  ;;  %v1816_v45 = vsel %vm1549_vm0, %v1459_v19, 0.0  ;;  %v1800_v14 = vrot.slane %v1799_v62, 1  ;;  %v2743_v8 = vrot.slane %v2742_v5, 4 }
 0x110   : > { %v1728_v31 = vrot.slane %v1727_v63, 2  ;;  %v2751_v37 = vadd.f32 %v2750_v0, %v2749_v58  ;;  %v1721_v44 = vrot.slane %v1720_v4, 2  ;;  %v1817_v18 = vrot.slane %v1816_v45, 4  ;;  %v5120_v58 = vld [vmem:[%s4805_s16 + $0x48] sm:$0xff] }
 0x111   : > { %v2824_v6 = vrot.slane %v2823_v1, 1  ;;  %v2484_v39 = vmul.f32 %v1459_v19, %v1459_v19  ;;  %v1801_v10 = vadd.f32 %v1800_v14, %v1799_v62  ;;  %v2744_v11 = vadd.f32 %v2743_v8, %v2742_v5 }
 0x112   : > { %v1729_v2 = vadd.f32 %v1728_v31, %v1727_v63  ;;  %v2752_v12 = vrot.slane %v2751_v37, 2  ;;  %v1722_v55 = vadd.f32 %v1721_v44, %v1720_v4  ;;  %v1818_v26 = vadd.f32 %v1817_v18, %v1816_v45 }
 0x113   : > { %v2825_v50 = vadd.f32 %v2824_v6, %v2823_v1  ;;  %v2840_v15 = vsel %vm1549_vm0, %v2484_v39, 0.0  ;;  %v3505_v7 = vmul.f32 %v1801_v10, %v1801_v10  ;;  %v2745_v21 = vrot.slane %v2744_v11, 2 }
 0x114   : > { %v1730_v25 = vrot.slane %v1729_v2, 1  ;;  %v2753_v28 = vadd.f32 %v2752_v12, %v2751_v37  ;;  %v1723_v29 = vrot.slane %v1722_v55, 1  ;;  %v1819_v40 = vrot.slane %v1818_v26, 2  ;;  %v422_v12 = vld [vmem:[%s4817_s21 + $0x148] sm:$0xff] }
 0x115   : > { %v2841_v54 = vrot.slane %v2840_v15, 4  ;;  %v1449_v13 = vmul.f32 %v727_v9, %v409_v30  ;;  %v3619_v38 = vsub.f32 %v3491_v60, %v5109_v53  ;;  %v2746_v48 = vadd.f32 %v2745_v21, %v2744_v11  ;;  %v741_v21 = vpop.permute.xlu0 %740 }
 0x116   : > { %v1731_v36 = vadd.f32 %v1730_v25, %v1729_v2  ;;  %v2754_v43 = vrot.slane %v2753_v28, 1  ;;  %v1724_v33 = vadd.f32 %v1723_v29, %v1722_v55  ;;  %v1820_v27 = vadd.f32 %v1819_v40, %v1818_v26  ;;  %v818_v2 = vpop.permute.xlu2 %817  ;;  %v748_v55 = vpop.permute.xlu1 %747  ;;  %v412_v26 = vld [vmem:[%s4817_s21 + $0xf8] sm:$0xff]  ;;  %v411_v29 = vld [vmem:[%s4817_s21 + $0xf0] sm:$0xff] }
 0x117   : > { %v2842_v32 = vadd.f32 %v2841_v54, %v2840_v15  ;;  %v1746_v46 = vsel %vm1549_vm0, %v1449_v13, 0.0  ;;  %v3633_v24 = vsub.f32 %v3505_v7, %v2825_v50  ;;  %v2747_v56 = vrot.slane %v2746_v48, 1 }
 0x118   : > { %v2755_v52 = vadd.f32 %v2754_v43, %v2753_v28  ;;  %v3495_v41 = vmul.f32 %v1731_v36, %v1731_v36  ;;  %v3494_v59 = vmul.f32 %v1724_v33, %v1724_v33  ;;  %v1821_v19 = vrot.slane %v1820_v27, 1 }
 0x119   : > { %v2843_v62 = vrot.slane %v2842_v32, 2  ;;  %v1747_v63 = vrot.slane %v1746_v46, 4  ;;  %v2748_v60 = vadd.f32 %v2747_v56, %v2746_v48  ;;  %v2474_v0 = vmul.f32 %v1449_v13, %v1449_v13 }
 0x11a   : > { %v3623_v53 = vsub.f32 %v3495_v41, %v2755_v52  ;;  %v1448_v1 = vmul.f32 %v720_v35, %v408_v42  ;;  %v1822_v4 = vadd.f32 %v1821_v19, %v1820_v27  ;;  %v1043_v14 = vperm.slane %v5120_v58, 2 }
 0x11b   : > { %v5122_v5 = vadd.f32 %v2843_v62, %v2842_v32  ;;  %v1748_v45 = vadd.f32 %v1747_v63, %v1746_v46  ;;  %v5125_v31 = vmul.f32 0.5, %v3619_v38  ;;  %v3622_v37 = vsub.f32 %v3494_v59, %v2748_v60 }
 0x11c   : > { %v2770_v8 = vsel %vm1549_vm0, %v2474_v0, 0.0  ;;  %v1739_v6 = vsel %vm1549_vm0, %v1448_v1, 0.0  ;;  %v5129_v44 = vmul.f32 0.5, %v3633_v24  ;;  %v5131_v18 = vmul.f32 0.5, %v3623_v53  ;;  %1048 = vperm.xlu2 %4705, %v1043_v14  }
 0x11d   : > { %v1749_v39 = vrot.slane %v1748_v45, 2  ;;  %v2771_v10 = vrot.slane %v2770_v8, 4  ;;  %v2845_v11 = vrot.slane %v5122_v5, 1  ;;  %v1740_v9 = vrot.slane %v1739_v6, 4 }
 0x11e   : > { %v2473_v30 = vmul.f32 %v1448_v1, %v1448_v1  ;;  %v1036_v50 = vperm.slane %v5120_v58, 1  ;;  %v5137_v15 = vmul.f32 %v1822_v4, %v1822_v4  ;;  %v1029_v28 = vperm.slane %v5120_v58, 0 }
 0x11f   : > { %v1750_v7 = vadd.f32 %v1749_v39, %v1748_v45  ;;  %v2772_v25 = vadd.f32 %v2771_v10, %v2770_v8  ;;  %v3750_v40 = vmul.f32 0.5, %v3622_v37  ;;  %v1741_v54 = vadd.f32 %v1740_v9, %v1739_v6 }
 0x120   : > { %v2763_v13 = vsel %vm1549_vm0, %v2473_v30, 0.0  ;;  %1041 = vperm.xlu1 %4704, %v1036_v50   ;;  %v1462_v35 = vmul.f32 %v818_v2, %v422_v12  ;;  %1034 = vperm.xlu0 %4703, %v1029_v28   ;;  %v1452_v48 = vmul.f32 %v748_v55, %v412_v26  ;;  %v1451_v46 = vmul.f32 %v741_v21, %v411_v29 }
 0x121   : > { %v1751_v38 = vrot.slane %v1750_v7, 1  ;;  %v2773_v36 = vrot.slane %v2772_v25, 2  ;;  %v2764_v43 = vrot.slane %v2763_v13, 4  ;;  %v1742_v33 = vrot.slane %v1741_v54, 2 }
 0x122   : > { %v1837_v27 = vsel %vm1549_vm0, %v1462_v35, 0.0  ;;  %v2487_v32 = vmul.f32 %v1462_v35, %v1462_v35  ;;  %v1767_v19 = vsel %vm1549_vm0, %v1452_v48, 0.0  ;;  %v2477_v62 = vmul.f32 %v1452_v48, %v1452_v48 }
 0x123   : > { %v1752_v42 = vadd.f32 %v1751_v38, %v1750_v7  ;;  %v2774_v24 = vadd.f32 %v2773_v36, %v2772_v25  ;;  %v2765_v52 = vadd.f32 %v2764_v43, %v2763_v13  ;;  %v1838_v41 = vrot.slane %v1837_v27, 4 }
 0x124   : > { %v1743_v56 = vadd.f32 %v1742_v33, %v1741_v54  ;;  %v2861_v59 = vsel %vm1549_vm0, %v2487_v32, 0.0  ;;  %v1768_v45 = vrot.slane %v1767_v19, 4  ;;  %v2791_v14 = vsel %vm1549_vm0, %v2477_v62, 0.0 }
 0x125   : > { %v2775_v63 = vrot.slane %v2774_v24, 1  ;;  %v3498_v53 = vmul.f32 %v1752_v42, %v1752_v42  ;;  %v2766_v60 = vrot.slane %v2765_v52, 2  ;;  %v1839_v0 = vadd.f32 %v1838_v41, %v1837_v27 }
 0x126   : > { %v1744_v1 = vrot.slane %v1743_v56, 1  ;;  %v2862_v4 = vrot.slane %v2861_v59, 4  ;;  %v2792_v39 = vrot.slane %v2791_v14, 4  ;;  %v1769_v12 = vadd.f32 %v1768_v45, %v1767_v19 }
 0x127   : > { %v2776_v37 = vadd.f32 %v2775_v63, %v2774_v24  ;;  %v2767_v8 = vadd.f32 %v2766_v60, %v2765_v52  ;;  %v1840_v6 = vrot.slane %v1839_v0, 2  ;;  %v1760_v9 = vsel %vm1549_vm0, %v1451_v46, 0.0  ;;  %v839_v60 = vpop.permute.xlu2 %838 }
 0x128   : > { %v1745_v10 = vadd.f32 %v1744_v1, %v1743_v56  ;;  %v2863_v2 = vadd.f32 %v2862_v4, %v2861_v59  ;;  %v5148_v30 = vadd.f32 %v2845_v11, %v5122_v5  ;;  %v2793_v26 = vadd.f32 %v2792_v39, %v2791_v14 }
 0x129   : > { %v2768_v50 = vrot.slane %v2767_v8, 1  ;;  %v1841_v55 = vadd.f32 %v1840_v6, %v1839_v0  ;;  %v1770_v28 = vrot.slane %v1769_v12, 2  ;;  %v1761_v21 = vrot.slane %v1760_v9, 4  ;;  %v769_v0 = vpop.permute.xlu1 %768  ;;  %v414_v6 = vld [vmem:[%s4817_s21 + $0x108] sm:$0xff] }
 0x12a   : > { %v3497_v7 = vmul.f32 %v1745_v10, %v1745_v10  ;;  %v2864_v25 = vrot.slane %v2863_v2, 2  ;;  %v3626_v29 = vsub.f32 %v3498_v53, %v2776_v37  ;;  %v2794_v35 = vrot.slane %v2793_v26, 2  ;;  %v425_v37 = vld [vmem:[%s4817_s21 + $0x160] sm:$0xff] }
 0x12b   : > { %v2769_v54 = vadd.f32 %v2768_v50, %v2767_v8  ;;  %v1842_v13 = vrot.slane %v1841_v55, 1  ;;  %v1771_v36 = vadd.f32 %v1770_v28, %v1769_v12  ;;  %v1762_v43 = vadd.f32 %v1761_v21, %v1760_v9  ;;  %v5184_v9 = vld [vmem:[%s4805_s16 + $0x50] sm:$0xff] }
 0x12c   : > { %v2865_v38 = vadd.f32 %v2864_v25, %v2863_v2  ;;  %v2476_v48 = vmul.f32 %v1451_v46, %v1451_v46  ;;  %v5152_v33 = vsel %vm3990_vm1, %v5131_v18, %v3750_v40  ;;  %v2741_v27 = vadd.f32 %v2740_v20, %v4971_v3 }
 0x12d   : > { %v3625_v5 = vsub.f32 %v3497_v7, %v2769_v54  ;;  %v1843_v11 = vadd.f32 %v1842_v13, %v1841_v55  ;;  %v1772_v42 = vrot.slane %v1771_v36, 1  ;;  %v1763_v24 = vrot.slane %v1762_v43, 2 }
 0x12e   : > { %v2866_v32 = vrot.slane %v2865_v38, 1  ;;  %v2784_v52 = vsel %vm1549_vm0, %v2476_v48, 0.0  ;;  %v5158_v41 = vmul.f32 0.5, %v3626_v29  ;;  %v5160_v59 = vadd.f32 %v2794_v35, %v2793_v26 }
 0x12f   : > { %v3511_v56 = vmul.f32 %v1843_v11, %v1843_v11  ;;  %v2785_v46 = vrot.slane %v2784_v52, 4  ;;  %v1773_v40 = vadd.f32 %v1772_v42, %v1771_v36  ;;  %v1764_v19 = vadd.f32 %v1763_v24, %v1762_v43 }
 0x130   : > { %v2867_v18 = vadd.f32 %v2866_v32, %v2865_v38  ;;  %v3620_v62 = vsub.f32 %v5101_v34, %v5096_v23  ;;  %v3621_v20 = vsub.f32 %v4986_v57, %v2741_v27  ;;  %v4012_v63 = vsel %vm3992_vm2, %v5092_v22, %v5057_v51  ;;  %v415_v23 = vld [vmem:[%s4817_s21 + $0x110] sm:$0xff]  ;;  %v762_v22 = vpop.permute.xlu0 %761 }
 0x131   : > { %v2786_v3 = vadd.f32 %v2785_v46, %v2784_v52  ;;  %v1064_v53 = vperm.slane %v5120_v58, 5  ;;  %v5169_v1 = vmul.f32 0.5, %v3625_v5  ;;  %v1765_v45 = vrot.slane %v1764_v19, 1 }
 0x132   : > { %v3639_v4 = vsub.f32 %v3511_v56, %v2867_v18  ;;  %v3748_v14 = vmul.f32 0.5, %v3620_v62  ;;  %v2796_v34 = vrot.slane %v5160_v59, 1  ;;  %v4013_v8 = vsel %vm3994_vm3, %v5069_v49, %v4012_v63  ;;  %v790_v62 = vpop.permute.xlu1 %789 }
 0x133   : > { %v2787_v57 = vrot.slane %v2786_v3, 2  ;;  %1069 = vperm.xlu2 %4705, %v1064_v53   ;;  %v1057_v51 = vperm.slane %v5120_v58, 4  ;;  %v5178_v39 = vmul.f32 %v1773_v40, %v1773_v40  ;;  %v3749_v10 = vmul.f32 0.5, %v3621_v20  ;;  %v860_v40 = vpop.permute.xlu2 %859 }
 0x134   : > { %v4014_v2 = vsel %vm3996_vm4, %v4968_v61, %v4013_v8  ;;  %v1050_v12 = vperm.slane %v5120_v58, 3  ;;  %v1465_v55 = vmul.f32 %v839_v60, %v425_v37  ;;  %v1455_v26 = vmul.f32 %v769_v0, %v415_v23 }
 0x135   : > { %v5186_v50 = vadd.f32 %v2787_v57, %v2786_v3  ;;  %v4015_v49 = vsel %vm3998_vm5, %v5125_v31, %v4014_v2  ;;  %1062 = vperm.xlu1 %4704, %v1057_v51   ;;  %v5190_v7 = vmul.f32 0.5, %v3639_v4  ;;  %v5192_v25 = vadd.f32 %v1765_v45, %v1764_v19  ;;  %v428_v19 = vld [vmem:[%s4817_s21 + $0x178] sm:$0xff]  ;;  %v418_v3 = vld [vmem:[%s4817_s21 + $0x128] sm:$0xff] }
 0x136   : > { %v4016_v28 = vsel %vm4000_vm6, %v3748_v14, %v4015_v49  ;;  %1055 = vperm.xlu0 %4703, %v1050_v12   ;;  %v1454_v61 = vmul.f32 %v762_v22, %v414_v6  ;;  %v1858_v29 = vsel %vm1549_vm0, %v1465_v55, 0.0  ;;  %v2490_v54 = vmul.f32 %v1465_v55, %v1465_v55 }
 0x137   : > { %v4017_v21 = vsel %vm4002_vm7, %v3749_v10, %v4016_v28  ;;  %v1085_v13 = vperm.slane %v5184_v9, 0  ;;  %v1859_v31 = vrot.slane %v1858_v29, 4  ;;  %v1788_v35 = vsel %vm1549_vm0, %v1455_v26, 0.0 }
 0x138   : > { %4655 = vmatmul.msk.f32.gmra.mxu0 %vm1549_vm0, %v4017_v21  ;;  %v2480_v38 = vmul.f32 %v1455_v26, %v1455_v26  ;;  %v1781_v36 = vsel %vm1549_vm0, %v1454_v61, 0.0  ;;  %v2789_v43 = vrot.slane %v5186_v50, 1  ;;  %v2882_v48 = vsel %vm1549_vm0, %v2490_v54, 0.0 }
 0x139   : > { %v1789_v5 = vrot.slane %v1788_v35, 4  ;;  %v1782_v11 = vrot.slane %v1781_v36, 4  ;;  %v1860_v27 = vadd.f32 %v1859_v31, %v1858_v29  ;;  %v2883_v32 = vrot.slane %v2882_v48, 4 }
 0x13a   : > { %v2812_v42 = vsel %vm1549_vm0, %v2480_v38, 0.0  ;;  %v2479_v24 = vmul.f32 %v1454_v61, %v1454_v61  ;;  %v1078_v18 = vperm.slane %v5120_v58, 7  ;;  %v1071_v60 = vperm.slane %v5120_v58, 6 }
 0x13b   : > { %v1790_v52 = vadd.f32 %v1789_v5, %v1788_v35  ;;  %v2813_v56 = vrot.slane %v2812_v42, 4  ;;  %v1783_v46 = vadd.f32 %v1782_v11, %v1781_v36  ;;  %1090 = vperm.xlu2 %4705, %v1085_v13   ;;  %v1861_v20 = vrot.slane %v1860_v27, 2 }
 0x13c   : > { %v2884_v63 = vadd.f32 %v2883_v32, %v2882_v48  ;;  %v2805_v53 = vsel %vm1549_vm0, %v2479_v24, 0.0  ;;  %v1468_v57 = vmul.f32 %v860_v40, %v428_v19  ;;  %v1458_v8 = vmul.f32 %v790_v62, %v418_v3  ;;  %v783_v48 = vpop.permute.xlu0 %782 }
 0x13d   : > { %v1791_v0 = vrot.slane %v1790_v52, 2  ;;  %v2814_v4 = vadd.f32 %v2813_v56, %v2812_v42  ;;  %v1784_v45 = vrot.slane %v1783_v46, 2  ;;  %v2806_v14 = vrot.slane %v2805_v53, 4  ;;  %1083 = vperm.xlu1 %4704, %v1078_v18  }
 0x13e   : > { %v1862_v37 = vadd.f32 %v1861_v20, %v1860_v27  ;;  %v2885_v23 = vrot.slane %v2884_v63, 2  ;;  %1076 = vperm.xlu0 %4703, %v1071_v60   ;;  %v1879_v49 = vsel %vm1549_vm0, %v1468_v57, 0.0  ;;  %v2493_v55 = vmul.f32 %v1468_v57, %v1468_v57 }
 0x13f   : > { %v1792_v51 = vadd.f32 %v1791_v0, %v1790_v52  ;;  %v2815_v22 = vrot.slane %v2814_v4, 2  ;;  %v1785_v6 = vadd.f32 %v1784_v45, %v1783_v46  ;;  %v2807_v10 = vadd.f32 %v2806_v14, %v2805_v53  ;;  %v417_v46 = vld [vmem:[%s4817_s21 + $0x120] sm:$0xff] }
 0x140   : > { %v1863_v2 = vrot.slane %v1862_v37, 1  ;;  %v2886_v12 = vadd.f32 %v2885_v23, %v2884_v63  ;;  %v1880_v54 = vrot.slane %v1879_v49, 4  ;;  %v2903_v13 = vsel %vm1549_vm0, %v2493_v55, 0.0 }
 0x141   : > { %v1793_v58 = vrot.slane %v1792_v51, 1  ;;  %v2816_v26 = vadd.f32 %v2815_v22, %v2814_v4  ;;  %v1786_v28 = vrot.slane %v1785_v6, 1  ;;  %v2808_v61 = vrot.slane %v2807_v10, 2 }
 0x142   : > { %v1864_v21 = vadd.f32 %v1863_v2, %v1862_v37  ;;  %v2887_v29 = vrot.slane %v2886_v12, 1  ;;  %v1881_v27 = vadd.f32 %v1880_v54, %v1879_v49  ;;  %v2904_v32 = vrot.slane %v2903_v13, 4  ;;  %v811_v54 = vpop.permute.xlu1 %810 }
 0x143   : > { %v1794_v31 = vadd.f32 %v1793_v58, %v1792_v51  ;;  %v2817_v35 = vrot.slane %v2816_v26, 1  ;;  %v1787_v38 = vadd.f32 %v1786_v28, %v1785_v6  ;;  %v2809_v36 = vadd.f32 %v2808_v61, %v2807_v10  ;;  %v881_v58 = vpop.permute.xlu2 %880 }
 0x144   : > { %v2888_v5 = vadd.f32 %v2887_v29, %v2886_v12  ;;  %v3514_v11 = vmul.f32 %v1864_v21, %v1864_v21  ;;  %v5214_v18 = vmul.f32 %v5192_v25, %v5192_v25  ;;  %v1882_v40 = vrot.slane %v1881_v27, 2 }
 0x145   : > { %v2818_v42 = vadd.f32 %v2817_v35, %v2816_v26  ;;  %v3504_v24 = vmul.f32 %v1794_v31, %v1794_v31  ;;  %v2810_v52 = vrot.slane %v2809_v36, 1  ;;  %v3503_v56 = vmul.f32 %v1787_v38, %v1787_v38  ;;  %v431_v26 = vld [vmem:[%s4817_s21 + $0x190] sm:$0xff]  ;;  %v804_v31 = vpop.permute.xlu0 %803  ;;  %v420_v35 = vld [vmem:[%s4817_s21 + $0x138] sm:$0xff] }
 0x146   : > { %v2905_v19 = vadd.f32 %v2904_v32, %v2903_v13  ;;  %v1809_v62 = vsel %vm1549_vm0, %v1458_v8, 0.0  ;;  %v3642_v3 = vsub.f32 %v3514_v11, %v2888_v5  ;;  %v2483_v53 = vmul.f32 %v1458_v8, %v1458_v8  ;;  %v421_v13 = vld [vmem:[%s4817_s21 + $0x140] sm:$0xff] }
 0x147   : > { %v2811_v20 = vadd.f32 %v2810_v52, %v2809_v36  ;;  %v1810_v63 = vrot.slane %v1809_v62, 4  ;;  %v3632_v60 = vsub.f32 %v3504_v24, %v2818_v42  ;;  %v1883_v0 = vadd.f32 %v1882_v40, %v1881_v27 }
 0x148   : > { %v2906_v4 = vrot.slane %v2905_v19, 2  ;;  %v1457_v45 = vmul.f32 %v783_v48, %v417_v46  ;;  %v5220_v14 = vadd.f32 %v2789_v43, %v5186_v50  ;;  %v2833_v23 = vsel %vm1549_vm0, %v2483_v53, 0.0 }
 0x149   : > { %v3631_v37 = vsub.f32 %v3503_v56, %v2811_v20  ;;  %v1811_v25 = vadd.f32 %v1810_v63, %v1809_v62  ;;  %v1884_v57 = vrot.slane %v1883_v0, 1  ;;  %v2834_v22 = vrot.slane %v2833_v23, 4 }
 0x14a   : > { %v5223_v51 = vadd.f32 %v2906_v4, %v2905_v19  ;;  %v1802_v8 = vsel %vm1549_vm0, %v1457_v45, 0.0  ;;  %v5226_v6 = vmul.f32 0.5, %v3642_v3  ;;  %v2482_v12 = vmul.f32 %v1457_v45, %v1457_v45 }
 0x14b   : > { %v1812_v10 = vrot.slane %v1811_v25, 2  ;;  %v1803_v2 = vrot.slane %v1802_v8, 4  ;;  %v5228_v50 = vmul.f32 0.5, %v3632_v60  ;;  %v3759_v43 = vmul.f32 0.5, %v3631_v37 }
 0x14c   : > { %v2835_v49 = vadd.f32 %v2834_v22, %v2833_v23  ;;  %v1106_v55 = vperm.slane %v5184_v9, 3  ;;  %v1885_v28 = vadd.f32 %v1884_v57, %v1883_v0  ;;  %v2826_v29 = vsel %vm1549_vm0, %v2482_v12, 0.0 }
 0x14d   : > { %v1813_v61 = vadd.f32 %v1812_v10, %v1811_v25  ;;  %v1804_v21 = vadd.f32 %v1803_v2, %v1802_v8  ;;  %v2908_v38 = vrot.slane %v5223_v51, 1  ;;  %v2827_v48 = vrot.slane %v2826_v29, 4 }
 0x14e   : > { %v2836_v36 = vrot.slane %v2835_v49, 2  ;;  %1111 = vperm.xlu2 %4705, %v1106_v55   ;;  %v1099_v5 = vperm.slane %v5184_v9, 2  ;;  %v1092_v32 = vperm.slane %v5184_v9, 1  ;;  %v1471_v42 = vmul.f32 %v881_v58, %v431_v26 }
 0x14f   : > { %v1814_v11 = vrot.slane %v1813_v61, 1  ;;  %v1805_v27 = vrot.slane %v1804_v21, 2  ;;  %v2828_v52 = vadd.f32 %v2827_v48, %v2826_v29  ;;  %v1461_v56 = vmul.f32 %v811_v54, %v421_v13 }
 0x150   : > { %v2837_v24 = vadd.f32 %v2836_v36, %v2835_v49  ;;  %1104 = vperm.xlu1 %4704, %v1099_v5   ;;  %v1460_v46 = vmul.f32 %v804_v31, %v420_v35  ;;  %1097 = vperm.xlu0 %4703, %v1092_v32   ;;  %v1900_v62 = vsel %vm1549_vm0, %v1471_v42, 0.0  ;;  %v2496_v3 = vmul.f32 %v1471_v42, %v1471_v42 }
 0x151   : > { %v1815_v40 = vadd.f32 %v1814_v11, %v1813_v61  ;;  %v1806_v19 = vadd.f32 %v1805_v27, %v1804_v21  ;;  %v2829_v63 = vrot.slane %v2828_v52, 2  ;;  %v1901_v53 = vrot.slane %v1900_v62, 4 }
 0x152   : > { %v2838_v20 = vrot.slane %v2837_v24, 1  ;;  %v1830_v60 = vsel %vm1549_vm0, %v1461_v56, 0.0  ;;  %v5242_v0 = vsel %vm3990_vm1, %v3759_v43, %v5094_v17  ;;  %v2924_v45 = vsel %vm1549_vm0, %v2496_v3, 0.0 }
 0x153   : > { %v1807_v4 = vrot.slane %v1806_v19, 1  ;;  %v1831_v37 = vrot.slane %v1830_v60, 4  ;;  %v3507_v25 = vmul.f32 %v1815_v40, %v1815_v40  ;;  %v2830_v23 = vadd.f32 %v2829_v63, %v2828_v52 }
 0x154   : > { %v1902_v57 = vadd.f32 %v1901_v53, %v1900_v62  ;;  %v2925_v22 = vrot.slane %v2924_v45, 4  ;;  %v2486_v2 = vmul.f32 %v1461_v56, %v1461_v56  ;;  %v1823_v12 = vsel %vm1549_vm0, %v1460_v46, 0.0 }
 0x155   : > { %v1808_v8 = vadd.f32 %v1807_v4, %v1806_v19  ;;  %v1832_v10 = vadd.f32 %v1831_v37, %v1830_v60  ;;  %v2839_v49 = vadd.f32 %v2838_v20, %v2837_v24  ;;  %v2831_v55 = vrot.slane %v2830_v23, 1 }
 0x156   : > { %v1903_v58 = vrot.slane %v1902_v57, 2  ;;  %v2926_v26 = vadd.f32 %v2925_v22, %v2924_v45  ;;  %v5246_v61 = vmul.f32 %v1885_v28, %v1885_v28  ;;  %v2854_v43 = vsel %vm1549_vm0, %v2486_v2, 0.0 }
 0x157   : > { %v1833_v17 = vrot.slane %v1832_v10, 2  ;;  %v1824_v21 = vrot.slane %v1823_v12, 4  ;;  %v2832_v29 = vadd.f32 %v2831_v55, %v2830_v23  ;;  %v3506_v54 = vmul.f32 %v1808_v8, %v1808_v8  ;;  %v832_v55 = vpop.permute.xlu1 %831 }
 0x158   : > { %v1904_v13 = vadd.f32 %v1903_v58, %v1902_v57  ;;  %v2927_v31 = vrot.slane %v2926_v26, 2  ;;  %v2855_v36 = vrot.slane %v2854_v43, 4  ;;  %v2485_v5 = vmul.f32 %v1460_v46, %v1460_v46  ;;  %v902_v57 = vpop.permute.xlu2 %901  ;;  %v424_v58 = vld [vmem:[%s4817_s21 + $0x158] sm:$0xff] }
 0x159   : > { %v1834_v35 = vadd.f32 %v1833_v17, %v1832_v10  ;;  %v1825_v48 = vadd.f32 %v1824_v21, %v1823_v12  ;;  %v3635_v11 = vsub.f32 %v3507_v25, %v2839_v49  ;;  %v2797_v28 = vadd.f32 %v2796_v34, %v5160_v59  ;;  %v434_v49 = vld [vmem:[%s4817_s21 + $0x1a8] sm:$0xff]  ;;  %v423_v21 = vld [vmem:[%s4817_s21 + $0x150] sm:$0xff] }
 0x15a   : > { %v1905_v27 = vrot.slane %v1904_v13, 1  ;;  %v2928_v32 = vadd.f32 %v2927_v31, %v2926_v26  ;;  %v2856_v24 = vadd.f32 %v2855_v36, %v2854_v43  ;;  %v2847_v56 = vsel %vm1549_vm0, %v2485_v5, 0.0 }
 0x15b   : > { %v1835_v42 = vrot.slane %v1834_v35, 1  ;;  %v1826_v52 = vrot.slane %v1825_v48, 2  ;;  %v3634_v40 = vsub.f32 %v3506_v54, %v2832_v29  ;;  %v2848_v3 = vrot.slane %v2847_v56, 4 }
 0x15c   : > { %v1906_v19 = vadd.f32 %v1905_v27, %v1904_v13  ;;  %v2929_v62 = vrot.slane %v2928_v32, 1  ;;  %v2857_v63 = vrot.slane %v2856_v24, 2  ;;  %v3628_v46 = vsub.f32 %v5214_v18, %v5220_v14 }
 0x15d   : > { %v1836_v20 = vadd.f32 %v1835_v42, %v1834_v35  ;;  %v1827_v53 = vadd.f32 %v1826_v52, %v1825_v48  ;;  %v2849_v45 = vadd.f32 %v2848_v3, %v2847_v56  ;;  %v3629_v59 = vsub.f32 %v5178_v39, %v2797_v28  ;;  %v5281_v48 = vld [vmem:[%s4805_s16 + $0x58] sm:$0xff] }
 0x15e   : > { %v2930_v60 = vadd.f32 %v2929_v62, %v2928_v32  ;;  %v3520_v4 = vmul.f32 %v1906_v19, %v1906_v19  ;;  %v2858_v34 = vadd.f32 %v2857_v63, %v2856_v24  ;;  %v3756_v23 = vmul.f32 0.5, %v3628_v46 }
 0x15f   : > { %v3510_v37 = vmul.f32 %v1836_v20, %v1836_v20  ;;  %v1828_v25 = vrot.slane %v1827_v53, 1  ;;  %v2850_v8 = vrot.slane %v2849_v45, 2  ;;  %v3757_v10 = vmul.f32 0.5, %v3629_v59  ;;  %v437_v59 = vld [vmem:[%s4817_s21 + $0x1c0] sm:$0xff] }
 0x160   : > { %v3648_v22 = vsub.f32 %v3520_v4, %v2930_v60  ;;  %v4019_v18 = vsel %vm3992_vm2, %v5007_v47, %v5152_v33  ;;  %v2859_v14 = vrot.slane %v2858_v34, 1  ;;  %v1127_v39 = vperm.slane %v5184_v9, 6  ;;  %v825_v33 = vpop.permute.xlu0 %824 }
 0x161   : > { %v1829_v2 = vadd.f32 %v1828_v25, %v1827_v53  ;;  %v4020_v12 = vsel %vm3994_vm3, %v5169_v1, %v4019_v18  ;;  %v5264_v26 = vmul.f32 0.5, %v3635_v11  ;;  %v5266_v17 = vmul.f32 0.5, %v3634_v40 }
 0x162   : > { %v4021_v43 = vsel %vm3996_vm4, %v5158_v41, %v4020_v12  ;;  %v1120_v47 = vperm.slane %v5184_v9, 5  ;;  %v5272_v29 = vmul.f32 0.5, %v3648_v22  ;;  %v2860_v1 = vadd.f32 %v2859_v14, %v2858_v34  ;;  %1132 = vperm.xlu2 %4705, %v1127_v39  }
 0x163   : > { %v4022_v54 = vsel %vm3998_vm5, %v5060_v16, %v4021_v43  ;;  %v1113_v13 = vperm.slane %v5184_v9, 4  ;;  %v5277_v31 = vadd.f32 %v2850_v8, %v2849_v45  ;;  %v1474_v36 = vmul.f32 %v902_v57, %v434_v49  ;;  %v923_v45 = vpop.permute.xlu2 %922 }
 0x164   : > { %v4023_v35 = vsel %vm4000_vm6, %v3756_v23, %v4022_v54  ;;  %1125 = vperm.xlu1 %4704, %v1120_v47   ;;  %v1464_v41 = vmul.f32 %v832_v55, %v424_v58  ;;  %v3638_v5 = vsub.f32 %v3510_v37, %v2860_v1  ;;  %v5283_v11 = vmul.f32 %v1829_v2, %v1829_v2 }
 0x165   : > { %v4024_v27 = vsel %vm4002_vm7, %v3757_v10, %v4023_v35  ;;  %1118 = vperm.xlu0 %4703, %v1113_v13   ;;  %v1463_v32 = vmul.f32 %v825_v33, %v423_v21  ;;  %v1921_v16 = vsel %vm1549_vm0, %v1474_v36, 0.0  ;;  %v2499_v28 = vmul.f32 %v1474_v36, %v1474_v36 }
 0x166   : > { %4656 = vmatmul.msk.f32.gmra.mxu0 %vm1549_vm0, %v4024_v27  ;;  %v1851_v42 = vsel %vm1549_vm0, %v1464_v41, 0.0  ;;  %v2489_v24 = vmul.f32 %v1464_v41, %v1464_v41  ;;  %v1922_v52 = vrot.slane %v1921_v16, 4  ;;  %v1148_v19 = vperm.slane %v5281_v48, 1 }
 0x167   : > { %v1852_v56 = vrot.slane %v1851_v42, 4  ;;  %v1844_v40 = vsel %vm1549_vm0, %v1463_v32, 0.0  ;;  %v2945_v62 = vsel %vm1549_vm0, %v2499_v28, 0.0  ;;  %v2488_v63 = vmul.f32 %v1463_v32, %v1463_v32 }
 0x168   : > { %v2875_v3 = vsel %vm1549_vm0, %v2489_v24, 0.0  ;;  %v1845_v20 = vrot.slane %v1844_v40, 4  ;;  %v5293_v53 = vmul.f32 0.5, %v3638_v5  ;;  %v1923_v46 = vadd.f32 %v1922_v52, %v1921_v16 }
 0x169   : > { %v2946_v60 = vrot.slane %v2945_v62, 4  ;;  %v1853_v4 = vadd.f32 %v1852_v56, %v1851_v42  ;;  %v2876_v34 = vrot.slane %v2875_v3, 4  ;;  %v2868_v25 = vsel %vm1549_vm0, %v2488_v63, 0.0 }
 0x16a   : > { %v1846_v37 = vadd.f32 %v1845_v20, %v1844_v40  ;;  %v1141_v23 = vperm.slane %v5281_v48, 0  ;;  %v1924_v57 = vrot.slane %v1923_v46, 2  ;;  %v2869_v10 = vrot.slane %v2868_v25, 4  ;;  %1153 = vperm.xlu2 %4705, %v1148_v19   ;;  %v853_v40 = vpop.permute.xlu1 %852  ;;  %v427_v19 = vld [vmem:[%s4817_s21 + $0x170] sm:$0xff] }
 0x16b   : > { %v2947_v22 = vadd.f32 %v2946_v60, %v2945_v62  ;;  %v1854_v8 = vrot.slane %v1853_v4, 2  ;;  %v2877_v18 = vadd.f32 %v2876_v34, %v2875_v3  ;;  %v1134_v2 = vperm.slane %v5184_v9, 7  ;;  %v846_v62 = vpop.permute.xlu0 %845  ;;  %v426_v3 = vld [vmem:[%s4817_s21 + $0x168] sm:$0xff] }
 0x16c   : > { %v1847_v14 = vrot.slane %v1846_v37, 2  ;;  %1146 = vperm.xlu1 %4704, %v1141_v23   ;;  %v1477_v12 = vmul.f32 %v923_v45, %v437_v59  ;;  %v1925_v39 = vadd.f32 %v1924_v57, %v1923_v46  ;;  %v2870_v58 = vadd.f32 %v2869_v10, %v2868_v25 }
 0x16d   : > { %v2948_v49 = vrot.slane %v2947_v22, 2  ;;  %v1855_v55 = vadd.f32 %v1854_v8, %v1853_v4  ;;  %v2878_v43 = vrot.slane %v2877_v18, 2  ;;  %1139 = vperm.xlu0 %4703, %v1134_v2   ;;  %v1467_v23 = vmul.f32 %v853_v40, %v427_v19 }
 0x16e   : > { %v1848_v47 = vadd.f32 %v1847_v14, %v1846_v37  ;;  %v1942_v33 = vsel %vm1549_vm0, %v1477_v12, 0.0  ;;  %v2502_v21 = vmul.f32 %v1477_v12, %v1477_v12  ;;  %v1926_v1 = vrot.slane %v1925_v39, 1 }
 0x16f   : > { %v2949_v54 = vadd.f32 %v2948_v49, %v2947_v22  ;;  %v1856_v13 = vrot.slane %v1855_v55, 1  ;;  %v2871_v35 = vrot.slane %v2870_v58, 2  ;;  %v2879_v36 = vadd.f32 %v2878_v43, %v2877_v18 }
 0x170   : > { %v1849_v41 = vrot.slane %v1848_v47, 1  ;;  %v1943_v9 = vrot.slane %v1942_v33, 4  ;;  %v2966_v5 = vsel %vm1549_vm0, %v2502_v21, 0.0  ;;  %v1927_v27 = vadd.f32 %v1926_v1, %v1925_v39 }
 0x171   : > { %v2950_v32 = vrot.slane %v2949_v54, 1  ;;  %v1857_v16 = vadd.f32 %v1856_v13, %v1855_v55  ;;  %v2872_v28 = vadd.f32 %v2871_v35, %v2870_v58  ;;  %v2880_v42 = vrot.slane %v2879_v36, 1 }
 0x172   : > { %v1850_v24 = vadd.f32 %v1849_v41, %v1848_v47  ;;  %v1944_v52 = vadd.f32 %v1943_v9, %v1942_v33  ;;  %v2967_v56 = vrot.slane %v2966_v5, 4  ;;  %v3523_v63 = vmul.f32 %v1927_v27, %v1927_v27 }
 0x173   : > { %v2951_v20 = vadd.f32 %v2950_v32, %v2949_v54  ;;  %v3513_v46 = vmul.f32 %v1857_v16, %v1857_v16  ;;  %v2873_v60 = vrot.slane %v2872_v28, 1  ;;  %v2881_v4 = vadd.f32 %v2880_v42, %v2879_v36 }
 0x174   : > { %v5303_v45 = vmul.f32 %v1850_v24, %v1850_v24  ;;  %v1945_v59 = vrot.slane %v1944_v52, 2  ;;  %v2968_v34 = vadd.f32 %v2967_v56, %v2966_v5  ;;  %v1466_v57 = vmul.f32 %v846_v62, %v426_v3 }
 0x175   : > { %v3651_v37 = vsub.f32 %v3523_v63, %v2951_v20  ;;  %v5305_v25 = vadd.f32 %v2873_v60, %v2872_v28  ;;  %v2852_v22 = vrot.slane %v5277_v31, 1  ;;  %v1169_v18 = vperm.slane %v5281_v48, 4  ;;  %v944_v60 = vpop.permute.xlu2 %943 }
 0x176   : > { %v1946_v8 = vadd.f32 %v1945_v59, %v1944_v52  ;;  %v2969_v10 = vrot.slane %v2968_v34, 2  ;;  %v5312_v14 = vsel %vm3990_vm1, %v5190_v7, %v5293_v53  ;;  %v3641_v2 = vsub.f32 %v3513_v46, %v2881_v4  ;;  %v440_v4 = vld [vmem:[%s4817_s21 + $0x1d8] sm:$0xff] }
 0x177   : > { %v1872_v12 = vsel %vm1549_vm0, %v1467_v23, 0.0  ;;  %v2492_v39 = vmul.f32 %v1467_v23, %v1467_v23  ;;  %v5315_v49 = vmul.f32 0.5, %v3651_v37  ;;  %1174 = vperm.xlu2 %4705, %v1169_v18   ;;  %v3640_v47 = vsub.f32 %v5303_v45, %v5305_v25 }
 0x178   : > { %v1947_v55 = vrot.slane %v1946_v8, 1  ;;  %v2970_v58 = vadd.f32 %v2969_v10, %v2968_v34  ;;  %v1873_v43 = vrot.slane %v1872_v12, 4  ;;  %v1865_v21 = vsel %vm1549_vm0, %v1466_v57, 0.0  ;;  %v430_v34 = vld [vmem:[%s4817_s21 + $0x188] sm:$0xff] }
 0x179   : > { %v2896_v33 = vsel %vm1549_vm0, %v2492_v39, 0.0  ;;  %v2491_v1 = vmul.f32 %v1466_v57, %v1466_v57  ;;  %v1866_v35 = vrot.slane %v1865_v21, 4  ;;  %v1162_v41 = vperm.slane %v5281_v48, 3 }
 0x17a   : > { %v1948_v7 = vadd.f32 %v1947_v55, %v1946_v8  ;;  %v2971_v53 = vrot.slane %v2970_v58, 1  ;;  %v1874_v54 = vadd.f32 %v1873_v43, %v1872_v12  ;;  %v2897_v13 = vrot.slane %v2896_v33, 4  ;;  %v429_v12 = vld [vmem:[%s4817_s21 + $0x180] sm:$0xff] }
 0x17b   : > { %v2889_v36 = vsel %vm1549_vm0, %v2491_v1, 0.0  ;;  %v1155_v9 = vperm.slane %v5281_v48, 2  ;;  %v1867_v28 = vadd.f32 %v1866_v35, %v1865_v21  ;;  %1167 = vperm.xlu1 %4704, %v1162_v41   ;;  %v2853_v24 = vadd.f32 %v2852_v22, %v5277_v31 }
 0x17c   : > { %v2972_v5 = vadd.f32 %v2971_v53, %v2970_v58  ;;  %v3526_v27 = vmul.f32 %v1948_v7, %v1948_v7  ;;  %v1875_v32 = vrot.slane %v1874_v54, 2  ;;  %v2898_v16 = vadd.f32 %v2897_v13, %v2896_v33 }
 0x17d   : > { %v2890_v42 = vrot.slane %v2889_v36, 4  ;;  %1160 = vperm.xlu0 %4703, %v1155_v9   ;;  %v3636_v52 = vsub.f32 %v5137_v15, %v5148_v30  ;;  %v5327_v56 = vmul.f32 0.5, %v3641_v2  ;;  %v4026_v62 = vsel %vm3992_vm2, %v5228_v50, %v5242_v0  ;;  %v874_v30 = vpop.permute.xlu1 %873  ;;  %v867_v2 = vpop.permute.xlu0 %866 }
 0x17e   : > { %v1876_v40 = vadd.f32 %v1875_v32, %v1874_v54  ;;  %v2899_v19 = vrot.slane %v2898_v16, 2  ;;  %v3654_v3 = vsub.f32 %v3526_v27, %v2972_v5  ;;  %v1868_v20 = vrot.slane %v1867_v28, 2 }
 0x17f   : > { %v2891_v63 = vadd.f32 %v2890_v42, %v2889_v36  ;;  %v3637_v46 = vsub.f32 %v5283_v11, %v2853_v24  ;;  %v3764_v59 = vmul.f32 0.5, %v3636_v52  ;;  %v4027_v15 = vsel %vm3994_vm3, %v5129_v44, %v4026_v62 }
 0x180   : > { %v1877_v31 = vrot.slane %v1876_v40, 1  ;;  %v2900_v45 = vadd.f32 %v2899_v19, %v2898_v16  ;;  %v1869_v37 = vadd.f32 %v1868_v20, %v1867_v28  ;;  %v4028_v50 = vsel %vm3996_vm4, %v5266_v17, %v4027_v15 }
 0x181   : > { %v2892_v25 = vrot.slane %v2891_v63, 2  ;;  %v3765_v23 = vmul.f32 0.5, %v3637_v46  ;;  %v4029_v11 = vsel %vm3998_vm5, %v5264_v26, %v4028_v50  ;;  %v1480_v22 = vmul.f32 %v944_v60, %v440_v4  ;;  %v965_v46 = vpop.permute.xlu2 %964  ;;  %v443_v60 = vld [vmem:[%s4817_s21 + $0x1f0] sm:$0xff] }
 0x182   : > { %v1878_v0 = vadd.f32 %v1877_v31, %v1876_v40  ;;  %v2901_v57 = vrot.slane %v2900_v45, 1  ;;  %v1870_v8 = vrot.slane %v1869_v37, 1  ;;  %v4030_v18 = vsel %vm4000_vm6, %v3764_v59, %v4029_v11  ;;  %v433_v31 = vld [vmem:[%s4817_s21 + $0x1a0] sm:$0xff] }
 0x183   : > { %v2893_v10 = vadd.f32 %v2892_v25, %v2891_v63  ;;  %v1470_v44 = vmul.f32 %v874_v30, %v430_v34  ;;  %v5343_v39 = vmul.f32 0.5, %v3640_v47  ;;  %v5345_v55 = vmul.f32 0.5, %v3654_v3 }
 0x184   : > { %v4031_v58 = vsel %vm4002_vm7, %v3765_v23, %v4030_v18  ;;  %v1963_v17 = vsel %vm1549_vm0, %v1480_v22, 0.0  ;;  %v5349_v43 = vadd.f32 %v2901_v57, %v2900_v45  ;;  %v2505_v21 = vmul.f32 %v1480_v22, %v1480_v22 }
 0x185   : > { %v2894_v33 = vrot.slane %v2893_v10, 1  ;;  %4657 = vmatmul.msk.f32.gmra.mxu0 %vm1549_vm0, %v4031_v58  ;;  %v1964_v26 = vrot.slane %v1963_v17, 4  ;;  %v1893_v1 = vsel %vm1549_vm0, %v1470_v44, 0.0  ;;  %v2495_v7 = vmul.f32 %v1470_v44, %v1470_v44  ;;  %v895_v4 = vpop.permute.xlu1 %894 }
 0x186   : > { %v1469_v53 = vmul.f32 %v867_v2, %v429_v12  ;;  %v1190_v47 = vperm.slane %v5281_v48, 7  ;;  %v5354_v54 = vmul.f32 %v1878_v0, %v1878_v0  ;;  %v1871_v13 = vadd.f32 %v1870_v8, %v1869_v37 }
 0x187   : > { %v1965_v35 = vadd.f32 %v1964_v26, %v1963_v17  ;;  %v2987_v36 = vsel %vm1549_vm0, %v2505_v21, 0.0  ;;  %v1894_v9 = vrot.slane %v1893_v1, 4  ;;  %v2917_v5 = vsel %vm1549_vm0, %v2495_v7, 0.0 }
 0x188   : > { %v2988_v41 = vrot.slane %v2987_v36, 4  ;;  %v1886_v27 = vsel %vm1549_vm0, %v1469_v53, 0.0  ;;  %1195 = vperm.xlu2 %4705, %v1190_v47   ;;  %v5359_v32 = vadd.f32 %v2894_v33, %v2893_v10  ;;  %v2918_v28 = vrot.slane %v2917_v5, 4  ;;  %v888_v47 = vpop.permute.xlu0 %887 }
 0x189   : > { %v1966_v16 = vrot.slane %v1965_v35, 2  ;;  %v1887_v42 = vrot.slane %v1886_v27, 4  ;;  %v1895_v52 = vadd.f32 %v1894_v9, %v1893_v1  ;;  %v2494_v40 = vmul.f32 %v1469_v53, %v1469_v53 }
 0x18a   : > { %v2989_v24 = vadd.f32 %v2988_v41, %v2987_v36  ;;  %v1183_v19 = vperm.slane %v5281_v48, 6  ;;  %v5362_v62 = vmul.f32 %v1871_v13, %v1871_v13  ;;  %v2919_v20 = vadd.f32 %v2918_v28, %v2917_v5  ;;  %v432_v28 = vld [vmem:[%s4817_s21 + $0x198] sm:$0xff] }
 0x18b   : > { %v1967_v3 = vadd.f32 %v1966_v16, %v1965_v35  ;;  %v1888_v63 = vadd.f32 %v1887_v42, %v1886_v27  ;;  %v1896_v59 = vrot.slane %v1895_v52, 2  ;;  %v2910_v15 = vsel %vm1549_vm0, %v2494_v40, 0.0 }
 0x18c   : > { %v2990_v45 = vrot.slane %v2989_v24, 2  ;;  %1188 = vperm.xlu1 %4704, %v1183_v19   ;;  %v1176_v30 = vperm.slane %v5281_v48, 5  ;;  %v2920_v37 = vrot.slane %v2919_v20, 2  ;;  %v2911_v23 = vrot.slane %v2910_v15, 4  ;;  %v5375_v19 = vld [vmem:[%s4805_s16 + $0x60] sm:$0xff] }
 0x18d   : > { %v1968_v34 = vrot.slane %v1967_v3, 1  ;;  %v1889_v25 = vrot.slane %v1888_v63, 2  ;;  %v1897_v0 = vadd.f32 %v1896_v59, %v1895_v52  ;;  %v1483_v57 = vmul.f32 %v965_v46, %v443_v60 }
 0x18e   : > { %v2991_v50 = vadd.f32 %v2990_v45, %v2989_v24  ;;  %1181 = vperm.xlu0 %4703, %v1176_v30   ;;  %v1473_v11 = vmul.f32 %v895_v4, %v433_v31  ;;  %v2921_v8 = vadd.f32 %v2920_v37, %v2919_v20  ;;  %v2912_v18 = vadd.f32 %v2911_v23, %v2910_v15 }
 0x18f   : > { %v1969_v22 = vadd.f32 %v1968_v34, %v1967_v3  ;;  %v1890_v10 = vadd.f32 %v1889_v25, %v1888_v63  ;;  %v1898_v2 = vrot.slane %v1897_v0, 1  ;;  %v1984_v12 = vsel %vm1549_vm0, %v1483_v57, 0.0 }
 0x190   : > { %v2992_v44 = vrot.slane %v2991_v50, 1  ;;  %v2508_v58 = vmul.f32 %v1483_v57, %v1483_v57  ;;  %v2922_v48 = vrot.slane %v2921_v8, 1  ;;  %v2913_v26 = vrot.slane %v2912_v18, 2 }
 0x191   : > { %v3529_v17 = vmul.f32 %v1969_v22, %v1969_v22  ;;  %v1891_v33 = vrot.slane %v1890_v10, 1  ;;  %v1899_v1 = vadd.f32 %v1898_v2, %v1897_v0  ;;  %v1985_v7 = vrot.slane %v1984_v12, 4 }
 0x192   : > { %v2993_v21 = vadd.f32 %v2992_v44, %v2991_v50  ;;  %v3008_v53 = vsel %vm1549_vm0, %v2508_v58, 0.0  ;;  %v2923_v13 = vadd.f32 %v2922_v48, %v2921_v8  ;;  %v2914_v36 = vadd.f32 %v2913_v26, %v2912_v18  ;;  %v986_v18 = vpop.permute.xlu2 %985  ;;  %v446_v44 = vld [vmem:[%s4817_s21 + $0x208] sm:$0xff]  ;;  %v916_v48 = vpop.permute.xlu1 %915 }
 0x193   : > { %v1892_v35 = vadd.f32 %v1891_v33, %v1890_v10  ;;  %v3009_v41 = vrot.slane %v3008_v53, 4  ;;  %v3643_v9 = vsub.f32 %v5362_v62, %v5359_v32  ;;  %v3519_v5 = vmul.f32 %v1899_v1, %v1899_v1  ;;  %v436_v33 = vld [vmem:[%s4817_s21 + $0x1b8] sm:$0xff]  ;;  %v909_v26 = vpop.permute.xlu0 %908 }
 0x194   : > { %v1986_v27 = vadd.f32 %v1985_v7, %v1984_v12  ;;  %v1914_v16 = vsel %vm1549_vm0, %v1473_v11, 0.0  ;;  %v2915_v42 = vrot.slane %v2914_v36, 1  ;;  %v3657_v3 = vsub.f32 %v3529_v17, %v2993_v21  ;;  %v435_v21 = vld [vmem:[%s4817_s21 + $0x1b0] sm:$0xff] }
 0x195   : > { %v3518_v24 = vmul.f32 %v1892_v35, %v1892_v35  ;;  %v3010_v52 = vadd.f32 %v3009_v41, %v3008_v53  ;;  %v1915_v40 = vrot.slane %v1914_v16, 4  ;;  %v3647_v20 = vsub.f32 %v3519_v5, %v2923_v13 }
 0x196   : > { %v1987_v63 = vrot.slane %v1986_v27, 2  ;;  %v2498_v46 = vmul.f32 %v1473_v11, %v1473_v11  ;;  %v2916_v60 = vadd.f32 %v2915_v42, %v2914_v36  ;;  %v1472_v45 = vmul.f32 %v888_v47, %v432_v28 }
 0x197   : > { %v3011_v4 = vrot.slane %v3010_v52, 2  ;;  %v1916_v31 = vadd.f32 %v1915_v40, %v1914_v16  ;;  %v3775_v32 = vmul.f32 0.5, %v3647_v20  ;;  %v1211_v15 = vperm.slane %v5375_v19, 2 }
 0x198   : > { %v1988_v62 = vadd.f32 %v1987_v63, %v1986_v27  ;;  %v2938_v59 = vsel %vm1549_vm0, %v2498_v46, 0.0  ;;  %v3646_v30 = vsub.f32 %v3518_v24, %v2916_v60  ;;  %v1907_v50 = vsel %vm1549_vm0, %v1472_v45, 0.0 }
 0x199   : > { %v3012_v34 = vadd.f32 %v3011_v4, %v3010_v52  ;;  %v1917_v37 = vrot.slane %v1916_v31, 2  ;;  %v2939_v25 = vrot.slane %v2938_v59, 4  ;;  %v2497_v0 = vmul.f32 %v1472_v45, %v1472_v45  ;;  %1216 = vperm.xlu2 %4705, %v1211_v15  }
 0x19a   : > { %v1989_v23 = vrot.slane %v1988_v62, 1  ;;  %v1204_v57 = vperm.slane %v5375_v19, 1  ;;  %v5381_v11 = vmul.f32 0.5, %v3643_v9  ;;  %v3774_v22 = vmul.f32 0.5, %v3646_v30 }
 0x19b   : > { %v1918_v8 = vadd.f32 %v1917_v37, %v1916_v31  ;;  %v2940_v10 = vadd.f32 %v2939_v25, %v2938_v59  ;;  %v5384_v2 = vmul.f32 0.5, %v3657_v3  ;;  %v1908_v12 = vrot.slane %v1907_v50, 4 }
 0x19c   : > { %v2931_v58 = vsel %vm1549_vm0, %v2497_v0, 0.0  ;;  %1209 = vperm.xlu1 %4704, %v1204_v57   ;;  %v1197_v17 = vperm.slane %v5375_v19, 0  ;;  %v1990_v1 = vadd.f32 %v1989_v23, %v1988_v62  ;;  %v3013_v7 = vrot.slane %v3012_v34, 1 }
 0x19d   : > { %v1919_v53 = vrot.slane %v1918_v8, 1  ;;  %v2941_v47 = vrot.slane %v2940_v10, 2  ;;  %v5391_v13 = vsel %vm3990_vm1, %v3775_v32, %v3774_v22  ;;  %v1909_v35 = vadd.f32 %v1908_v12, %v1907_v50 }
 0x19e   : > { %v2932_v36 = vrot.slane %v2931_v58, 4  ;;  %1202 = vperm.xlu0 %4703, %v1197_v17   ;;  %v1486_v41 = vmul.f32 %v986_v18, %v446_v44  ;;  %v1476_v27 = vmul.f32 %v916_v48, %v436_v33  ;;  %v1475_v16 = vmul.f32 %v909_v26, %v435_v21 }
 0x19f   : > { %v1920_v9 = vadd.f32 %v1919_v53, %v1918_v8  ;;  %v2942_v5 = vadd.f32 %v2941_v47, %v2940_v10  ;;  %v1910_v28 = vrot.slane %v1909_v35, 2  ;;  %v5397_v23 = vadd.f32 %v3013_v7, %v3012_v34 }
 0x1a0   : > { %v2933_v42 = vadd.f32 %v2932_v36, %v2931_v58  ;;  %v2005_v24 = vsel %vm1549_vm0, %v1486_v41, 0.0  ;;  %v2511_v52 = vmul.f32 %v1486_v41, %v1486_v41  ;;  %v1935_v63 = vsel %vm1549_vm0, %v1476_v27, 0.0 }
 0x1a1   : > { %v2943_v40 = vrot.slane %v2942_v5, 1  ;;  %v3522_v3 = vmul.f32 %v1920_v9, %v1920_v9  ;;  %v2006_v20 = vrot.slane %v2005_v24, 4  ;;  %v1911_v46 = vadd.f32 %v1910_v28, %v1909_v35 }
 0x1a2   : > { %v2934_v60 = vrot.slane %v2933_v42, 2  ;;  %v3029_v4 = vsel %vm1549_vm0, %v2511_v52, 0.0  ;;  %v1936_v31 = vrot.slane %v1935_v63, 4  ;;  %v2501_v59 = vmul.f32 %v1476_v27, %v1476_v27 }
 0x1a3   : > { %v2944_v45 = vadd.f32 %v2943_v40, %v2942_v5  ;;  %v2007_v32 = vadd.f32 %v2006_v20, %v2005_v24  ;;  %v3030_v62 = vrot.slane %v3029_v4, 4  ;;  %v1912_v15 = vrot.slane %v1911_v46, 1 }
 0x1a4   : > { %v2935_v30 = vadd.f32 %v2934_v60, %v2933_v42  ;;  %v1937_v37 = vadd.f32 %v1936_v31, %v1935_v63  ;;  %v1928_v25 = vsel %vm1549_vm0, %v1475_v16, 0.0  ;;  %v2959_v57 = vsel %vm1549_vm0, %v2501_v59, 0.0  ;;  %v449_v59 = vld [vmem:[%s4817_s21 + $0x220] sm:$0xff] }
 0x1a5   : > { %v2008_v50 = vrot.slane %v2007_v32, 2  ;;  %v3031_v0 = vadd.f32 %v3030_v62, %v3029_v4  ;;  %v1913_v22 = vadd.f32 %v1912_v15, %v1911_v46  ;;  %v2960_v18 = vrot.slane %v2959_v57, 4  ;;  %v1007_v4 = vpop.permute.xlu2 %1006 }
 0x1a6   : > { %v2936_v8 = vrot.slane %v2935_v30, 1  ;;  %v1938_v10 = vrot.slane %v1937_v37, 2  ;;  %v3650_v44 = vsub.f32 %v3522_v3, %v2944_v45  ;;  %v1929_v17 = vrot.slane %v1928_v25, 4 }
 0x1a7   : > { %v2009_v12 = vadd.f32 %v2008_v50, %v2007_v32  ;;  %v3032_v58 = vrot.slane %v3031_v0, 2  ;;  %v3521_v33 = vmul.f32 %v1913_v22, %v1913_v22  ;;  %v2961_v21 = vadd.f32 %v2960_v18, %v2959_v57  ;;  %v438_v50 = vld [vmem:[%s4817_s21 + $0x1c8] sm:$0xff] }
 0x1a8   : > { %v2937_v48 = vadd.f32 %v2936_v8, %v2935_v30  ;;  %v1939_v26 = vadd.f32 %v1938_v10, %v1937_v37  ;;  %v1930_v34 = vadd.f32 %v1929_v17, %v1928_v25  ;;  %v2500_v7 = vmul.f32 %v1475_v16, %v1475_v16  ;;  %v937_v37 = vpop.permute.xlu1 %936  ;;  %v439_v25 = vld [vmem:[%s4817_s21 + $0x1d0] sm:$0xff] }
 0x1a9   : > { %v2010_v53 = vrot.slane %v2009_v12, 1  ;;  %v3033_v47 = vadd.f32 %v3032_v58, %v3031_v0  ;;  %v2962_v41 = vrot.slane %v2961_v21, 2  ;;  %v2909_v9 = vadd.f32 %v2908_v38, %v5223_v51 }
 0x1aa   : > { %v3649_v35 = vsub.f32 %v3521_v33, %v2937_v48  ;;  %v1940_v36 = vrot.slane %v1939_v26, 1  ;;  %v1931_v28 = vrot.slane %v1930_v34, 2  ;;  %v2952_v42 = vsel %vm1549_vm0, %v2500_v7, 0.0 }
 0x1ab   : > { %v2011_v5 = vadd.f32 %v2010_v53, %v2009_v12  ;;  %v3034_v27 = vrot.slane %v3033_v47, 1  ;;  %v5404_v24 = vmul.f32 %v1990_v1, %v1990_v1  ;;  %v5406_v40 = vadd.f32 %v2962_v41, %v2961_v21 }
 0x1ac   : > { %v1941_v52 = vadd.f32 %v1940_v36, %v1939_v26  ;;  %v2953_v3 = vrot.slane %v2952_v42, 4  ;;  %v1932_v63 = vadd.f32 %v1931_v28, %v1930_v34  ;;  %v3644_v46 = vsub.f32 %v5354_v54, %v5349_v43 }
 0x1ad   : > { %v3035_v16 = vadd.f32 %v3034_v27, %v3033_v47  ;;  %v3535_v20 = vmul.f32 %v2011_v5, %v2011_v5  ;;  %v5410_v51 = vmul.f32 0.5, %v3650_v44  ;;  %v5412_v38 = vmul.f32 0.5, %v3649_v35  ;;  %v5446_v47 = vld [vmem:[%s4805_s16 + $0x68] sm:$0xff] }
 0x1ae   : > { %v2954_v60 = vadd.f32 %v2953_v3, %v2952_v42  ;;  %v3645_v1 = vsub.f32 %v5246_v61, %v2909_v9  ;;  %v2964_v45 = vrot.slane %v5406_v40, 1  ;;  %v3772_v32 = vmul.f32 0.5, %v3644_v46  ;;  %v930_v61 = vpop.permute.xlu0 %929  ;;  %v4224_v46 = vld [vmem:[%s6345_s5 + $0x10] sm:$0xff] }
 0x1af   : > { %v3663_v31 = vsub.f32 %v3535_v20, %v3035_v16  ;;  %v4033_v62 = vsel %vm3992_vm2, %v5343_v39, %v5312_v14  ;;  %v1933_v43 = vrot.slane %v1932_v63, 1  ;;  %v1232_v30 = vperm.slane %v5375_v19, 5  ;;  %v1028_v16 = vpop.permute.xlu2 %1027  ;;  %v452_v20 = vld [vmem:[%s4817_s21 + $0x238] sm:$0xff] }
 0x1b0   : > { %v2955_v54 = vrot.slane %v2954_v60, 2  ;;  %v4034_v15 = vsel %vm3994_vm3, %v5327_v56, %v4033_v62  ;;  %v5425_v0 = vmul.f32 %v1941_v52, %v1941_v52  ;;  %v3773_v57 = vmul.f32 0.5, %v3645_v1 }
 0x1b1   : > { %v4035_v22 = vsel %vm3996_vm4, %v5226_v6, %v4034_v15  ;;  %v1225_v14 = vperm.slane %v5375_v19, 4  ;;  %1237 = vperm.xlu2 %4705, %v1232_v30   ;;  %v1218_v56 = vperm.slane %v5375_v19, 3  ;;  %v1489_v10 = vmul.f32 %v1007_v4, %v449_v59 }
 0x1b2   : > { %v5430_v39 = vadd.f32 %v2955_v54, %v2954_v60  ;;  %v4036_v8 = vsel %vm3998_vm5, %v5381_v11, %v4035_v22  ;;  %v5435_v18 = vmul.f32 0.5, %v3663_v31  ;;  %v1479_v12 = vmul.f32 %v937_v37, %v439_v25  ;;  %v4223_v54 = vld [vmem:[%s6345_s5 + $0x8] sm:$0xff] }
 0x1b3   : > { %v4037_v44 = vsel %vm4000_vm6, %v3772_v32, %v4036_v8  ;;  %1230 = vperm.xlu1 %4704, %v1225_v14   ;;  %v1478_v58 = vmul.f32 %v930_v61, %v438_v50  ;;  %v5438_v6 = vadd.f32 %v1933_v43, %v1932_v63  ;;  %1223 = vperm.xlu0 %4703, %v1218_v56   ;;  %v2026_v48 = vsel %vm1549_vm0, %v1489_v10, 0.0  ;;  %v4225_v63 = vld [vmem:[%s6345_s5 + $0x18] sm:$0xff] }
 0x1b4   : > { %v4038_v17 = vsel %vm4002_vm7, %v3773_v57, %v4037_v44  ;;  %v2514_v11 = vmul.f32 %v1489_v10, %v1489_v10  ;;  %v2027_v33 = vrot.slane %v2026_v48, 4  ;;  %v1956_v26 = vsel %vm1549_vm0, %v1479_v12, 0.0  ;;  %4290 = vmatpush.msra.mxu1 %v4225_v63  ;;  %4691 = vmatpush.msra.mxu3 %v4225_v63  ;;  %v5472_v63 = vld [vmem:[%s6344_s4] ss:$0 sm:$0xff] }
 0x1b5   : > { %4658 = vmatmul.msk.f32.gmra.mxu0 %vm1549_vm0, %v4038_v17  ;;  %v2504_v21 = vmul.f32 %v1479_v12, %v1479_v12  ;;  %v1949_v53 = vsel %vm1549_vm0, %v1478_v58, 0.0  ;;  %v2957_v34 = vrot.slane %v5430_v39, 1  ;;  %v1957_v35 = vrot.slane %v1956_v26, 4 }
 0x1b6   : > { %v3050_v7 = vsel %vm1549_vm0, %v2514_v11, 0.0  ;;  %v1950_v36 = vrot.slane %v1949_v53, 4  ;;  %v2028_v41 = vadd.f32 %v2027_v33, %v2026_v48  ;;  %v2503_v27 = vmul.f32 %v1478_v58, %v1478_v58  ;;  %4291 = vmatpush.msra.mxu1 %v4224_v46  ;;  %4692 = vmatpush.msra.mxu3 %v4224_v46 }
 0x1b7   : > { %v3051_v9 = vrot.slane %v3050_v7, 4  ;;  %v2980_v5 = vsel %vm1549_vm0, %v2504_v21, 0.0  ;;  %v1958_v28 = vadd.f32 %v1957_v35, %v1956_v26  ;;  %v1253_v3 = vperm.slane %v5446_v47, 0  ;;  %v958_v35 = vpop.permute.xlu1 %957 }
 0x1b8   : > { %v2981_v42 = vrot.slane %v2980_v5, 4  ;;  %v1951_v52 = vadd.f32 %v1950_v36, %v1949_v53  ;;  %v2029_v60 = vrot.slane %v2028_v41, 2  ;;  %v2973_v4 = vsel %vm1549_vm0, %v2503_v27, 0.0  ;;  %4292 = vmatpush.msra.mxu1 %v4223_v54  ;;  %4693 = vmatpush.msra.mxu3 %v4223_v54  ;;  %v442_v36 = vld [vmem:[%s4817_s21 + $0x1e8] sm:$0xff]  ;;  %v4222_v54 = vld [vmem:[%s6345_s5] sm:$0xff] }
 0x1b9   : > { %v3052_v1 = vadd.f32 %v3051_v9, %v3050_v7  ;;  %v1246_v31 = vperm.slane %v5375_v19, 7  ;;  %v1959_v32 = vrot.slane %v1958_v28, 2  ;;  %v2974_v43 = vrot.slane %v2973_v4, 4  ;;  %1258 = vperm.xlu2 %4705, %v1253_v3  }
 0x1ba   : > { %v2982_v62 = vadd.f32 %v2981_v42, %v2980_v5  ;;  %v1952_v59 = vrot.slane %v1951_v52, 2  ;;  %v2030_v15 = vadd.f32 %v2029_v60, %v2028_v41  ;;  %v1239_v37 = vperm.slane %v5375_v19, 6  ;;  %v441_v42 = vld [vmem:[%s4817_s21 + $0x1e0] sm:$0xff]  ;;  %4293 = vmatpush.msra.mxu1 %v4222_v54  ;;  %4694 = vmatpush.msra.mxu3 %v4222_v54 }
 0x1bb   : > { %v3053_v30 = vrot.slane %v3052_v1, 2  ;;  %1251 = vperm.xlu1 %4704, %v1246_v31   ;;  %v1492_v25 = vmul.f32 %v1028_v16, %v452_v20  ;;  %v1960_v61 = vadd.f32 %v1959_v32, %v1958_v28  ;;  %v2975_v22 = vadd.f32 %v2974_v43, %v2973_v4  ;;  %v951_v28 = vpop.permute.xlu0 %950  ;;  %v4158_v31 = vpop.f32.mrf.mxu0 }
 0x1bc   : > { %v2983_v50 = vrot.slane %v2982_v62, 2  ;;  %v1953_v57 = vadd.f32 %v1952_v59, %v1951_v52  ;;  %v2031_v14 = vrot.slane %v2030_v15, 1  ;;  %1244 = vperm.xlu0 %4703, %v1239_v37   ;;  %v5476_v46 = vmul.f32 %v5438_v6, %v5438_v6 }
 0x1bd   : > { %v3054_v8 = vadd.f32 %v3053_v30, %v3052_v1  ;;  %v2047_v56 = vsel %vm1549_vm0, %v1492_v25, 0.0  ;;  %v2517_v10 = vmul.f32 %v1492_v25, %v1492_v25  ;;  %v1961_v44 = vrot.slane %v1960_v61, 1 }
 0x1be   : > { %v2984_v12 = vadd.f32 %v2983_v50, %v2982_v62  ;;  %v1954_v58 = vrot.slane %v1953_v57, 1  ;;  %v2976_v17 = vrot.slane %v2975_v22, 2  ;;  %v2032_v19 = vadd.f32 %v2031_v14, %v2030_v15 }
 0x1bf   : > { %v3055_v48 = vrot.slane %v3054_v8, 1  ;;  %v2048_v11 = vrot.slane %v2047_v56, 4  ;;  %v3071_v33 = vsel %vm1549_vm0, %v2517_v10, 0.0  ;;  %v1962_v26 = vadd.f32 %v1961_v44, %v1960_v61 }
 0x1c0   : > { %v2985_v21 = vrot.slane %v2984_v12, 1  ;;  %v1955_v53 = vadd.f32 %v1954_v58, %v1953_v57  ;;  %v2977_v7 = vadd.f32 %v2976_v17, %v2975_v22  ;;  %v3538_v9 = vmul.f32 %v2032_v19, %v2032_v19 }
 0x1c1   : > { %v3056_v41 = vadd.f32 %v3055_v48, %v3054_v8  ;;  %v2049_v5 = vadd.f32 %v2048_v11, %v2047_v56  ;;  %v3072_v27 = vrot.slane %v3071_v33, 4  ;;  %v3528_v3 = vmul.f32 %v1962_v26, %v1962_v26 }
 0x1c2   : > { %v2986_v52 = vadd.f32 %v2985_v21, %v2984_v12  ;;  %v2978_v16 = vrot.slane %v2977_v7, 1  ;;  %v3527_v20 = vmul.f32 %v1955_v53, %v1955_v53  ;;  %v1482_v4 = vmul.f32 %v958_v35, %v442_v36  ;;  %v1049_v21 = vpop.permute.xlu2 %1048  ;;  %v455_v53 = vld [vmem:[%s4817_s21 + $0x250] sm:$0xff]  ;;  %v445_v35 = vld [vmem:[%s4817_s21 + $0x200] sm:$0xff] }
 0x1c3   : > { %v2050_v60 = vrot.slane %v2049_v5, 2  ;;  %v3073_v1 = vadd.f32 %v3072_v27, %v3071_v33  ;;  %v5481_v32 = vadd.f32 %v2957_v34, %v5430_v39  ;;  %v3666_v62 = vsub.f32 %v3538_v9, %v3056_v41  ;;  %v972_v27 = vpop.permute.xlu0 %971 }
 0x1c4   : > { %v2979_v59 = vadd.f32 %v2978_v16, %v2977_v7  ;;  %v1481_v43 = vmul.f32 %v951_v28, %v441_v42  ;;  %v3656_v15 = vsub.f32 %v3528_v3, %v2986_v52  ;;  %v1977_v37 = vsel %vm1549_vm0, %v1482_v4, 0.0  ;;  %v979_v7 = vpop.permute.xlu1 %978  ;;  %v444_v28 = vld [vmem:[%s4817_s21 + $0x1f8] sm:$0xff] }
 0x1c5   : > { %v2051_v30 = vadd.f32 %v2050_v60, %v2049_v5  ;;  %v3074_v6 = vrot.slane %v3073_v1, 2  ;;  %v1978_v61 = vrot.slane %v1977_v37, 4  ;;  %v2507_v50 = vmul.f32 %v1482_v4, %v1482_v4 }
 0x1c6   : > { %v3655_v25 = vsub.f32 %v3527_v20, %v2979_v59  ;;  %v4159_v39 = vadd.f32 %v5472_v63, %v4158_v31  ;;  %v1970_v22 = vsel %vm1549_vm0, %v1481_v43, 0.0  ;;  %v2506_v14 = vmul.f32 %v1481_v43, %v1481_v43 }
 0x1c7   : > { %v2052_v34 = vrot.slane %v2051_v30, 1  ;;  %v5488_v57 = vadd.f32 %v3074_v6, %v3073_v1  ;;  %v5491_v8 = vmul.f32 0.5, %v3666_v62  ;;  %v1979_v56 = vadd.f32 %v1978_v61, %v1977_v37 }
 0x1c8   : > { %v3001_v10 = vsel %vm1549_vm0, %v2507_v50, 0.0  ;;  %v1971_v44 = vrot.slane %v1970_v22, 4  ;;  %v5494_v12 = vmul.f32 0.5, %v3656_v15  ;;  %v3783_v58 = vmul.f32 0.5, %v3655_v25 }
 0x1c9   : > { %v3002_v17 = vrot.slane %v3001_v10, 4  ;;  %v2994_v19 = vsel %vm1549_vm0, %v2506_v14, 0.0  ;;  %v2053_v48 = vadd.f32 %v2052_v34, %v2051_v30  ;;  %v1980_v11 = vrot.slane %v1979_v56, 2 }
 0x1ca   : > { %v1972_v33 = vadd.f32 %v1971_v44, %v1970_v22  ;;  %v2995_v26 = vrot.slane %v2994_v19, 4  ;;  %v3076_v36 = vrot.slane %v5488_v57, 1  ;;  %v4206_v9 = vmax.f32 %v4159_v39, 0.0 }
 0x1cb   : > { %v3003_v41 = vadd.f32 %v3002_v17, %v3001_v10  ;;  %v1274_v5 = vperm.slane %v5446_v47, 3  ;;  %v1981_v42 = vadd.f32 %v1980_v11, %v1979_v56  ;;  %v1267_v16 = vperm.slane %v5446_v47, 2 }
 0x1cc   : > { %v1973_v52 = vrot.slane %v1972_v33, 2  ;;  %v2996_v3 = vadd.f32 %v2995_v26, %v2994_v19  ;;  %v1260_v60 = vperm.slane %v5446_v47, 1  ;;  %v1495_v1 = vmul.f32 %v1049_v21, %v455_v53  ;;  %4669 = vmatmul.msk.f32.vlgmr.msra.gmra.mxu1 %vm1549_vm0, %v4206_v9 }
 0x1cd   : > { %v3004_v20 = vrot.slane %v3003_v41, 2  ;;  %1279 = vperm.xlu2 %4705, %v1274_v5   ;;  %v1485_v4 = vmul.f32 %v979_v7, %v445_v35  ;;  %v1982_v31 = vrot.slane %v1981_v42, 1  ;;  %1272 = vperm.xlu1 %4704, %v1267_v16   ;;  %v1484_v43 = vmul.f32 %v972_v27, %v444_v28 }
 0x1ce   : > { %v1974_v62 = vadd.f32 %v1973_v52, %v1972_v33  ;;  %v2997_v59 = vrot.slane %v2996_v3, 2  ;;  %1265 = vperm.xlu0 %4703, %v1260_v60   ;;  %v2068_v15 = vsel %vm1549_vm0, %v1495_v1, 0.0  ;;  %v2520_v30 = vmul.f32 %v1495_v1, %v1495_v1 }
 0x1cf   : > { %v3005_v54 = vadd.f32 %v3004_v20, %v3003_v41  ;;  %v1998_v6 = vsel %vm1549_vm0, %v1485_v4, 0.0  ;;  %v1983_v37 = vadd.f32 %v1982_v31, %v1981_v42  ;;  %v2069_v50 = vrot.slane %v2068_v15, 4 }
 0x1d0   : > { %v1975_v25 = vrot.slane %v1974_v62, 1  ;;  %v2998_v61 = vadd.f32 %v2997_v59, %v2996_v3  ;;  %v3092_v34 = vsel %vm1549_vm0, %v2520_v30, 0.0  ;;  %v1999_v22 = vrot.slane %v1998_v6, 4 }
 0x1d1   : > { %v3006_v39 = vrot.slane %v3005_v54, 1  ;;  %v2510_v14 = vmul.f32 %v1485_v4, %v1485_v4  ;;  %v3531_v56 = vmul.f32 %v1983_v37, %v1983_v37  ;;  %v2070_v17 = vadd.f32 %v2069_v50, %v2068_v15 }
 0x1d2   : > { %v1976_v10 = vadd.f32 %v1975_v25, %v1974_v62  ;;  %v2999_v44 = vrot.slane %v2998_v61, 1  ;;  %v3093_v11 = vrot.slane %v3092_v34, 4  ;;  %v2000_v33 = vadd.f32 %v1999_v22, %v1998_v6 }
 0x1d3   : > { %v3007_v19 = vadd.f32 %v3006_v39, %v3005_v54  ;;  %v3022_v26 = vsel %vm1549_vm0, %v2510_v14, 0.0  ;;  %v2071_v7 = vrot.slane %v2070_v17, 2  ;;  %v5511_v41 = vsel %vm3990_vm1, %v3783_v58, %v5345_v55 }
 0x1d4   : > { %v3000_v21 = vadd.f32 %v2999_v44, %v2998_v61  ;;  %v3530_v53 = vmul.f32 %v1976_v10, %v1976_v10  ;;  %v3023_v35 = vrot.slane %v3022_v26, 4  ;;  %v3094_v9 = vadd.f32 %v3093_v11, %v3092_v34  ;;  %v1000_v10 = vpop.permute.xlu1 %999 }
 0x1d5   : > { %v2001_v5 = vrot.slane %v2000_v33, 2  ;;  %v1991_v27 = vsel %vm1549_vm0, %v1484_v43, 0.0  ;;  %v5514_v28 = vmul.f32 %v2053_v48, %v2053_v48  ;;  %v2072_v42 = vadd.f32 %v2071_v7, %v2070_v17 }
 0x1d6   : > { %v3024_v52 = vadd.f32 %v3023_v35, %v3022_v26  ;;  %v1992_v3 = vrot.slane %v1991_v27, 4  ;;  %v3659_v16 = vsub.f32 %v3531_v56, %v3007_v19  ;;  %v3095_v20 = vrot.slane %v3094_v9, 2  ;;  %v1070_v56 = vpop.permute.xlu2 %1069 }
 0x1d7   : > { %v2002_v60 = vadd.f32 %v2001_v5, %v2000_v33  ;;  %v2509_v1 = vmul.f32 %v1484_v43, %v1484_v43  ;;  %v3658_v4 = vsub.f32 %v3530_v53, %v3000_v21  ;;  %v2073_v31 = vrot.slane %v2072_v42, 1 }
 0x1d8   : > { %v3025_v62 = vrot.slane %v3024_v52, 2  ;;  %v1993_v59 = vadd.f32 %v1992_v3, %v1991_v27  ;;  %v3096_v54 = vadd.f32 %v3095_v20, %v3094_v9  ;;  %v2965_v48 = vadd.f32 %v2964_v45, %v5406_v40  ;;  %v447_v3 = vld [vmem:[%s4817_s21 + $0x210] sm:$0xff] }
 0x1d9   : > { %v2003_v55 = vrot.slane %v2002_v60, 1  ;;  %v3015_v58 = vsel %vm1549_vm0, %v2509_v1, 0.0  ;;  %v2074_v15 = vadd.f32 %v2073_v31, %v2072_v42  ;;  %v3652_v43 = vsub.f32 %v5476_v46, %v5481_v32  ;;  %v458_v32 = vld [vmem:[%s4817_s21 + $0x268] sm:$0xff] }
 0x1da   : > { %v3026_v30 = vadd.f32 %v3025_v62, %v3024_v52  ;;  %v1994_v6 = vrot.slane %v1993_v59, 2  ;;  %v3016_v37 = vrot.slane %v3015_v58, 4  ;;  %v3097_v25 = vrot.slane %v3096_v54, 1  ;;  %v993_v52 = vpop.permute.xlu0 %992 }
 0x1db   : > { %v2004_v61 = vadd.f32 %v2003_v55, %v2002_v60  ;;  %v3653_v50 = vsub.f32 %v5425_v0, %v2965_v48  ;;  %v3544_v39 = vmul.f32 %v2074_v15, %v2074_v15  ;;  %v3780_v45 = vmul.f32 0.5, %v3652_v43 }
 0x1dc   : > { %v3027_v34 = vrot.slane %v3026_v30, 1  ;;  %v1995_v22 = vadd.f32 %v1994_v6, %v1993_v59  ;;  %v3017_v14 = vadd.f32 %v3016_v37, %v3015_v58  ;;  %v3098_v44 = vadd.f32 %v3097_v25, %v3096_v54 }
 0x1dd   : > { %v3534_v40 = vmul.f32 %v2004_v61, %v2004_v61  ;;  %v3781_v17 = vmul.f32 0.5, %v3653_v50  ;;  %v4040_v46 = vsel %vm3992_vm2, %v5272_v29, %v5391_v13  ;;  %v1295_v21 = vperm.slane %v5446_v47, 6  ;;  %v448_v29 = vld [vmem:[%s4817_s21 + $0x218] sm:$0xff] }
 0x1de   : > { %v3028_v19 = vadd.f32 %v3027_v34, %v3026_v30  ;;  %v1996_v11 = vrot.slane %v1995_v22, 1  ;;  %v3018_v33 = vrot.slane %v3017_v14, 2  ;;  %v3672_v0 = vsub.f32 %v3544_v39, %v3098_v44  ;;  %v1091_v50 = vpop.permute.xlu2 %1090  ;;  %v461_v39 = vld [vmem:[%s4817_s21 + $0x280] sm:$0xff]  ;;  %v1021_v34 = vpop.permute.xlu1 %1020 }
 0x1df   : > { %v4041_v26 = vsel %vm3994_vm3, %v5412_v38, %v4040_v46  ;;  %v1288_v53 = vperm.slane %v5446_v47, 5  ;;  %v5531_v7 = vmul.f32 0.5, %v3659_v16  ;;  %v5538_v13 = vmul.f32 0.5, %v3658_v4  ;;  %1300 = vperm.xlu2 %4705, %v1295_v21   ;;  %v5545_v16 = vld [vmem:[%s4805_s16 + $0x70] sm:$0xff] }
 0x1e0   : > { %v3662_v35 = vsub.f32 %v3534_v40, %v3028_v19  ;;  %v5533_v9 = vadd.f32 %v3018_v33, %v3017_v14  ;;  %v4042_v5 = vsel %vm3996_vm4, %v5410_v51, %v4041_v26  ;;  %v1281_v38 = vperm.slane %v5446_v47, 4 }
 0x1e1   : > { %v4043_v27 = vsel %vm3998_vm5, %v5315_v49, %v4042_v5  ;;  %1293 = vperm.xlu1 %4704, %v1288_v53   ;;  %v1498_v42 = vmul.f32 %v1070_v56, %v458_v32  ;;  %v5547_v20 = vmul.f32 0.5, %v3672_v0  ;;  %v5551_v51 = vadd.f32 %v1996_v11, %v1995_v22  ;;  %v451_v22 = vld [vmem:[%s4817_s21 + $0x230] sm:$0xff] }
 0x1e2   : > { %v5549_v60 = vmul.f32 0.5, %v3662_v35  ;;  %v4044_v1 = vsel %vm4000_vm6, %v3780_v45, %v4043_v27  ;;  %1286 = vperm.xlu0 %4703, %v1281_v38   ;;  %v1488_v62 = vmul.f32 %v1000_v10, %v448_v29  ;;  %v3020_v59 = vrot.slane %v5533_v9, 1 }
 0x1e3   : > { %v4045_v4 = vsel %vm4002_vm7, %v3781_v17, %v4044_v1  ;;  %v2089_v49 = vsel %vm1549_vm0, %v1498_v42, 0.0  ;;  %v2523_v31 = vmul.f32 %v1498_v42, %v1498_v42  ;;  %v1487_v55 = vmul.f32 %v993_v52, %v447_v3 }
 0x1e4   : > { %4659 = vmatmul.msk.f32.gmra.mxu0 %vm1549_vm0, %v4045_v4  ;;  %v2090_v54 = vrot.slane %v2089_v49, 4  ;;  %v1316_v58 = vperm.slane %v5545_v16, 1  ;;  %v2019_v15 = vsel %vm1549_vm0, %v1488_v62, 0.0  ;;  %v2513_v30 = vmul.f32 %v1488_v62, %v1488_v62 }
 0x1e5   : > { %v3113_v48 = vsel %vm1549_vm0, %v2523_v31, 0.0  ;;  %v1309_v6 = vperm.slane %v5545_v16, 0  ;;  %v2020_v61 = vrot.slane %v2019_v15, 4  ;;  %v2012_v43 = vsel %vm1549_vm0, %v1487_v55, 0.0 }
 0x1e6   : > { %v2091_v37 = vadd.f32 %v2090_v54, %v2089_v49  ;;  %v3114_v25 = vrot.slane %v3113_v48, 4  ;;  %v3043_v14 = vsel %vm1549_vm0, %v2513_v30, 0.0  ;;  %v2013_v56 = vrot.slane %v2012_v43, 4 }
 0x1e7   : > { %v2512_v10 = vmul.f32 %v1487_v55, %v1487_v55  ;;  %v1302_v44 = vperm.slane %v5446_v47, 7  ;;  %v2021_v17 = vadd.f32 %v2020_v61, %v2019_v15  ;;  %v3044_v19 = vrot.slane %v3043_v14, 4  ;;  %1321 = vperm.xlu2 %4705, %v1316_v58  }
 0x1e8   : > { %v2092_v40 = vrot.slane %v2091_v37, 2  ;;  %v3115_v45 = vadd.f32 %v3114_v25, %v3113_v48  ;;  %v2014_v11 = vadd.f32 %v2013_v56, %v2012_v43  ;;  %v1501_v46 = vmul.f32 %v1091_v50, %v461_v39 }
 0x1e9   : > { %v3036_v33 = vsel %vm1549_vm0, %v2512_v10, 0.0  ;;  %1314 = vperm.xlu1 %4704, %v1309_v6   ;;  %v1491_v32 = vmul.f32 %v1021_v34, %v451_v22  ;;  %v2022_v21 = vrot.slane %v2021_v17, 2  ;;  %v3045_v53 = vadd.f32 %v3044_v19, %v3043_v14 }
 0x1ea   : > { %v2093_v0 = vadd.f32 %v2092_v40, %v2091_v37  ;;  %v3116_v26 = vrot.slane %v3115_v45, 2  ;;  %v2015_v35 = vrot.slane %v2014_v11, 2  ;;  %v3037_v5 = vrot.slane %v3036_v33, 4  ;;  %1307 = vperm.xlu0 %4703, %v1302_v44   ;;  %v1014_v44 = vpop.permute.xlu0 %1013  ;;  %v450_v40 = vld [vmem:[%s4817_s21 + $0x228] sm:$0xff] }
 0x1eb   : > { %v2110_v47 = vsel %vm1549_vm0, %v1501_v46, 0.0  ;;  %v2526_v29 = vmul.f32 %v1501_v46, %v1501_v46  ;;  %v2023_v42 = vadd.f32 %v2022_v21, %v2021_v17  ;;  %v3046_v52 = vrot.slane %v3045_v53, 2 }
 0x1ec   : > { %v2094_v27 = vrot.slane %v2093_v0, 1  ;;  %v3117_v38 = vadd.f32 %v3116_v26, %v3115_v45  ;;  %v2016_v3 = vadd.f32 %v2015_v35, %v2014_v11  ;;  %v3038_v1 = vadd.f32 %v3037_v5, %v3036_v33  ;;  %v4161_v33 = vpop.f32.mrf.mxu0 }
 0x1ed   : > { %v2111_v4 = vrot.slane %v2110_v47, 4  ;;  %v3134_v49 = vsel %vm1549_vm0, %v2526_v29, 0.0  ;;  %v2024_v54 = vrot.slane %v2023_v42, 1  ;;  %v3047_v55 = vadd.f32 %v3046_v52, %v3045_v53 }
 0x1ee   : > { %v2095_v31 = vadd.f32 %v2094_v27, %v2093_v0  ;;  %v3118_v62 = vrot.slane %v3117_v38, 1  ;;  %v2017_v58 = vrot.slane %v2016_v3, 1  ;;  %v3039_v48 = vrot.slane %v3038_v1, 2 }
 0x1ef   : > { %v2112_v15 = vadd.f32 %v2111_v4, %v2110_v47  ;;  %v3135_v30 = vrot.slane %v3134_v49, 4  ;;  %v2025_v25 = vadd.f32 %v2024_v54, %v2023_v42  ;;  %v3048_v61 = vrot.slane %v3047_v55, 1 }
 0x1f0   : > { %v3119_v6 = vadd.f32 %v3118_v62, %v3117_v38  ;;  %v3547_v37 = vmul.f32 %v2095_v31, %v2095_v31  ;;  %v2018_v43 = vadd.f32 %v2017_v58, %v2016_v3  ;;  %v3040_v50 = vadd.f32 %v3039_v48, %v3038_v1 }
 0x1f1   : > { %v2113_v39 = vrot.slane %v2112_v15, 2  ;;  %v3136_v34 = vadd.f32 %v3135_v30, %v3134_v49  ;;  %v5572_v22 = vmul.f32 %v5551_v51, %v5551_v51  ;;  %v3049_v56 = vadd.f32 %v3048_v61, %v3047_v55 }
 0x1f2   : > { %v3675_v14 = vsub.f32 %v3547_v37, %v3119_v6  ;;  %v2040_v10 = vsel %vm1549_vm0, %v1491_v32, 0.0  ;;  %v3537_v45 = vmul.f32 %v2025_v25, %v2025_v25  ;;  %v3041_v17 = vrot.slane %v3040_v50, 1 }
 0x1f3   : > { %v2114_v19 = vadd.f32 %v2113_v39, %v2112_v15  ;;  %v3137_v11 = vrot.slane %v3136_v34, 2  ;;  %v5579_v46 = vsel %vm3990_vm1, %v5435_v18, %v5549_v60  ;;  %v3536_v0 = vmul.f32 %v2018_v43, %v2018_v43 }
 0x1f4   : > { %v2041_v26 = vrot.slane %v2040_v10, 4  ;;  %v2516_v51 = vmul.f32 %v1491_v32, %v1491_v32  ;;  %v3042_v21 = vadd.f32 %v3041_v17, %v3040_v50  ;;  %v1490_v5 = vmul.f32 %v1014_v44, %v450_v40  ;;  %v464_v17 = vld [vmem:[%s4817_s21 + $0x298] sm:$0xff] }
 0x1f5   : > { %v2115_v53 = vrot.slane %v2114_v19, 1  ;;  %v3138_v35 = vadd.f32 %v3137_v11, %v3136_v34  ;;  %v5581_v47 = vmul.f32 0.5, %v3675_v14  ;;  %v4162_v38 = vadd.f32 %v5472_v63, %v4161_v33 }
 0x1f6   : > { %v2042_v29 = vadd.f32 %v2041_v26, %v2040_v10  ;;  %v3064_v27 = vsel %vm1549_vm0, %v2516_v51, 0.0  ;;  %v3665_v42 = vsub.f32 %v3537_v45, %v3049_v56  ;;  %v2033_v60 = vsel %vm1549_vm0, %v1490_v5, 0.0  ;;  %v1035_v26 = vpop.permute.xlu0 %1034  ;;  %v453_v51 = vld [vmem:[%s4817_s21 + $0x240] sm:$0xff] }
 0x1f7   : > { %v2116_v52 = vadd.f32 %v2115_v53, %v2114_v19  ;;  %v3139_v3 = vrot.slane %v3138_v35, 1  ;;  %v3065_v1 = vrot.slane %v3064_v27, 4  ;;  %v2515_v4 = vmul.f32 %v1490_v5, %v1490_v5 }
 0x1f8   : > { %v2043_v18 = vrot.slane %v2042_v29, 2  ;;  %v4207_v32 = vmax.f32 %v4162_v38, 0.0  ;;  %v3664_v49 = vsub.f32 %v3536_v0, %v3042_v21  ;;  %v2034_v58 = vrot.slane %v2033_v60, 4 }
 0x1f9   : > { %v3140_v31 = vadd.f32 %v3139_v3, %v3138_v35  ;;  %v3550_v62 = vmul.f32 %v2116_v52, %v2116_v52  ;;  %v3066_v54 = vadd.f32 %v3065_v1, %v3064_v27  ;;  %v3057_v48 = vsel %vm1549_vm0, %v2515_v4, 0.0 }
 0x1fa   : > { %v2044_v55 = vadd.f32 %v2043_v18, %v2042_v29  ;;  %v1337_v15 = vperm.slane %v5545_v16, 4  ;;  %4670 = vmatmul.msk.f32.gmra.mxu1 %vm1549_vm0, %v4207_v32  ;;  %v3058_v37 = vrot.slane %v3057_v48, 4  ;;  %v1330_v25 = vperm.slane %v5545_v16, 3 }
 0x1fb   : > { %v3678_v30 = vsub.f32 %v3550_v62, %v3140_v31  ;;  %v3067_v6 = vrot.slane %v3066_v54, 2  ;;  %v2035_v43 = vadd.f32 %v2034_v58, %v2033_v60  ;;  %v1323_v50 = vperm.slane %v5545_v16, 2 }
 0x1fc   : > { %v2045_v61 = vrot.slane %v2044_v55, 1  ;;  %1342 = vperm.xlu2 %4705, %v1337_v15   ;;  %v3021_v39 = vadd.f32 %v3020_v59, %v5533_v9  ;;  %v5594_v34 = vmul.f32 0.5, %v3665_v42  ;;  %v3059_v56 = vadd.f32 %v3058_v37, %v3057_v48  ;;  %1335 = vperm.xlu1 %4704, %v1330_v25   ;;  %v1112_v59 = vpop.permute.xlu2 %1111 }
 0x1fd   : > { %v3068_v14 = vadd.f32 %v3067_v6, %v3066_v54  ;;  %v3660_v10 = vsub.f32 %v5404_v24, %v5397_v23  ;;  %v5598_v44 = vmul.f32 0.5, %v3664_v49  ;;  %v2036_v40 = vrot.slane %v2035_v43, 2  ;;  %1328 = vperm.xlu0 %4703, %v1323_v50   ;;  %v1042_v23 = vpop.permute.xlu1 %1041  ;;  %v454_v24 = vld [vmem:[%s4817_s21 + $0x248] sm:$0xff] }
 0x1fe   : > { %v3661_v45 = vsub.f32 %v5572_v22, %v3021_v39  ;;  %v4047_v9 = vsel %vm3992_vm2, %v5494_v12, %v5511_v41  ;;  %v5605_v19 = vmul.f32 0.5, %v3678_v30  ;;  %v2046_v11 = vadd.f32 %v2045_v61, %v2044_v55 }
 0x1ff   : > { %v3060_v33 = vrot.slane %v3059_v56, 2  ;;  %v4048_v0 = vsel %vm3994_vm3, %v5384_v2, %v4047_v9  ;;  %v2037_v21 = vadd.f32 %v2036_v40, %v2035_v43  ;;  %v3788_v53 = vmul.f32 0.5, %v3660_v10 }
 0x200   : > { %v3789_v22 = vmul.f32 0.5, %v3661_v45  ;;  %v4049_v35 = vsel %vm3996_vm4, %v5538_v13, %v4048_v0  ;;  %v3069_v12 = vrot.slane %v3068_v14, 1  ;;  %v1504_v29 = vmul.f32 %v1112_v59, %v464_v17 }
 0x201   : > { %v3061_v41 = vadd.f32 %v3060_v33, %v3059_v56  ;;  %v4050_v5 = vsel %vm3998_vm5, %v5531_v7, %v4049_v35  ;;  %v2038_v27 = vrot.slane %v2037_v21, 1  ;;  %v1494_v2 = vmul.f32 %v1042_v23, %v454_v24 }
 0x202   : > { %v4051_v38 = vsel %vm4000_vm6, %v3788_v53, %v4050_v5  ;;  %v1493_v42 = vmul.f32 %v1035_v26, %v453_v51  ;;  %v5616_v52 = vmul.f32 %v2046_v11, %v2046_v11  ;;  %v2131_v1 = vsel %vm1549_vm0, %v1504_v29, 0.0  ;;  %v467_v11 = vld [vmem:[%s4817_s21 + $0x2b0] sm:$0xff]  ;;  %v457_v51 = vld [vmem:[%s4817_s21 + $0x260] sm:$0xff] }
 0x203   : > { %v4052_v3 = vsel %vm4002_vm7, %v3789_v22, %v4051_v38  ;;  %v2529_v18 = vmul.f32 %v1504_v29, %v1504_v29  ;;  %v3062_v60 = vrot.slane %v3061_v41, 1  ;;  %v2132_v13 = vrot.slane %v2131_v1, 4 }
 0x204   : > { %4660 = vmatmul.msk.f32.gmra.mxu0 %vm1549_vm0, %v4052_v3  ;;  %v2061_v4 = vsel %vm1549_vm0, %v1494_v2, 0.0  ;;  %v2519_v7 = vmul.f32 %v1494_v2, %v1494_v2  ;;  %v5622_v32 = vadd.f32 %v3069_v12, %v3068_v14  ;;  %v2054_v62 = vsel %vm1549_vm0, %v1493_v42, 0.0  ;;  %v1133_v17 = vpop.permute.xlu2 %1132 }
 0x205   : > { %v3155_v49 = vsel %vm1549_vm0, %v2529_v18, 0.0  ;;  %v2062_v31 = vrot.slane %v2061_v4, 4  ;;  %v2039_v54 = vadd.f32 %v2038_v27, %v2037_v21  ;;  %v2133_v55 = vadd.f32 %v2132_v13, %v2131_v1  ;;  %v1063_v26 = vpop.permute.xlu1 %1062 }
 0x206   : > { %v3156_v58 = vrot.slane %v3155_v49, 4  ;;  %v3085_v48 = vsel %vm1549_vm0, %v2519_v7, 0.0  ;;  %v2055_v6 = vrot.slane %v2054_v62, 4  ;;  %v2518_v37 = vmul.f32 %v1493_v42, %v1493_v42 }
 0x207   : > { %v2063_v15 = vadd.f32 %v2062_v31, %v2061_v4  ;;  %v3086_v30 = vrot.slane %v3085_v48, 4  ;;  %v5627_v25 = vadd.f32 %v3062_v60, %v3061_v41  ;;  %v2134_v61 = vrot.slane %v2133_v55, 2 }
 0x208   : > { %v3157_v43 = vadd.f32 %v3156_v58, %v3155_v49  ;;  %v1358_v50 = vperm.slane %v5545_v16, 7  ;;  %v2056_v56 = vadd.f32 %v2055_v6, %v2054_v62  ;;  %v3078_v10 = vsel %vm1549_vm0, %v2518_v37, 0.0  ;;  %v456_v6 = vld [vmem:[%s4817_s21 + $0x258] sm:$0xff] }
 0x209   : > { %v2064_v39 = vrot.slane %v2063_v15, 2  ;;  %v3087_v14 = vadd.f32 %v3086_v30, %v3085_v48  ;;  %v5631_v40 = vmul.f32 %v2039_v54, %v2039_v54  ;;  %v2135_v45 = vadd.f32 %v2134_v61, %v2133_v55  ;;  %v1056_v30 = vpop.permute.xlu0 %1055 }
 0x20a   : > { %v3158_v9 = vrot.slane %v3157_v43, 2  ;;  %v3079_v59 = vrot.slane %v3078_v10, 4  ;;  %1363 = vperm.xlu2 %4705, %v1358_v50   ;;  %v2057_v23 = vrot.slane %v2056_v56, 2  ;;  %v1351_v24 = vperm.slane %v5545_v16, 6 }
 0x20b   : > { %v2065_v33 = vadd.f32 %v2064_v39, %v2063_v15  ;;  %v3088_v0 = vrot.slane %v3087_v14, 2  ;;  %v2136_v21 = vrot.slane %v2135_v45, 1  ;;  %v1344_v35 = vperm.slane %v5545_v16, 5  ;;  %v5644_v39 = vld [vmem:[%s4805_s16 + $0x78] sm:$0xff] }
 0x20c   : > { %v3159_v53 = vadd.f32 %v3158_v9, %v3157_v43  ;;  %v3080_v22 = vadd.f32 %v3079_v59, %v3078_v10  ;;  %v2058_v5 = vadd.f32 %v2057_v23, %v2056_v56  ;;  %1356 = vperm.xlu1 %4704, %v1351_v24   ;;  %v1507_v29 = vmul.f32 %v1133_v17, %v467_v11 }
 0x20d   : > { %v2066_v12 = vrot.slane %v2065_v33, 1  ;;  %v3089_v41 = vadd.f32 %v3088_v0, %v3087_v14  ;;  %v2137_v27 = vadd.f32 %v2136_v21, %v2135_v45  ;;  %1349 = vperm.xlu0 %4703, %v1344_v35   ;;  %v1497_v42 = vmul.f32 %v1063_v26, %v457_v51 }
 0x20e   : > { %v3160_v38 = vrot.slane %v3159_v53, 1  ;;  %v3081_v2 = vrot.slane %v3080_v22, 2  ;;  %v2059_v18 = vrot.slane %v2058_v5, 1  ;;  %v2152_v60 = vsel %vm1549_vm0, %v1507_v29, 0.0 }
 0x20f   : > { %v2067_v3 = vadd.f32 %v2066_v12, %v2065_v33  ;;  %v3090_v1 = vrot.slane %v3089_v41, 1  ;;  %v3553_v4 = vmul.f32 %v2137_v27, %v2137_v27  ;;  %v2153_v16 = vrot.slane %v2152_v60, 4  ;;  %v4164_v27 = vpop.f32.mrf.mxu0 }
 0x210   : > { %v3161_v13 = vadd.f32 %v3160_v38, %v3159_v53  ;;  %v3082_v7 = vadd.f32 %v3081_v2, %v3080_v22  ;;  %v2060_v62 = vadd.f32 %v2059_v18, %v2058_v5  ;;  %v2532_v54 = vmul.f32 %v1507_v29, %v1507_v29  ;;  %v470_v18 = vld [vmem:[%s4817_s21 + $0x2c8] sm:$0xff] }
 0x211   : > { %v3091_v49 = vadd.f32 %v3090_v1, %v3089_v41  ;;  %v3543_v31 = vmul.f32 %v2067_v3, %v2067_v3  ;;  %v3667_v55 = vsub.f32 %v5631_v40, %v5627_v25  ;;  %v2154_v48 = vadd.f32 %v2153_v16, %v2152_v60  ;;  %v1154_v1 = vpop.permute.xlu2 %1153  ;;  %v1084_v16 = vpop.permute.xlu1 %1083 }
 0x212   : > { %v3083_v58 = vrot.slane %v3082_v7, 1  ;;  %v2082_v15 = vsel %vm1549_vm0, %v1497_v42, 0.0  ;;  %v3542_v61 = vmul.f32 %v2060_v62, %v2060_v62  ;;  %v3176_v43 = vsel %vm1549_vm0, %v2532_v54, 0.0 }
 0x213   : > { %v3671_v37 = vsub.f32 %v3543_v31, %v3091_v49  ;;  %v2083_v50 = vrot.slane %v2082_v15, 4  ;;  %v3681_v14 = vsub.f32 %v3553_v4, %v3161_v13  ;;  %v2155_v10 = vrot.slane %v2154_v48, 2  ;;  %v460_v49 = vld [vmem:[%s4817_s21 + $0x278] sm:$0xff] }
 0x214   : > { %v3084_v56 = vadd.f32 %v3083_v58, %v3082_v7  ;;  %v3177_v45 = vrot.slane %v3176_v43, 4  ;;  %v2522_v25 = vmul.f32 %v1497_v42, %v1497_v42  ;;  %v1496_v40 = vmul.f32 %v1056_v30, %v456_v6 }
 0x215   : > { %v3799_v9 = vmul.f32 0.5, %v3671_v37  ;;  %v2084_v59 = vadd.f32 %v2083_v50, %v2082_v15  ;;  %v2156_v11 = vadd.f32 %v2155_v10, %v2154_v48  ;;  %v1379_v0 = vperm.slane %v5644_v39, 2 }
 0x216   : > { %v3670_v17 = vsub.f32 %v3542_v61, %v3084_v56  ;;  %v3178_v33 = vadd.f32 %v3177_v45, %v3176_v43  ;;  %v3106_v24 = vsel %vm1549_vm0, %v2522_v25, 0.0  ;;  %v2075_v26 = vsel %vm1549_vm0, %v1496_v40, 0.0  ;;  %v1077_v45 = vpop.permute.xlu0 %1076 }
 0x217   : > { %v2085_v23 = vrot.slane %v2084_v59, 2  ;;  %v2521_v51 = vmul.f32 %v1496_v40, %v1496_v40  ;;  %v2157_v53 = vrot.slane %v2156_v11, 1  ;;  %v3107_v35 = vrot.slane %v3106_v24, 4  ;;  %1384 = vperm.xlu2 %4705, %v1379_v0  }
 0x218   : > { %v3798_v21 = vmul.f32 0.5, %v3670_v17  ;;  %v3179_v22 = vrot.slane %v3178_v33, 2  ;;  %v2076_v41 = vrot.slane %v2075_v26, 4  ;;  %v1372_v29 = vperm.slane %v5644_v39, 1 }
 0x219   : > { %v2086_v12 = vadd.f32 %v2085_v23, %v2084_v59  ;;  %v3099_v5 = vsel %vm1549_vm0, %v2521_v51, 0.0  ;;  %v5651_v38 = vmul.f32 0.5, %v3667_v55  ;;  %v5653_v2 = vmul.f32 0.5, %v3681_v14 }
 0x21a   : > { %v3180_v42 = vadd.f32 %v3179_v22, %v3178_v33  ;;  %v3108_v3 = vadd.f32 %v3107_v35, %v3106_v24  ;;  %v2077_v13 = vadd.f32 %v2076_v41, %v2075_v26  ;;  %v3100_v4 = vrot.slane %v3099_v5, 4  ;;  %1377 = vperm.xlu1 %4704, %v1372_v29  }
 0x21b   : > { %v2087_v60 = vrot.slane %v2086_v12, 1  ;;  %v1365_v7 = vperm.slane %v5644_v39, 0  ;;  %v5659_v31 = vsel %vm3990_vm1, %v3799_v9, %v3798_v21  ;;  %v2158_v62 = vadd.f32 %v2157_v53, %v2156_v11  ;;  %v459_v9 = vld [vmem:[%s4817_s21 + $0x270] sm:$0xff] }
 0x21c   : > { %v3109_v54 = vrot.slane %v3108_v3, 2  ;;  %v4165_v55 = vadd.f32 %v5472_v63, %v4164_v27  ;;  %v2078_v48 = vrot.slane %v2077_v13, 2  ;;  %v3101_v15 = vadd.f32 %v3100_v4, %v3099_v5 }
 0x21d   : > { %v2088_v58 = vadd.f32 %v2087_v60, %v2086_v12  ;;  %1370 = vperm.xlu0 %4703, %v1365_v7   ;;  %v1510_v30 = vmul.f32 %v1154_v1, %v470_v18  ;;  %v3181_v6 = vrot.slane %v3180_v42, 1  ;;  %v1500_v43 = vmul.f32 %v1084_v16, %v460_v49 }
 0x21e   : > { %v3110_v37 = vadd.f32 %v3109_v54, %v3108_v3  ;;  %v4208_v61 = vmax.f32 %v4165_v55, 0.0  ;;  %v2079_v14 = vadd.f32 %v2078_v48, %v2077_v13  ;;  %v3102_v56 = vrot.slane %v3101_v15, 2 }
 0x21f   : > { %v3546_v50 = vmul.f32 %v2088_v58, %v2088_v58  ;;  %v2173_v10 = vsel %vm1549_vm0, %v1510_v30, 0.0  ;;  %v2535_v40 = vmul.f32 %v1510_v30, %v1510_v30  ;;  %v2103_v63 = vsel %vm1549_vm0, %v1500_v43, 0.0 }
 0x220   : > { %v3111_v59 = vrot.slane %v3110_v37, 1  ;;  %v2174_v25 = vrot.slane %v2173_v10, 4  ;;  %4671 = vmatmul.msk.f32.gmra.mxu1 %vm1549_vm0, %v4208_v61  ;;  %v2080_v17 = vrot.slane %v2079_v14, 1  ;;  %v3103_v11 = vadd.f32 %v3102_v56, %v3101_v15 }
 0x221   : > { %v2104_v33 = vrot.slane %v2103_v63, 4  ;;  %v2525_v0 = vmul.f32 %v1500_v43, %v1500_v43  ;;  %v3197_v26 = vsel %vm1549_vm0, %v2535_v40, 0.0  ;;  %v1499_v51 = vmul.f32 %v1077_v45, %v459_v9  ;;  %v1175_v40 = vpop.permute.xlu2 %1174 }
 0x222   : > { %v3112_v23 = vadd.f32 %v3111_v59, %v3110_v37  ;;  %v2175_v24 = vadd.f32 %v2174_v25, %v2173_v10  ;;  %v2081_v21 = vadd.f32 %v2080_v17, %v2079_v14  ;;  %v3104_v53 = vrot.slane %v3103_v11, 1 }
 0x223   : > { %v3198_v22 = vrot.slane %v3197_v26, 4  ;;  %v2105_v35 = vadd.f32 %v2104_v33, %v2103_v63  ;;  %v5667_v12 = vmul.f32 %v2158_v62, %v2158_v62  ;;  %v3127_v5 = vsel %vm1549_vm0, %v2525_v0, 0.0  ;;  %v1105_v63 = vpop.permute.xlu1 %1104 }
 0x224   : > { %v2176_v41 = vrot.slane %v2175_v24, 2  ;;  %v2096_v29 = vsel %vm1549_vm0, %v1499_v51, 0.0  ;;  %v3105_v27 = vadd.f32 %v3104_v53, %v3103_v11  ;;  %v3545_v3 = vmul.f32 %v2081_v21, %v2081_v21 }
 0x225   : > { %v3199_v1 = vadd.f32 %v3198_v22, %v3197_v26  ;;  %v2106_v18 = vrot.slane %v2105_v35, 2  ;;  %v5671_v60 = vadd.f32 %v3181_v6, %v3180_v42  ;;  %v3128_v4 = vrot.slane %v3127_v5, 4 }
 0x226   : > { %v2177_v13 = vadd.f32 %v2176_v41, %v2175_v24  ;;  %v2097_v7 = vrot.slane %v2096_v29, 4  ;;  %v3674_v16 = vsub.f32 %v3546_v50, %v3112_v23  ;;  %v2524_v55 = vmul.f32 %v1499_v51, %v1499_v51  ;;  %v463_v51 = vld [vmem:[%s4817_s21 + $0x290] sm:$0xff]  ;;  %v462_v41 = vld [vmem:[%s4817_s21 + $0x288] sm:$0xff] }
 0x227   : > { %v3200_v49 = vrot.slane %v3199_v1, 2  ;;  %v2107_v54 = vadd.f32 %v2106_v18, %v2105_v35  ;;  %v3129_v58 = vadd.f32 %v3128_v4, %v3127_v5  ;;  %v3077_v15 = vadd.f32 %v3076_v36, %v5488_v57  ;;  %v1098_v35 = vpop.permute.xlu0 %1097 }
 0x228   : > { %v2178_v62 = vrot.slane %v2177_v13, 1  ;;  %v2098_v48 = vadd.f32 %v2097_v7, %v2096_v29  ;;  %v3673_v30 = vsub.f32 %v3545_v3, %v3105_v27  ;;  %v3120_v42 = vsel %vm1549_vm0, %v2524_v55, 0.0 }
 0x229   : > { %v3201_v37 = vadd.f32 %v3200_v49, %v3199_v1  ;;  %v2108_v61 = vrot.slane %v2107_v54, 1  ;;  %v3130_v43 = vrot.slane %v3129_v58, 2  ;;  %v3121_v56 = vrot.slane %v3120_v42, 4 }
 0x22a   : > { %v2179_v6 = vadd.f32 %v2178_v62, %v2177_v13  ;;  %v2099_v14 = vrot.slane %v2098_v48, 2  ;;  %v5677_v50 = vmul.f32 0.5, %v3674_v16  ;;  %v3668_v9 = vsub.f32 %v5616_v52, %v5622_v32  ;;  %v473_v32 = vld [vmem:[%s4817_s21 + $0x2e0] sm:$0xff] }
 0x22b   : > { %v3202_v10 = vrot.slane %v3201_v37, 1  ;;  %v2109_v45 = vadd.f32 %v2108_v61, %v2107_v54  ;;  %v3122_v36 = vadd.f32 %v3121_v56, %v3120_v42  ;;  %v3669_v25 = vsub.f32 %v5514_v28, %v3077_v15  ;;  %v476_v56 = vld [vmem:[%s4817_s21 + $0x2f8] sm:$0xff] }
 0x22c   : > { %v3559_v59 = vmul.f32 %v2179_v6, %v2179_v6  ;;  %v2100_v57 = vadd.f32 %v2099_v14, %v2098_v48  ;;  %v5682_v17 = vmul.f32 0.5, %v3673_v30  ;;  %v5684_v33 = vadd.f32 %v3130_v43, %v3129_v58  ;;  %v1196_v14 = vpop.permute.xlu2 %1195 }
 0x22d   : > { %v3203_v11 = vadd.f32 %v3202_v10, %v3201_v37  ;;  %v5686_v0 = vmul.f32 %v2109_v45, %v2109_v45  ;;  %v3123_v24 = vrot.slane %v3122_v36, 2  ;;  %v3796_v26 = vmul.f32 0.5, %v3668_v9  ;;  %v1126_v10 = vpop.permute.xlu1 %1125  ;;  %v466_v45 = vld [vmem:[%s4817_s21 + $0x2a8] sm:$0xff] }
 0x22e   : > { %v2101_v23 = vrot.slane %v2100_v57, 1  ;;  %v4054_v52 = vsel %vm3992_vm2, %v5598_v44, %v5579_v46  ;;  %v1400_v53 = vperm.slane %v5644_v39, 5  ;;  %v1393_v22 = vperm.slane %v5644_v39, 4 }
 0x22f   : > { %v3687_v28 = vsub.f32 %v3559_v59, %v3203_v11  ;;  %v4055_v21 = vsel %vm3994_vm3, %v5594_v34, %v4054_v52  ;;  %v5698_v5 = vadd.f32 %v3123_v24, %v3122_v36  ;;  %v3797_v29 = vmul.f32 0.5, %v3669_v25 }
 0x230   : > { %v4056_v27 = vsel %vm3996_vm4, %v5491_v8, %v4055_v21  ;;  %v1386_v46 = vperm.slane %v5644_v39, 3  ;;  %v3132_v44 = vrot.slane %v5684_v33, 1  ;;  %1405 = vperm.xlu2 %4705, %v1400_v53   ;;  %1398 = vperm.xlu1 %4704, %v1393_v22   ;;  %v1513_v34 = vmul.f32 %v1175_v40, %v473_v32 }
 0x231   : > { %v4057_v3 = vsel %vm3998_vm5, %v5651_v38, %v4056_v27  ;;  %v1503_v1 = vmul.f32 %v1105_v63, %v463_v51  ;;  %v5706_v18 = vmul.f32 0.5, %v3687_v28  ;;  %v5708_v13 = vadd.f32 %v2101_v23, %v2100_v57 }
 0x232   : > { %v4058_v4 = vsel %vm4000_vm6, %v3796_v26, %v4057_v3  ;;  %1391 = vperm.xlu0 %4703, %v1386_v46   ;;  %v1502_v7 = vmul.f32 %v1098_v35, %v462_v41  ;;  %v2194_v16 = vsel %vm1549_vm0, %v1513_v34, 0.0  ;;  %v2538_v49 = vmul.f32 %v1513_v34, %v1513_v34 }
 0x233   : > { %v4059_v8 = vsel %vm4002_vm7, %v3797_v29, %v4058_v4  ;;  %v2124_v38 = vsel %vm1549_vm0, %v1503_v1, 0.0  ;;  %v3125_v54 = vrot.slane %v5698_v5, 1  ;;  %v2195_v55 = vrot.slane %v2194_v16, 4 }
 0x234   : > { %4661 = vmatmul.msk.f32.vlgmr.msra.gmra.mxu2 %vm1549_vm0, %v4059_v8  ;;  %v2125_v62 = vrot.slane %v2124_v38, 4  ;;  %v2528_v58 = vmul.f32 %v1503_v1, %v1503_v1  ;;  %v3218_v48 = vsel %vm1549_vm0, %v2538_v49, 0.0  ;;  %v2117_v15 = vsel %vm1549_vm0, %v1502_v7, 0.0 }
 0x235   : > { %v2527_v30 = vmul.f32 %v1502_v7, %v1502_v7  ;;  %v1414_v37 = vperm.slane %v5644_v39, 7  ;;  %v2196_v61 = vadd.f32 %v2195_v55, %v2194_v16  ;;  %v3219_v42 = vrot.slane %v3218_v48, 4 }
 0x236   : > { %v2126_v6 = vadd.f32 %v2125_v62, %v2124_v38  ;;  %v3148_v43 = vsel %vm1549_vm0, %v2528_v58, 0.0  ;;  %v2118_v59 = vrot.slane %v2117_v15, 4  ;;  %v1407_v36 = vperm.slane %v5644_v39, 6  ;;  %v1119_v38 = vpop.permute.xlu0 %1118 }
 0x237   : > { %v3149_v9 = vrot.slane %v3148_v43, 4  ;;  %v3141_v57 = vsel %vm1549_vm0, %v2527_v30, 0.0  ;;  %v2197_v25 = vrot.slane %v2196_v61, 2  ;;  %v3220_v40 = vadd.f32 %v3219_v42, %v3218_v48 }
 0x238   : > { %v2127_v63 = vrot.slane %v2126_v6, 2  ;;  %v3142_v11 = vrot.slane %v3141_v57, 4  ;;  %v2119_v24 = vadd.f32 %v2118_v59, %v2117_v15  ;;  %1419 = vperm.xlu1 %4704, %v1414_v37   ;;  %v1516_v26 = vmul.f32 %v1196_v14, %v476_v56  ;;  %v465_v56 = vld [vmem:[%s4817_s21 + $0x2a0] sm:$0xff] }
 0x239   : > { %v3150_v23 = vadd.f32 %v3149_v9, %v3148_v43  ;;  %v1506_v52 = vmul.f32 %v1126_v10, %v466_v45  ;;  %v2198_v32 = vadd.f32 %v2197_v25, %v2196_v61  ;;  %v3221_v51 = vrot.slane %v3220_v40, 2 }
 0x23a   : > { %v2128_v28 = vadd.f32 %v2127_v63, %v2126_v6  ;;  %v3143_v21 = vadd.f32 %v3142_v11, %v3141_v57  ;;  %1412 = vperm.xlu0 %4703, %v1407_v36   ;;  %v2120_v22 = vrot.slane %v2119_v24, 2  ;;  %v2215_v35 = vsel %vm1549_vm0, %v1516_v26, 0.0 }
 0x23b   : > { %v3151_v53 = vrot.slane %v3150_v23, 2  ;;  %v2541_v41 = vmul.f32 %v1516_v26, %v1516_v26  ;;  %v2199_v39 = vrot.slane %v2198_v32, 1  ;;  %v3222_v29 = vadd.f32 %v3221_v51, %v3220_v40 }
 0x23c   : > { %v2129_v27 = vrot.slane %v2128_v28, 1  ;;  %v3144_v46 = vrot.slane %v3143_v21, 2  ;;  %v2121_v34 = vadd.f32 %v2120_v22, %v2119_v24  ;;  %v2216_v1 = vrot.slane %v2215_v35, 4 }
 0x23d   : > { %v3152_v3 = vadd.f32 %v3151_v53, %v3150_v23  ;;  %v3239_v4 = vsel %vm1549_vm0, %v2541_v41, 0.0  ;;  %v2200_v7 = vadd.f32 %v2199_v39, %v2198_v32  ;;  %v3223_v8 = vrot.slane %v3222_v29, 1 }
 0x23e   : > { %v2130_v16 = vadd.f32 %v2129_v27, %v2128_v28  ;;  %v3145_v49 = vadd.f32 %v3144_v46, %v3143_v21  ;;  %v2122_v62 = vrot.slane %v2121_v34, 1  ;;  %v2217_v58 = vadd.f32 %v2216_v1, %v2215_v35  ;;  %v4167_v28 = vpop.f32.mrf.mxu0 }
 0x23f   : > { %v3153_v55 = vrot.slane %v3152_v3, 1  ;;  %v3240_v48 = vrot.slane %v3239_v4, 4  ;;  %v3224_v15 = vadd.f32 %v3223_v8, %v3222_v29  ;;  %v3562_v30 = vmul.f32 %v2200_v7, %v2200_v7  ;;  %v469_v7 = vld [vmem:[%s4817_s21 + $0x2c0] sm:$0xff]  ;;  %v1140_v8 = vpop.permute.xlu0 %1139 }
 0x240   : > { %v3552_v37 = vmul.f32 %v2130_v16, %v2130_v16  ;;  %v3146_v61 = vrot.slane %v3145_v49, 1  ;;  %v2123_v6 = vadd.f32 %v2122_v62, %v2121_v34  ;;  %v2218_v43 = vrot.slane %v2217_v58, 2  ;;  %v5750_v34 = vld [vmem:[%s6344_s4] ss:$0 sm:$0xff]  ;;  %v468_v16 = vld [vmem:[%s4817_s21 + $0x2b8] sm:$0xff] }
 0x241   : > { %v3154_v42 = vadd.f32 %v3153_v55, %v3152_v3  ;;  %v3241_v14 = vadd.f32 %v3240_v48, %v3239_v4  ;;  %v3690_v10 = vsub.f32 %v3562_v30, %v3224_v15  ;;  %v2145_v9 = vsel %vm1549_vm0, %v1506_v52, 0.0  ;;  %v1147_v4 = vpop.permute.xlu1 %1146 }
 0x242   : > { %v3147_v45 = vadd.f32 %v3146_v61, %v3145_v49  ;;  %v2531_v59 = vmul.f32 %v1506_v52, %v1506_v52  ;;  %v3551_v36 = vmul.f32 %v2123_v6, %v2123_v6  ;;  %v2219_v25 = vadd.f32 %v2218_v43, %v2217_v58 }
 0x243   : > { %v3680_v57 = vsub.f32 %v3552_v37, %v3154_v42  ;;  %v3242_v40 = vrot.slane %v3241_v14, 2  ;;  %v5730_v63 = vmul.f32 %v5708_v13, %v5708_v13  ;;  %v2146_v11 = vrot.slane %v2145_v9, 4 }
 0x244   : > { %v3169_v23 = vsel %vm1549_vm0, %v2531_v59, 0.0  ;;  %v1505_v24 = vmul.f32 %v1119_v38, %v465_v56  ;;  %v5736_v26 = vadd.f32 %v3125_v54, %v5698_v5  ;;  %v3679_v32 = vsub.f32 %v3551_v36, %v3147_v45  ;;  %v1217_v5 = vpop.permute.xlu2 %1216  ;;  %v479_v54 = vld [vmem:[%s4817_s21 + $0x310] sm:$0xff] }
 0x245   : > { %v2220_v52 = vrot.slane %v2219_v25, 1  ;;  %v5738_v51 = vadd.f32 %v3242_v40, %v3241_v14  ;;  %v2147_v21 = vadd.f32 %v2146_v11, %v2145_v9  ;;  %v3170_v53 = vrot.slane %v3169_v23, 4 }
 0x246   : > { %v2138_v13 = vsel %vm1549_vm0, %v1505_v24, 0.0  ;;  %v2530_v22 = vmul.f32 %v1505_v24, %v1505_v24  ;;  %v5741_v35 = vmul.f32 0.5, %v3690_v10  ;;  %v5743_v41 = vmul.f32 0.5, %v3680_v57 }
 0x247   : > { %v3807_v39 = vmul.f32 0.5, %v3679_v32  ;;  %v2139_v29 = vrot.slane %v2138_v13, 4  ;;  %v2148_v27 = vrot.slane %v2147_v21, 2  ;;  %v3171_v46 = vadd.f32 %v3170_v53, %v3169_v23 }
 0x248   : > { %v3162_v3 = vsel %vm1549_vm0, %v2530_v22, 0.0  ;;  %v4168_v1 = vadd.f32 %v5750_v34, %v4167_v28  ;;  %v2221_v49 = vadd.f32 %v2220_v52, %v2219_v25  ;;  %v3244_v38 = vrot.slane %v5738_v51, 1 }
 0x249   : > { %v2140_v55 = vadd.f32 %v2139_v29, %v2138_v13  ;;  %v3163_v62 = vrot.slane %v3162_v3, 4  ;;  %v2149_v58 = vadd.f32 %v2148_v27, %v2147_v21  ;;  %v3172_v48 = vrot.slane %v3171_v46, 2 }
 0x24a   : > { %v4209_v15 = vmax.f32 %v4168_v1, 0.0  ;;  %v1519_v30 = vmul.f32 %v1217_v5, %v479_v54  ;;  %v1509_v42 = vmul.f32 %v1147_v4, %v469_v7  ;;  %v1508_v6 = vmul.f32 %v1140_v8, %v468_v16 }
 0x24b   : > { %v2141_v37 = vrot.slane %v2140_v55, 2  ;;  %v3164_v61 = vadd.f32 %v3163_v62, %v3162_v3  ;;  %v2150_v43 = vrot.slane %v2149_v58, 1  ;;  %v3173_v14 = vadd.f32 %v3172_v48, %v3171_v46 }
 0x24c   : > { %v2236_v56 = vsel %vm1549_vm0, %v1519_v30, 0.0  ;;  %v2544_v10 = vmul.f32 %v1519_v30, %v1519_v30  ;;  %4672 = vmatmul.msk.f32.gmra.mxu1 %vm1549_vm0, %v4209_v15  ;;  %v2166_v57 = vsel %vm1549_vm0, %v1509_v42, 0.0  ;;  %v2534_v13 = vmul.f32 %v1509_v42, %v1509_v42 }
 0x24d   : > { %v2142_v45 = vadd.f32 %v2141_v37, %v2140_v55  ;;  %v3165_v9 = vrot.slane %v3164_v61, 2  ;;  %v2237_v59 = vrot.slane %v2236_v56, 4  ;;  %v2151_v36 = vadd.f32 %v2150_v43, %v2149_v58 }
 0x24e   : > { %v3174_v25 = vrot.slane %v3173_v14, 1  ;;  %v3260_v40 = vsel %vm1549_vm0, %v2544_v10, 0.0  ;;  %v2167_v11 = vrot.slane %v2166_v57, 4  ;;  %v5762_v27 = vsel %vm3990_vm1, %v3807_v39, %v5605_v19  ;;  %v1238_v19 = vpop.permute.xlu2 %1237 }
 0x24f   : > { %v2143_v23 = vrot.slane %v2142_v45, 1  ;;  %v3166_v24 = vadd.f32 %v3165_v9, %v3164_v61  ;;  %v2238_v32 = vadd.f32 %v2237_v59, %v2236_v56  ;;  %v3261_v52 = vrot.slane %v3260_v40, 4  ;;  %v1168_v9 = vpop.permute.xlu1 %1167 }
 0x250   : > { %v3175_v28 = vadd.f32 %v3174_v25, %v3173_v14  ;;  %v3555_v21 = vmul.f32 %v2151_v36, %v2151_v36  ;;  %v2168_v53 = vadd.f32 %v2167_v11, %v2166_v57  ;;  %v3190_v3 = vsel %vm1549_vm0, %v2534_v13, 0.0 }
 0x251   : > { %v2144_v22 = vadd.f32 %v2143_v23, %v2142_v45  ;;  %v3167_v29 = vrot.slane %v3166_v24, 1  ;;  %v2239_v5 = vrot.slane %v2238_v32, 2  ;;  %v3262_v54 = vadd.f32 %v3261_v52, %v3260_v40  ;;  %v482_v52 = vld [vmem:[%s4817_s21 + $0x328] sm:$0xff] }
 0x252   : > { %v2169_v46 = vrot.slane %v2168_v53, 2  ;;  %v2159_v1 = vsel %vm1549_vm0, %v1508_v6, 0.0  ;;  %v5766_v55 = vmul.f32 %v2221_v49, %v2221_v49  ;;  %v3191_v58 = vrot.slane %v3190_v3, 4 }
 0x253   : > { %v3168_v4 = vadd.f32 %v3167_v29, %v3166_v24  ;;  %v3554_v7 = vmul.f32 %v2144_v22, %v2144_v22  ;;  %v2240_v8 = vadd.f32 %v2239_v5, %v2238_v32  ;;  %v3263_v16 = vrot.slane %v3262_v54, 2 }
 0x254   : > { %v2170_v62 = vadd.f32 %v2169_v46, %v2168_v53  ;;  %v2160_v48 = vrot.slane %v2159_v1, 4  ;;  %v3683_v15 = vsub.f32 %v3555_v21, %v3175_v28  ;;  %v2533_v61 = vmul.f32 %v1508_v6, %v1508_v6  ;;  %v472_v28 = vld [vmem:[%s4817_s21 + $0x2d8] sm:$0xff] }
 0x255   : > { %v2241_v30 = vrot.slane %v2240_v8, 1  ;;  %v3264_v37 = vadd.f32 %v3263_v16, %v3262_v54  ;;  %v3192_v42 = vadd.f32 %v3191_v58, %v3190_v3  ;;  %v3133_v14 = vadd.f32 %v3132_v44, %v5684_v33 }
 0x256   : > { %v2171_v39 = vrot.slane %v2170_v62, 1  ;;  %v2161_v43 = vadd.f32 %v2160_v48, %v2159_v1  ;;  %v3682_v56 = vsub.f32 %v3554_v7, %v3168_v4  ;;  %v3183_v45 = vsel %vm1549_vm0, %v2533_v61, 0.0  ;;  %v1259_v58 = vpop.permute.xlu2 %1258  ;;  %v485_v48 = vld [vmem:[%s4817_s21 + $0x340] sm:$0xff] }
 0x257   : > { %v2242_v10 = vadd.f32 %v2241_v30, %v2240_v8  ;;  %v3265_v49 = vrot.slane %v3264_v37, 1  ;;  %v3193_v57 = vrot.slane %v3192_v42, 2  ;;  %v3184_v6 = vrot.slane %v3183_v45, 4 }
 0x258   : > { %v2172_v59 = vadd.f32 %v2171_v39, %v2170_v62  ;;  %v2162_v36 = vrot.slane %v2161_v43, 2  ;;  %v3676_v11 = vsub.f32 %v5730_v63, %v5736_v26  ;;  %v3677_v23 = vsub.f32 %v5686_v0, %v3133_v14  ;;  %v1161_v62 = vpop.permute.xlu0 %1160  ;;  %v475_v14 = vld [vmem:[%s4817_s21 + $0x2f0] sm:$0xff] }
 0x259   : > { %v3266_v25 = vadd.f32 %v3265_v49, %v3264_v37  ;;  %v3568_v40 = vmul.f32 %v2242_v10, %v2242_v10  ;;  %v3194_v33 = vadd.f32 %v3193_v57, %v3192_v42  ;;  %v3185_v32 = vadd.f32 %v3184_v6, %v3183_v45 }
 0x25a   : > { %v3558_v44 = vmul.f32 %v2172_v59, %v2172_v59  ;;  %v2163_v24 = vadd.f32 %v2162_v36, %v2161_v43  ;;  %v3804_v53 = vmul.f32 0.5, %v3676_v11  ;;  %v3805_v13 = vmul.f32 0.5, %v3677_v23  ;;  %v1189_v43 = vpop.permute.xlu1 %1188 }
 0x25b   : > { %v3696_v21 = vsub.f32 %v3568_v40, %v3266_v25  ;;  %v4061_v22 = vsel %vm3992_vm2, %v5547_v20, %v5659_v31  ;;  %v3195_v29 = vrot.slane %v3194_v33, 1  ;;  %v3186_v54 = vrot.slane %v3185_v32, 2 }
 0x25c   : > { %v2164_v5 = vrot.slane %v2163_v24, 1  ;;  %v4062_v0 = vsel %vm3994_vm3, %v5682_v17, %v4061_v22  ;;  %v5782_v63 = vmul.f32 0.5, %v3683_v15  ;;  %v1522_v46 = vmul.f32 %v1238_v19, %v482_v52 }
 0x25d   : > { %v4063_v26 = vsel %vm3996_vm4, %v5677_v50, %v4062_v0  ;;  %v1512_v3 = vmul.f32 %v1168_v9, %v472_v28  ;;  %v5786_v1 = vmul.f32 0.5, %v3682_v56  ;;  %v3196_v4 = vadd.f32 %v3195_v29, %v3194_v33  ;;  %v471_v50 = vld [vmem:[%s4817_s21 + $0x2d0] sm:$0xff] }
 0x25e   : > { %v5788_v7 = vadd.f32 %v3186_v54, %v3185_v32  ;;  %v4064_v20 = vsel %vm3998_vm5, %v5581_v47, %v4063_v26  ;;  %v2257_v17 = vsel %vm1549_vm0, %v1522_v46, 0.0  ;;  %v2547_v8 = vmul.f32 %v1522_v46, %v1522_v46 }
 0x25f   : > { %v4065_v31 = vsel %vm4000_vm6, %v3804_v53, %v4064_v20  ;;  %v2187_v16 = vsel %vm1549_vm0, %v1512_v3, 0.0  ;;  %v5797_v15 = vmul.f32 0.5, %v3696_v21  ;;  %v3686_v30 = vsub.f32 %v3558_v44, %v3196_v4 }
 0x260   : > { %v2165_v37 = vadd.f32 %v2164_v5, %v2163_v24  ;;  %v4066_v61 = vsel %vm4002_vm7, %v3805_v13, %v4065_v31  ;;  %v2258_v47 = vrot.slane %v2257_v17, 4  ;;  %v3281_v19 = vsel %vm1549_vm0, %v2547_v8, 0.0 }
 0x261   : > { %4662 = vmatmul.msk.f32.gmra.mxu2 %vm1549_vm0, %v4066_v61  ;;  %v2188_v39 = vrot.slane %v2187_v16, 4  ;;  %v2537_v42 = vmul.f32 %v1512_v3, %v1512_v3  ;;  %v3188_v56 = vrot.slane %v5788_v7, 1  ;;  %v3282_v10 = vrot.slane %v3281_v19, 4 }
 0x262   : > { %v1511_v49 = vmul.f32 %v1161_v62, %v471_v50  ;;  %v1525_v45 = vmul.f32 %v1259_v58, %v485_v48  ;;  %v3814_v9 = vmul.f32 0.5, %v3686_v30  ;;  %v2259_v59 = vadd.f32 %v2258_v47, %v2257_v17 }
 0x263   : > { %v2189_v57 = vadd.f32 %v2188_v39, %v2187_v16  ;;  %v3211_v36 = vsel %vm1549_vm0, %v2537_v42, 0.0  ;;  %v3283_v6 = vadd.f32 %v3282_v10, %v3281_v19  ;;  %v1515_v11 = vmul.f32 %v1189_v43, %v475_v14 }
 0x264   : > { %v3212_v25 = vrot.slane %v3211_v36, 4  ;;  %v2180_v40 = vsel %vm1549_vm0, %v1511_v49, 0.0  ;;  %v2260_v23 = vrot.slane %v2259_v59, 2  ;;  %v2536_v24 = vmul.f32 %v1511_v49, %v1511_v49 }
 0x265   : > { %v2190_v33 = vrot.slane %v2189_v57, 2  ;;  %v2181_v44 = vrot.slane %v2180_v40, 4  ;;  %v3284_v32 = vrot.slane %v3283_v6, 2  ;;  %v2278_v28 = vsel %vm1549_vm0, %v1525_v45, 0.0 }
 0x266   : > { %v3213_v52 = vadd.f32 %v3212_v25, %v3211_v36  ;;  %v2550_v21 = vmul.f32 %v1525_v45, %v1525_v45  ;;  %v2261_v53 = vadd.f32 %v2260_v23, %v2259_v59  ;;  %v3204_v29 = vsel %vm1549_vm0, %v2536_v24, 0.0  ;;  %v1182_v24 = vpop.permute.xlu0 %1181 }
 0x267   : > { %v2191_v13 = vadd.f32 %v2190_v33, %v2189_v57  ;;  %v2182_v22 = vadd.f32 %v2181_v44, %v2180_v40  ;;  %v3285_v5 = vadd.f32 %v3284_v32, %v3283_v6  ;;  %v3205_v0 = vrot.slane %v3204_v29, 4  ;;  %v474_v32 = vld [vmem:[%s4817_s21 + $0x2e8] sm:$0xff] }
 0x268   : > { %v3214_v54 = vrot.slane %v3213_v52, 2  ;;  %v2279_v26 = vrot.slane %v2278_v28, 4  ;;  %v2262_v46 = vrot.slane %v2261_v53, 1  ;;  %v3302_v20 = vsel %vm1549_vm0, %v2550_v21, 0.0 }
 0x269   : > { %v2192_v3 = vrot.slane %v2191_v13, 1  ;;  %v2183_v4 = vrot.slane %v2182_v22, 2  ;;  %v3286_v31 = vrot.slane %v3285_v5, 1  ;;  %v3206_v8 = vadd.f32 %v3205_v0, %v3204_v29 }
 0x26a   : > { %v3215_v17 = vadd.f32 %v3214_v54, %v3213_v52  ;;  %v2280_v16 = vadd.f32 %v2279_v26, %v2278_v28  ;;  %v2263_v62 = vadd.f32 %v2262_v46, %v2261_v53  ;;  %v3303_v48 = vrot.slane %v3302_v20, 4 }
 0x26b   : > { %v2193_v50 = vadd.f32 %v2192_v3, %v2191_v13  ;;  %v2184_v58 = vadd.f32 %v2183_v4, %v2182_v22  ;;  %v3287_v30 = vadd.f32 %v3286_v31, %v3285_v5  ;;  %v3207_v47 = vrot.slane %v3206_v8, 2  ;;  %v4170_v13 = vpop.f32.mrf.mxu0 }
 0x26c   : > { %v3216_v61 = vrot.slane %v3215_v17, 1  ;;  %v2281_v19 = vrot.slane %v2280_v16, 2  ;;  %v3571_v39 = vmul.f32 %v2263_v62, %v2263_v62  ;;  %v3304_v14 = vadd.f32 %v3303_v48, %v3302_v20 }
 0x26d   : > { %v3561_v42 = vmul.f32 %v2193_v50, %v2193_v50  ;;  %v2185_v43 = vrot.slane %v2184_v58, 1  ;;  %v3208_v49 = vadd.f32 %v3207_v47, %v3206_v8  ;;  %v2208_v59 = vsel %vm1549_vm0, %v1515_v11, 0.0 }
 0x26e   : > { %v3217_v10 = vadd.f32 %v3216_v61, %v3215_v17  ;;  %v2282_v45 = vadd.f32 %v2281_v19, %v2280_v16  ;;  %v3557_v57 = vmul.f32 %v2165_v37, %v2165_v37  ;;  %v3305_v6 = vrot.slane %v3304_v14, 2 }
 0x26f   : > { %v2186_v36 = vadd.f32 %v2185_v43, %v2184_v58  ;;  %v2209_v25 = vrot.slane %v2208_v59, 4  ;;  %v5812_v40 = vsel %vm3990_vm1, %v5706_v18, %v3814_v9  ;;  %v3209_v23 = vrot.slane %v3208_v49, 1 }
 0x270   : > { %v2283_v33 = vrot.slane %v2282_v45, 1  ;;  %v2540_v44 = vmul.f32 %v1515_v11, %v1515_v11  ;;  %v3699_v52 = vsub.f32 %v3571_v39, %v3287_v30  ;;  %v3306_v21 = vadd.f32 %v3305_v6, %v3304_v14 }
 0x271   : > { %v3560_v28 = vmul.f32 %v2186_v36, %v2186_v36  ;;  %v2210_v53 = vadd.f32 %v2209_v25, %v2208_v59  ;;  %v3689_v22 = vsub.f32 %v3561_v42, %v3217_v10  ;;  %v3210_v29 = vadd.f32 %v3209_v23, %v3208_v49  ;;  %v1280_v10 = vpop.permute.xlu2 %1279  ;;  %v488_v49 = vld [vmem:[%s4817_s21 + $0x358] sm:$0xff] }
 0x272   : > { %v2284_v37 = vadd.f32 %v2283_v33, %v2282_v45  ;;  %v3232_v5 = vsel %vm1549_vm0, %v2540_v44, 0.0  ;;  %v3307_v54 = vrot.slane %v3306_v21, 1  ;;  %v1514_v18 = vmul.f32 %v1182_v24, %v474_v32 }
 0x273   : > { %v2211_v0 = vrot.slane %v2210_v53, 2  ;;  %v3233_v26 = vrot.slane %v3232_v5, 4  ;;  %v3688_v9 = vsub.f32 %v3560_v28, %v3210_v29  ;;  %v4171_v11 = vadd.f32 %v5750_v34, %v4170_v13 }
 0x274   : > { %v3574_v46 = vmul.f32 %v2284_v37, %v2284_v37  ;;  %v3189_v3 = vadd.f32 %v3188_v56, %v5788_v7  ;;  %v3308_v4 = vadd.f32 %v3307_v54, %v3306_v21  ;;  %v2201_v17 = vsel %vm1549_vm0, %v1514_v18, 0.0 }
 0x275   : > { %v2212_v20 = vadd.f32 %v2211_v0, %v2210_v53  ;;  %v3234_v31 = vadd.f32 %v3233_v26, %v3232_v5  ;;  %v5821_v8 = vmul.f32 0.5, %v3699_v52  ;;  %v2202_v16 = vrot.slane %v2201_v17, 4 }
 0x276   : > { %v2539_v62 = vmul.f32 %v1514_v18, %v1514_v18  ;;  %v4210_v50 = vmax.f32 %v4171_v11, 0.0  ;;  %v3702_v58 = vsub.f32 %v3574_v46, %v3308_v4  ;;  %v3684_v61 = vsub.f32 %v5667_v12, %v5671_v60  ;;  %v1210_v12 = vpop.permute.xlu1 %1209  ;;  %v478_v60 = vld [vmem:[%s4817_s21 + $0x308] sm:$0xff] }
 0x277   : > { %v2213_v48 = vrot.slane %v2212_v20, 1  ;;  %v3235_v30 = vrot.slane %v3234_v31, 2  ;;  %v2203_v47 = vadd.f32 %v2202_v16, %v2201_v17  ;;  %v3685_v56 = vsub.f32 %v3557_v57, %v3189_v3 }
 0x278   : > { %v3225_v7 = vsel %vm1549_vm0, %v2539_v62, 0.0  ;;  %v4068_v19 = vsel %vm3992_vm2, %v5743_v41, %v5762_v27  ;;  %4673 = vmatmul.msk.f32.gmra.mxu1 %vm1549_vm0, %v4210_v50  ;;  %v5830_v39 = vmul.f32 0.5, %v3689_v22  ;;  %v5832_v42 = vmul.f32 0.5, %v3688_v9  ;;  %v1203_v41 = vpop.permute.xlu0 %1202  ;;  %v477_v27 = vld [vmem:[%s4817_s21 + $0x300] sm:$0xff] }
 0x279   : > { %v3236_v43 = vadd.f32 %v3235_v30, %v3234_v31  ;;  %v3226_v14 = vrot.slane %v3225_v7, 4  ;;  %v5836_v45 = vmul.f32 0.5, %v3702_v58  ;;  %v2204_v59 = vrot.slane %v2203_v47, 2  ;;  %v4428_v62 = vld [vmem:[%s5854_s26] sm:$0xff] }
 0x27a   : > { %v3813_v57 = vmul.f32 0.5, %v3685_v56  ;;  %v4069_v36 = vsel %vm3994_vm3, %v5653_v2, %v4068_v19  ;;  %v2214_v6 = vadd.f32 %v2213_v48, %v2212_v20  ;;  %v3812_v23 = vmul.f32 0.5, %v3684_v61 }
 0x27b   : > { %v3227_v25 = vadd.f32 %v3226_v14, %v3225_v7  ;;  %v4070_v33 = vsel %vm3996_vm4, %v5786_v1, %v4069_v36  ;;  %v2205_v44 = vadd.f32 %v2204_v59, %v2203_v47  ;;  %v1528_v32 = vmul.f32 %v1280_v10, %v488_v49  ;;  %v4710_v10 = vld [vmem:[%s4805_s16] sm:$0xff]  ;;  %v1301_v36 = vpop.permute.xlu2 %1300 }
 0x27c   : > { %v4071_v24 = vsel %vm3998_vm5, %v5782_v63, %v4070_v33  ;;  %v1518_v52 = vmul.f32 %v1210_v12, %v478_v60  ;;  %v3237_v28 = vrot.slane %v3236_v43, 1  ;;  %v1517_v2 = vmul.f32 %v1203_v41, %v477_v27  ;;  %v491_v41 = vld [vmem:[%s4817_s21 + $0x370] sm:$0xff] }
 0x27d   : > { %v3228_v21 = vrot.slane %v3227_v25, 2  ;;  %v4072_v53 = vsel %vm4000_vm6, %v3812_v23, %v4071_v24  ;;  %v2206_v13 = vrot.slane %v2205_v44, 1  ;;  %v2299_v29 = vsel %vm1549_vm0, %v1528_v32, 0.0 }
 0x27e   : > { %v4073_v22 = vsel %vm4002_vm7, %v3813_v57, %v4072_v53  ;;  %v2553_v37 = vmul.f32 %v1528_v32, %v1528_v32  ;;  %v2300_v1 = vrot.slane %v2299_v29, 4  ;;  %v2229_v63 = vsel %vm1549_vm0, %v1518_v52, 0.0 }
 0x27f   : > { %v3229_v5 = vadd.f32 %v3228_v21, %v3227_v25  ;;  %4663 = vmatmul.msk.f32.gmra.mxu2 %vm1549_vm0, %v4073_v22  ;;  %v2543_v54 = vmul.f32 %v1518_v52, %v1518_v52  ;;  %v2207_v0 = vadd.f32 %v2206_v13, %v2205_v44  ;;  %v2230_v18 = vrot.slane %v2229_v63, 4 }
 0x280   : > { %v3323_v26 = vsel %vm1549_vm0, %v2553_v37, 0.0  ;;  %v2222_v9 = vsel %vm1549_vm0, %v1517_v2, 0.0  ;;  %v5858_v46 = vmul.f32 %v2214_v6, %v2214_v6  ;;  %v2301_v11 = vadd.f32 %v2300_v1, %v2299_v29  ;;  %v1231_v29 = vpop.permute.xlu1 %1230  ;;  %v481_v37 = vld [vmem:[%s4817_s21 + $0x320] sm:$0xff] }
 0x281   : > { %v3324_v3 = vrot.slane %v3323_v26, 4  ;;  %v3253_v4 = vsel %vm1549_vm0, %v2543_v54, 0.0  ;;  %v5861_v20 = vadd.f32 %v3237_v28, %v3236_v43  ;;  %v2231_v31 = vadd.f32 %v2230_v18, %v2229_v63 }
 0x282   : > { %v3254_v17 = vrot.slane %v3253_v4, 4  ;;  %v2223_v16 = vrot.slane %v2222_v9, 4  ;;  %v3230_v50 = vrot.slane %v3229_v5, 1  ;;  %v2302_v58 = vrot.slane %v2301_v11, 2 }
 0x283   : > { %v3325_v48 = vadd.f32 %v3324_v3, %v3323_v26  ;;  %v2542_v30 = vmul.f32 %v1517_v2, %v1517_v2  ;;  %v5864_v61 = vmul.f32 %v2207_v0, %v2207_v0  ;;  %v2232_v47 = vrot.slane %v2231_v31, 2 }
 0x284   : > { %v3255_v7 = vadd.f32 %v3254_v17, %v3253_v4  ;;  %v2224_v56 = vadd.f32 %v2223_v16, %v2222_v9  ;;  %v2303_v19 = vadd.f32 %v2302_v58, %v2301_v11  ;;  %v4444_v49 = vmul.f32 %v4710_v10, %v4428_v62  ;;  %v1224_v58 = vpop.permute.xlu0 %1223 }
 0x285   : > { %v3326_v14 = vrot.slane %v3325_v48, 2  ;;  %v3246_v43 = vsel %vm1549_vm0, %v2542_v30, 0.0  ;;  %v2233_v12 = vadd.f32 %v2232_v47, %v2231_v31  ;;  %v5869_v27 = vadd.f32 %v3230_v50, %v3229_v5  ;;  %v4173_v30 = vpop.f32.mrf.mxu0 }
 0x286   : > { %v3256_v60 = vrot.slane %v3255_v7, 2  ;;  %v2225_v59 = vrot.slane %v2224_v56, 2  ;;  %v3247_v57 = vrot.slane %v3246_v43, 4  ;;  %v2304_v6 = vrot.slane %v2303_v19, 1 }
 0x287   : > { %v3327_v25 = vadd.f32 %v3326_v14, %v3325_v48  ;;  %v2234_v23 = vrot.slane %v2233_v12, 1  ;;  %v4461_v28 = vsel %vm4460_vm8, %v4444_v49, 0.0  ;;  %v1531_v21 = vmul.f32 %v1301_v36, %v491_v41  ;;  %v480_v48 = vld [vmem:[%s4817_s21 + $0x318] sm:$0xff] }
 0x288   : > { %v3257_v33 = vadd.f32 %v3256_v60, %v3255_v7  ;;  %v2226_v44 = vadd.f32 %v2225_v59, %v2224_v56  ;;  %v3248_v24 = vadd.f32 %v3247_v57, %v3246_v43  ;;  %v2305_v32 = vadd.f32 %v2304_v6, %v2303_v19  ;;  %4462 = vadd.xlane.f32.xlu2 %v4461_v28  ;;  %v4431_v6 = vld [vmem:[%s5854_s26 + $0x18] sm:$0xff] }
 0x289   : > { %v3328_v52 = vrot.slane %v3327_v25, 1  ;;  %v2235_v53 = vadd.f32 %v2234_v23, %v2233_v12  ;;  %v2320_v63 = vsel %vm1549_vm0, %v1531_v21, 0.0  ;;  %v2556_v54 = vmul.f32 %v1531_v21, %v1531_v21 }
 0x28a   : > { %v3258_v2 = vrot.slane %v3257_v33, 1  ;;  %v2227_v13 = vrot.slane %v2226_v44, 1  ;;  %v3249_v22 = vrot.slane %v3248_v24, 2  ;;  %v3577_v1 = vmul.f32 %v2305_v32, %v2305_v32 }
 0x28b   : > { %v3329_v5 = vadd.f32 %v3328_v52, %v3327_v25  ;;  %v3567_v26 = vmul.f32 %v2235_v53, %v2235_v53  ;;  %v3691_v11 = vsub.f32 %v5864_v61, %v5869_v27  ;;  %v2321_v3 = vrot.slane %v2320_v63, 4 }
 0x28c   : > { %v3259_v0 = vadd.f32 %v3258_v2, %v3257_v33  ;;  %v2228_v18 = vadd.f32 %v2227_v13, %v2226_v44  ;;  %v3250_v9 = vadd.f32 %v3249_v22, %v3248_v24  ;;  %v3344_v4 = vsel %vm1549_vm0, %v2556_v54, 0.0  ;;  %v4711_v2 = vld [vmem:[%s4805_s16 + $0x18] sm:$0xff]  ;;  %v1322_v22 = vpop.permute.xlu2 %1321  ;;  %v1252_v54 = vpop.permute.xlu1 %1251 }
 0x28d   : > { %v1521_v31 = vmul.f32 %v1231_v29, %v481_v37  ;;  %v3345_v50 = vrot.slane %v3344_v4, 4  ;;  %v3705_v47 = vsub.f32 %v3577_v1, %v3329_v5  ;;  %v2322_v7 = vadd.f32 %v2321_v3, %v2320_v63  ;;  %v494_v29 = vld [vmem:[%s4817_s21 + $0x388] sm:$0xff] }
 0x28e   : > { %v3695_v17 = vsub.f32 %v3567_v26, %v3259_v0  ;;  %v3251_v16 = vrot.slane %v3250_v9, 1  ;;  %v3566_v62 = vmul.f32 %v2228_v18, %v2228_v18  ;;  %v1520_v60 = vmul.f32 %v1224_v58, %v480_v48  ;;  %v484_v0 = vld [vmem:[%s4817_s21 + $0x338] sm:$0xff] }
 0x28f   : > { %v2250_v56 = vsel %vm1549_vm0, %v1521_v31, 0.0  ;;  %v2546_v19 = vmul.f32 %v1521_v31, %v1521_v31  ;;  %v3346_v61 = vadd.f32 %v3345_v50, %v3344_v4  ;;  %v2323_v49 = vrot.slane %v2322_v7, 2 }
 0x290   : > { %v3823_v14 = vmul.f32 0.5, %v3695_v17  ;;  %v3252_v43 = vadd.f32 %v3251_v16, %v3250_v9  ;;  %v2251_v10 = vrot.slane %v2250_v56, 4  ;;  %v4174_v59 = vadd.f32 %v5750_v34, %v4173_v30 }
 0x291   : > { %v3274_v12 = vsel %vm1549_vm0, %v2546_v19, 0.0  ;;  %v3347_v36 = vrot.slane %v3346_v61, 2  ;;  %v2324_v25 = vadd.f32 %v2323_v49, %v2322_v7  ;;  %v2243_v23 = vsel %vm1549_vm0, %v1520_v60, 0.0 }
 0x292   : > { %v3694_v57 = vsub.f32 %v3566_v62, %v3252_v43  ;;  %v2252_v41 = vadd.f32 %v2251_v10, %v2250_v56  ;;  %v3275_v27 = vrot.slane %v3274_v12, 4  ;;  %v2545_v33 = vmul.f32 %v1520_v60, %v1520_v60  ;;  %v483_v10 = vld [vmem:[%s4817_s21 + $0x330] sm:$0xff] }
 0x293   : > { %v4211_v44 = vmax.f32 %v4174_v59, 0.0  ;;  %v3348_v32 = vadd.f32 %v3347_v36, %v3346_v61  ;;  %v2325_v21 = vrot.slane %v2324_v25, 1  ;;  %v2244_v53 = vrot.slane %v2243_v23, 4  ;;  %v1245_v61 = vpop.permute.xlu0 %1244 }
 0x294   : > { %v3822_v24 = vmul.f32 0.5, %v3694_v57  ;;  %v2253_v52 = vrot.slane %v2252_v41, 2  ;;  %v3276_v28 = vadd.f32 %v3275_v27, %v3274_v12  ;;  %v3267_v34 = vsel %vm1549_vm0, %v2545_v33, 0.0 }
 0x295   : > { %v4447_v13 = vmul.f32 %v4711_v2, %v4431_v6  ;;  %4674 = vmatmul.msk.f32.gmra.mxu1 %vm1549_vm0, %v4211_v44  ;;  %v5887_v37 = vmul.f32 0.5, %v3691_v11  ;;  %v5889_v5 = vmul.f32 0.5, %v3705_v47  ;;  %v2245_v18 = vadd.f32 %v2244_v53, %v2243_v23 }
 0x296   : > { %v2254_v1 = vadd.f32 %v2253_v52, %v2252_v41  ;;  %v3277_v63 = vrot.slane %v3276_v28, 2  ;;  %v5893_v26 = vsel %vm3990_vm1, %v3823_v14, %v3822_v24  ;;  %v3268_v9 = vrot.slane %v3267_v34, 4 }
 0x297   : > { %v4470_v3 = vsel %vm4460_vm8, %v4447_v13, 0.0  ;;  %v3349_v4 = vrot.slane %v3348_v32, 1  ;;  %v1534_v11 = vmul.f32 %v1322_v22, %v494_v29  ;;  %v2326_v16 = vadd.f32 %v2325_v21, %v2324_v25 }
 0x298   : > { %v2255_v31 = vrot.slane %v2254_v1, 1  ;;  %v3278_v17 = vadd.f32 %v3277_v63, %v3276_v28  ;;  %4471 = vadd.xlane.f32.xlu2 %v4470_v3  ;;  %v2246_v62 = vrot.slane %v2245_v18, 2  ;;  %v3269_v50 = vadd.f32 %v3268_v9, %v3267_v34 }
 0x299   : > { %v1524_v58 = vmul.f32 %v1252_v54, %v484_v0  ;;  %v2341_v47 = vsel %vm1549_vm0, %v1534_v11, 0.0  ;;  %v2559_v7 = vmul.f32 %v1534_v11, %v1534_v11  ;;  %v5900_v6 = vadd.f32 %v3349_v4, %v3348_v32 }
 0x29a   : > { %v2256_v48 = vadd.f32 %v2255_v31, %v2254_v1  ;;  %v3279_v30 = vrot.slane %v3278_v17, 1  ;;  %v2247_v56 = vadd.f32 %v2246_v62, %v2245_v18  ;;  %v3270_v19 = vrot.slane %v3269_v50, 2 }
 0x29b   : > { %v2342_v14 = vrot.slane %v2341_v47, 4  ;;  %v2271_v43 = vsel %vm1549_vm0, %v1524_v58, 0.0  ;;  %v3365_v60 = vsel %vm1549_vm0, %v2559_v7, 0.0  ;;  %v2549_v23 = vmul.f32 %v1524_v58, %v1524_v58  ;;  %v1273_v58 = vpop.permute.xlu1 %1272 }
 0x29c   : > { %v3280_v49 = vadd.f32 %v3279_v30, %v3278_v17  ;;  %v3570_v12 = vmul.f32 %v2256_v48, %v2256_v48  ;;  %v2272_v59 = vrot.slane %v2271_v43, 4  ;;  %v2248_v57 = vrot.slane %v2247_v56, 1 }
 0x29d   : > { %v3271_v36 = vadd.f32 %v3270_v19, %v3269_v50  ;;  %v2343_v41 = vadd.f32 %v2342_v14, %v2341_v47  ;;  %v3366_v27 = vrot.slane %v3365_v60, 4  ;;  %v1523_v33 = vmul.f32 %v1245_v61, %v483_v10  ;;  %v1343_v50 = vpop.permute.xlu2 %1342 }
 0x29e   : > { %v2273_v25 = vadd.f32 %v2272_v59, %v2271_v43  ;;  %v2249_v44 = vadd.f32 %v2248_v57, %v2247_v56  ;;  %v3698_v21 = vsub.f32 %v3570_v12, %v3280_v49  ;;  %v3295_v34 = vsel %vm1549_vm0, %v2549_v23, 0.0  ;;  %v4434_v49 = vld [vmem:[%s5854_s26 + $0x30] sm:$0xff]  ;;  %v497_v57 = vld [vmem:[%s4817_s21 + $0x3a0] sm:$0xff] }
 0x29f   : > { %v3272_v24 = vrot.slane %v3271_v36, 1  ;;  %v2344_v52 = vrot.slane %v2343_v41, 2  ;;  %v3367_v28 = vadd.f32 %v3366_v27, %v3365_v60  ;;  %v2264_v2 = vsel %vm1549_vm0, %v1523_v33, 0.0 }
 0x2a0   : > { %v2274_v53 = vrot.slane %v2273_v25, 2  ;;  %v3569_v22 = vmul.f32 %v2249_v44, %v2249_v44  ;;  %v3296_v32 = vrot.slane %v3295_v34, 4  ;;  %v2265_v54 = vrot.slane %v2264_v2, 4 }
 0x2a1   : > { %v3273_v13 = vadd.f32 %v3272_v24, %v3271_v36  ;;  %v2345_v29 = vadd.f32 %v2344_v52, %v2343_v41  ;;  %v3368_v1 = vrot.slane %v3367_v28, 2  ;;  %v2548_v0 = vmul.f32 %v1523_v33, %v1523_v33  ;;  %v4712_v33 = vld [vmem:[%s4805_s16 + $0x30] sm:$0xff] }
 0x2a2   : > { %v2275_v63 = vadd.f32 %v2274_v53, %v2273_v25  ;;  %v3245_v4 = vadd.f32 %v3244_v38, %v5738_v51  ;;  %v3297_v17 = vadd.f32 %v3296_v32, %v3295_v34  ;;  %v2266_v11 = vadd.f32 %v2265_v54, %v2264_v2 }
 0x2a3   : > { %v3697_v18 = vsub.f32 %v3569_v22, %v3273_v13  ;;  %v2346_v9 = vrot.slane %v2345_v29, 1  ;;  %v3369_v3 = vadd.f32 %v3368_v1, %v3367_v28  ;;  %v3288_v62 = vsel %vm1549_vm0, %v2548_v0, 0.0  ;;  %v4437_v1 = vld [vmem:[%s5854_s26 + $0x48] sm:$0xff] }
 0x2a4   : > { %v2276_v31 = vrot.slane %v2275_v63, 1  ;;  %v5908_v48 = vmul.f32 %v2326_v16, %v2326_v16  ;;  %v3289_v7 = vrot.slane %v3288_v62, 4  ;;  %v3298_v19 = vrot.slane %v3297_v17, 2 }
 0x2a5   : > { %v2347_v30 = vadd.f32 %v2346_v9, %v2345_v29  ;;  %v3370_v47 = vrot.slane %v3369_v3, 1  ;;  %v2267_v14 = vrot.slane %v2266_v11, 2  ;;  %v3692_v51 = vsub.f32 %v5858_v46, %v5861_v20  ;;  %v487_v20 = vld [vmem:[%s4817_s21 + $0x350] sm:$0xff]  ;;  %v486_v29 = vld [vmem:[%s4817_s21 + $0x348] sm:$0xff]  ;;  %v1364_v0 = vpop.permute.xlu2 %1363  ;;  %v1294_v9 = vpop.permute.xlu1 %1293 }
 0x2a6   : > { %v2277_v56 = vadd.f32 %v2276_v31, %v2275_v63  ;;  %v3290_v61 = vadd.f32 %v3289_v7, %v3288_v62  ;;  %v3693_v10 = vsub.f32 %v5766_v55, %v3245_v4  ;;  %v5914_v16 = vmul.f32 0.5, %v3698_v21 }
 0x2a7   : > { %v3371_v38 = vadd.f32 %v3370_v47, %v3369_v3  ;;  %v3583_v43 = vmul.f32 %v2347_v30, %v2347_v30  ;;  %v5916_v12 = vmul.f32 0.5, %v3697_v18  ;;  %v5918_v60 = vadd.f32 %v3298_v19, %v3297_v17  ;;  %v500_v18 = vld [vmem:[%s4817_s21 + $0x3b8] sm:$0xff]  ;;  %v490_v3 = vld [vmem:[%s4817_s21 + $0x368] sm:$0xff] }
 0x2a8   : > { %v2268_v59 = vadd.f32 %v2267_v14, %v2266_v11  ;;  %v3291_v41 = vrot.slane %v3290_v61, 2  ;;  %v3820_v27 = vmul.f32 0.5, %v3692_v51  ;;  %v4075_v46 = vsel %vm3992_vm2, %v5832_v42, %v5812_v40  ;;  %v4713_v30 = vld [vmem:[%s4805_s16 + $0x48] sm:$0xff] }
 0x2a9   : > { %v3711_v36 = vsub.f32 %v3583_v43, %v3371_v38  ;;  %v5925_v25 = vmul.f32 %v2277_v56, %v2277_v56  ;;  %v4076_v23 = vsel %vm3994_vm3, %v5830_v39, %v4075_v46  ;;  %v4450_v44 = vmul.f32 %v4712_v33, %v4434_v49 }
 0x2aa   : > { %v2269_v55 = vrot.slane %v2268_v59, 1  ;;  %v5930_v24 = vadd.f32 %v3291_v41, %v3290_v61  ;;  %v3821_v52 = vmul.f32 0.5, %v3693_v10  ;;  %v4077_v28 = vsel %vm3996_vm4, %v5741_v35, %v4076_v23  ;;  %v1266_v35 = vpop.permute.xlu0 %1265 }
 0x2ab   : > { %v1537_v21 = vmul.f32 %v1343_v50, %v497_v57  ;;  %v3300_v40 = vrot.slane %v5918_v60, 1  ;;  %v4078_v42 = vsel %vm3998_vm5, %v5887_v37, %v4077_v28  ;;  %v4479_v53 = vsel %vm4460_vm8, %v4450_v44, 0.0 }
 0x2ac   : > { %v1527_v39 = vmul.f32 %v1273_v58, %v487_v20  ;;  %v5938_v34 = vmul.f32 0.5, %v3711_v36  ;;  %v4079_v2 = vsel %vm4000_vm6, %v3820_v27, %v4078_v42  ;;  %4480 = vadd.xlane.f32.xlu2 %v4479_v53  ;;  %v5944_v63 = vadd.f32 %v2269_v55, %v2268_v59 }
 0x2ad   : > { %v2362_v13 = vsel %vm1549_vm0, %v1537_v21, 0.0  ;;  %v2562_v22 = vmul.f32 %v1537_v21, %v1537_v21  ;;  %v4080_v37 = vsel %vm4002_vm7, %v3821_v52, %v4079_v2  ;;  %v3293_v4 = vrot.slane %v5930_v24, 1 }
 0x2ae   : > { %v2363_v32 = vrot.slane %v2362_v13, 4  ;;  %v2292_v54 = vsel %vm1549_vm0, %v1527_v39, 0.0  ;;  %4664 = vmatmul.msk.f32.gmra.mxu2 %vm1549_vm0, %v4080_v37  ;;  %v2552_v11 = vmul.f32 %v1527_v39, %v1527_v39  ;;  %v1526_v58 = vmul.f32 %v1266_v35, %v486_v29 }
 0x2af   : > { %v3386_v31 = vsel %vm1549_vm0, %v2562_v22, 0.0  ;;  %v2293_v17 = vrot.slane %v2292_v54, 4  ;;  %v4453_v47 = vmul.f32 %v4713_v30, %v4437_v1  ;;  %v1540_v19 = vmul.f32 %v1364_v0, %v500_v18 }
 0x2b0   : > { %v2364_v62 = vadd.f32 %v2363_v32, %v2362_v13  ;;  %v3387_v50 = vrot.slane %v3386_v31, 4  ;;  %v3316_v56 = vsel %vm1549_vm0, %v2552_v11, 0.0  ;;  %v1530_v14 = vmul.f32 %v1294_v9, %v490_v3 }
 0x2b1   : > { %v2294_v7 = vadd.f32 %v2293_v17, %v2292_v54  ;;  %v3317_v43 = vrot.slane %v3316_v56, 4  ;;  %v2285_v61 = vsel %vm1549_vm0, %v1526_v58, 0.0  ;;  %v2551_v59 = vmul.f32 %v1526_v58, %v1526_v58 }
 0x2b2   : > { %v2365_v51 = vrot.slane %v2364_v62, 2  ;;  %v3388_v38 = vadd.f32 %v3387_v50, %v3386_v31  ;;  %v2286_v49 = vrot.slane %v2285_v61, 4  ;;  %v4488_v57 = vsel %vm4460_vm8, %v4453_v47, 0.0 }
 0x2b3   : > { %v2295_v10 = vrot.slane %v2294_v7, 2  ;;  %v3318_v27 = vadd.f32 %v3317_v43, %v3316_v56  ;;  %v2383_v46 = vsel %vm1549_vm0, %v1540_v19, 0.0  ;;  %v3309_v23 = vsel %vm1549_vm0, %v2551_v59, 0.0  ;;  %v489_v43 = vld [vmem:[%s4817_s21 + $0x360] sm:$0xff] }
 0x2b4   : > { %v2366_v36 = vadd.f32 %v2365_v51, %v2364_v62  ;;  %v3389_v41 = vrot.slane %v3388_v38, 2  ;;  %v2287_v55 = vadd.f32 %v2286_v49, %v2285_v61  ;;  %4489 = vadd.xlane.f32.xlu2 %v4488_v57  ;;  %v2384_v33 = vrot.slane %v2383_v46, 4 }
 0x2b5   : > { %v2296_v20 = vadd.f32 %v2295_v10, %v2294_v7  ;;  %v3319_v28 = vrot.slane %v3318_v27, 2  ;;  %v3310_v21 = vrot.slane %v3309_v23, 4  ;;  %v2565_v2 = vmul.f32 %v1540_v19, %v1540_v19 }
 0x2b6   : > { %v2367_v44 = vrot.slane %v2366_v36, 1  ;;  %v3390_v52 = vadd.f32 %v3389_v41, %v3388_v38  ;;  %v2288_v53 = vrot.slane %v2287_v55, 2  ;;  %v2385_v39 = vadd.f32 %v2384_v33, %v2383_v46  ;;  %v1287_v38 = vpop.permute.xlu0 %1286  ;;  %v4176_v46 = vpop.f32.mrf.mxu0 }
 0x2b7   : > { %v2297_v42 = vrot.slane %v2296_v20, 1  ;;  %v3320_v35 = vadd.f32 %v3319_v28, %v3318_v27  ;;  %v3311_v29 = vadd.f32 %v3310_v21, %v3309_v23  ;;  %v3407_v54 = vsel %vm1549_vm0, %v2565_v2, 0.0 }
 0x2b8   : > { %v2368_v13 = vadd.f32 %v2367_v44, %v2366_v36  ;;  %v3391_v22 = vrot.slane %v3390_v52, 1  ;;  %v2289_v37 = vadd.f32 %v2288_v53, %v2287_v55  ;;  %v2386_v32 = vrot.slane %v2385_v39, 2 }
 0x2b9   : > { %v2298_v1 = vadd.f32 %v2297_v42, %v2296_v20  ;;  %v3321_v9 = vrot.slane %v3320_v35, 1  ;;  %v3312_v3 = vrot.slane %v3311_v29, 2  ;;  %v3408_v62 = vrot.slane %v3407_v54, 4  ;;  %v5981_v42 = vld [vmem:[%s6344_s4] ss:$0 sm:$0xff] }
 0x2ba   : > { %v3392_v0 = vadd.f32 %v3391_v22, %v3390_v52  ;;  %v3586_v18 = vmul.f32 %v2368_v13, %v2368_v13  ;;  %v2290_v17 = vrot.slane %v2289_v37, 1  ;;  %v2387_v11 = vadd.f32 %v2386_v32, %v2385_v39  ;;  %v4429_v52 = vld [vmem:[%s5854_s26 + $0x8] sm:$0xff] }
 0x2bb   : > { %v3576_v31 = vmul.f32 %v2298_v1, %v2298_v1  ;;  %v3322_v58 = vadd.f32 %v3321_v9, %v3320_v35  ;;  %v3313_v30 = vadd.f32 %v3312_v3, %v3311_v29  ;;  %v2313_v47 = vsel %vm1549_vm0, %v1530_v14, 0.0  ;;  %v4440_v35 = vld [vmem:[%s5854_s26 + $0x60] sm:$0xff]  ;;  %v4715_v32 = vld [vmem:[%s4805_s16 + $0x8] sm:$0xff] }
 0x2bc   : > { %v3714_v50 = vsub.f32 %v3586_v18, %v3392_v0  ;;  %v2291_v7 = vadd.f32 %v2290_v17, %v2289_v37  ;;  %v2388_v56 = vrot.slane %v2387_v11, 1  ;;  %v3409_v19 = vadd.f32 %v3408_v62, %v3407_v54  ;;  %v503_v0 = vld [vmem:[%s4817_s21 + $0x3d0] sm:$0xff]  ;;  %v5993_v17 = vld [vmem:[%s6346_s6] ss:$0 sm:$0xff]  ;;  %v1315_v62 = vpop.permute.xlu1 %1314 }
 0x2bd   : > { %v2314_v51 = vrot.slane %v2313_v47, 4  ;;  %v5965_v61 = vadd.f32 %v3293_v4, %v5930_v24  ;;  %v5969_v10 = vmul.f32 %v5944_v63, %v5944_v63  ;;  %v3314_v49 = vrot.slane %v3313_v30, 1 }
 0x2be   : > { %v2555_v59 = vmul.f32 %v1530_v14, %v1530_v14  ;;  %v3704_v57 = vsub.f32 %v3576_v31, %v3322_v58  ;;  %v3575_v36 = vmul.f32 %v2291_v7, %v2291_v7  ;;  %v3410_v41 = vrot.slane %v3409_v19, 2  ;;  %v4716_v7 = vld [vmem:[%s4805_s16 + $0x60] sm:$0xff] }
 0x2bf   : > { %v2315_v27 = vadd.f32 %v2314_v51, %v2313_v47  ;;  %v5971_v20 = vmul.f32 0.5, %v3714_v50  ;;  %v3315_v55 = vadd.f32 %v3314_v49, %v3313_v30  ;;  %v1529_v24 = vmul.f32 %v1287_v38, %v489_v43  ;;  %v493_v50 = vld [vmem:[%s4817_s21 + $0x380] sm:$0xff] }
 0x2c0   : > { %v3337_v23 = vsel %vm1549_vm0, %v2555_v59, 0.0  ;;  %v2389_v4 = vadd.f32 %v2388_v56, %v2387_v11  ;;  %v5974_v33 = vadd.f32 %v3410_v41, %v3409_v19  ;;  %v4177_v53 = vadd.f32 %v5981_v42, %v4176_v46  ;;  %v1385_v11 = vpop.permute.xlu2 %1384  ;;  %v4295_v19 = vpop.f32.mrf.mxu1 }
 0x2c1   : > { %v2316_v63 = vrot.slane %v2315_v27, 2  ;;  %v3338_v44 = vrot.slane %v3337_v23, 4  ;;  %v3703_v14 = vsub.f32 %v3575_v36, %v3315_v55  ;;  %v2306_v28 = vsel %vm1549_vm0, %v1529_v24, 0.0 }
 0x2c2   : > { %v2554_v21 = vmul.f32 %v1529_v24, %v1529_v24  ;;  %v5984_v39 = vmul.f32 0.5, %v3704_v57  ;;  %v2307_v22 = vrot.slane %v2306_v28, 4  ;;  %v4212_v37 = vmax.f32 %v4177_v53, 0.0  ;;  %v1308_v24 = vpop.permute.xlu0 %1307 }
 0x2c3   : > { %v2317_v2 = vadd.f32 %v2316_v63, %v2315_v27  ;;  %v3339_v13 = vadd.f32 %v3338_v44, %v3337_v23  ;;  %v3831_v29 = vmul.f32 0.5, %v3703_v14  ;;  %v4445_v54 = vmul.f32 %v4715_v32, %v4429_v52 }
 0x2c4   : > { %v3330_v1 = vsel %vm1549_vm0, %v2554_v21, 0.0  ;;  %v2308_v3 = vadd.f32 %v2307_v22, %v2306_v28  ;;  %v3412_v58 = vrot.slane %v5974_v33, 1  ;;  %v5997_v30 = vmul.f32 %v2389_v4, %v2389_v4  ;;  %4675 = vmatmul.msk.f32.gmra.mxu1 %vm1549_vm0, %v4212_v37  ;;  %v492_v4 = vld [vmem:[%s4817_s21 + $0x378] sm:$0xff] }
 0x2c5   : > { %v2318_v18 = vrot.slane %v2317_v2, 1  ;;  %v3340_v9 = vrot.slane %v3339_v13, 2  ;;  %v3331_v31 = vrot.slane %v3330_v1, 4  ;;  %v4464_v47 = vsel %vm4460_vm8, %v4445_v54, 0.0 }
 0x2c6   : > { %v4456_v56 = vmul.f32 %v4716_v7, %v4440_v35  ;;  %v2309_v43 = vrot.slane %v2308_v3, 2  ;;  %4465 = vadd.xlane.f32.xlu0 %v4464_v47  ;;  %v6004_v59 = vsel %vm3990_vm1, %v3831_v29, %v5836_v45  ;;  %v1543_v36 = vmul.f32 %v1385_v11, %v503_v0 }
 0x2c7   : > { %v2319_v51 = vadd.f32 %v2318_v18, %v2317_v2  ;;  %v3341_v38 = vadd.f32 %v3340_v9, %v3339_v13  ;;  %v3332_v49 = vadd.f32 %v3331_v31, %v3330_v1  ;;  %v1533_v41 = vmul.f32 %v1315_v62, %v493_v50 }
 0x2c8   : > { %v4497_v57 = vsel %vm4460_vm8, %v4456_v56, 0.0  ;;  %v2310_v46 = vadd.f32 %v2309_v43, %v2308_v3  ;;  %v6008_v23 = vadd.f32 %v5993_v17, %v4295_v19  ;;  %v2404_v63 = vsel %vm1549_vm0, %v1543_v36, 0.0 }
 0x2c9   : > { %v3342_v27 = vrot.slane %v3341_v38, 1  ;;  %v3333_v55 = vrot.slane %v3332_v49, 2  ;;  %4498 = vadd.xlane.f32.xlu2 %v4497_v57  ;;  %v2568_v44 = vmul.f32 %v1543_v36, %v1543_v36  ;;  %v2334_v52 = vsel %vm1549_vm0, %v1533_v41, 0.0 }
 0x2ca   : > { %v2558_v45 = vmul.f32 %v1533_v41, %v1533_v41  ;;  %v6013_v14 = vmul.f32 %v2319_v51, %v2319_v51  ;;  %v2311_v28 = vrot.slane %v2310_v46, 1  ;;  %v2405_v53 = vrot.slane %v2404_v63, 4 }
 0x2cb   : > { %v3334_v21 = vadd.f32 %v3333_v55, %v3332_v49  ;;  %v3428_v2 = vsel %vm1549_vm0, %v2568_v44, 0.0  ;;  %v2335_v13 = vrot.slane %v2334_v52, 4  ;;  %v1532_v35 = vmul.f32 %v1308_v24, %v492_v4 }
 0x2cc   : > { %v3358_v22 = vsel %vm1549_vm0, %v2558_v45, 0.0  ;;  %v6017_v29 = vadd.f32 %v3342_v27, %v3341_v38  ;;  %v2312_v1 = vadd.f32 %v2311_v28, %v2310_v46  ;;  %v2406_v32 = vadd.f32 %v2405_v53, %v2404_v63 }
 0x2cd   : > { %v3335_v37 = vrot.slane %v3334_v21, 1  ;;  %v3429_v54 = vrot.slane %v3428_v2, 4  ;;  %v2336_v0 = vadd.f32 %v2335_v13, %v2334_v52  ;;  %v3359_v18 = vrot.slane %v3358_v22, 4 }
 0x2ce   : > { %v2327_v9 = vsel %vm1549_vm0, %v1532_v35, 0.0  ;;  %v3578_v31 = vmul.f32 %v2312_v1, %v2312_v1  ;;  %v4343_v11 = vmax.f32 %v6008_v23, 0.0  ;;  %v2407_v62 = vrot.slane %v2406_v32, 2 }
 0x2cf   : > { %v3336_v3 = vadd.f32 %v3335_v37, %v3334_v21  ;;  %v3430_v50 = vadd.f32 %v3429_v54, %v3428_v2  ;;  %v2337_v47 = vrot.slane %v2336_v0, 2  ;;  %v3360_v7 = vadd.f32 %v3359_v18, %v3358_v22  ;;  %v4717_v18 = vld [vmem:[%s4805_s16 + $0x20] sm:$0xff] }
 0x2d0   : > { %v2328_v56 = vrot.slane %v2327_v9, 4  ;;  %v3707_v19 = vsub.f32 %v6013_v14, %v6017_v29  ;;  %v2408_v51 = vadd.f32 %v2407_v62, %v2406_v32  ;;  %v2557_v38 = vmul.f32 %v1532_v35, %v1532_v35  ;;  %v6033_v14 = vld [vmem:[%s6347_s7] ss:$0 sm:$0xff]  ;;  %v1336_v32 = vpop.permute.xlu1 %1335 }
 0x2d1   : > { %v3301_v43 = vadd.f32 %v3300_v40, %v5918_v60  ;;  %v3431_v49 = vrot.slane %v3430_v50, 2  ;;  %v2338_v57 = vadd.f32 %v2337_v47, %v2336_v0  ;;  %v3361_v36 = vrot.slane %v3360_v7, 2  ;;  %v1406_v47 = vpop.permute.xlu2 %1405 }
 0x2d2   : > { %v2329_v41 = vadd.f32 %v2328_v56, %v2327_v9  ;;  %v3706_v27 = vsub.f32 %v3578_v31, %v3336_v3  ;;  %v2409_v46 = vrot.slane %v2408_v51, 1  ;;  %v3351_v55 = vsel %vm1549_vm0, %v2557_v38, 0.0  ;;  %v1329_v31 = vpop.permute.xlu0 %1328  ;;  %v495_v38 = vld [vmem:[%s4817_s21 + $0x390] sm:$0xff] }
 0x2d3   : > { %v3700_v23 = vsub.f32 %v5969_v10, %v5965_v61  ;;  %v3432_v24 = vadd.f32 %v3431_v49, %v3430_v50  ;;  %v2339_v4 = vrot.slane %v2338_v57, 1  ;;  %v3362_v63 = vadd.f32 %v3361_v36, %v3360_v7  ;;  %v4432_v61 = vld [vmem:[%s5854_s26 + $0x20] sm:$0xff]  ;;  %v506_v7 = vld [vmem:[%s4817_s21 + $0x3e8] sm:$0xff]  ;;  %v4435_v36 = vld [vmem:[%s5854_s26 + $0x38] sm:$0xff] }
 0x2d4   : > { %v2330_v44 = vrot.slane %v2329_v41, 2  ;;  %v2410_v52 = vadd.f32 %v2409_v46, %v2408_v51  ;;  %v3352_v45 = vrot.slane %v3351_v55, 4  ;;  %v3701_v60 = vsub.f32 %v5925_v25, %v3301_v43 }
 0x2d5   : > { %v3828_v40 = vmul.f32 0.5, %v3700_v23  ;;  %v3433_v28 = vrot.slane %v3432_v24, 1  ;;  %v2340_v21 = vadd.f32 %v2339_v4, %v2338_v57  ;;  %v3363_v53 = vrot.slane %v3362_v63, 1 }
 0x2d6   : > { %v2331_v2 = vadd.f32 %v2330_v44, %v2329_v41  ;;  %v3592_v10 = vmul.f32 %v2410_v52, %v2410_v52  ;;  %v3353_v13 = vadd.f32 %v3352_v45, %v3351_v55  ;;  %v3829_v22 = vmul.f32 0.5, %v3701_v60  ;;  %v4430_v41 = vld [vmem:[%s5854_s26 + $0x10] sm:$0xff]  ;;  %v4718_v52 = vld [vmem:[%s4805_s16 + $0x38] sm:$0xff] }
 0x2d7   : > { %v4082_v35 = vsel %vm3992_vm2, %v5797_v15, %v5893_v26  ;;  %v3434_v25 = vadd.f32 %v3433_v28, %v3432_v24  ;;  %v3364_v29 = vadd.f32 %v3363_v53, %v3362_v63  ;;  %v3582_v1 = vmul.f32 %v2340_v21, %v2340_v21  ;;  %v4719_v60 = vld [vmem:[%s4805_s16 + $0x10] sm:$0xff] }
 0x2d8   : > { %v2332_v37 = vrot.slane %v2331_v2, 1  ;;  %v3354_v54 = vrot.slane %v3353_v13, 2  ;;  %v4083_v0 = vsel %vm3994_vm3, %v5916_v12, %v4082_v35  ;;  %v4448_v9 = vmul.f32 %v4717_v18, %v4432_v61 }
 0x2d9   : > { %v4363_v3 = vmul.f32 %v6033_v14, %v4343_v11  ;;  %v3720_v62 = vsub.f32 %v3592_v10, %v3434_v25  ;;  %v3710_v50 = vsub.f32 %v3582_v1, %v3364_v29  ;;  %v4084_v26 = vsel %vm3996_vm4, %v5914_v16, %v4083_v0  ;;  %v496_v11 = vld [vmem:[%s4817_s21 + $0x398] sm:$0xff] }
 0x2da   : > { %v2333_v15 = vadd.f32 %v2332_v37, %v2331_v2  ;;  %v6046_v56 = vadd.f32 %v3354_v54, %v3353_v13  ;;  %v4085_v12 = vsel %vm3998_vm5, %v5821_v8, %v4084_v26  ;;  %v4473_v51 = vsel %vm4460_vm8, %v4448_v9, 0.0  ;;  %v1357_v37 = vpop.permute.xlu1 %1356 }
 0x2db   : > { %v6053_v43 = vmul.f32 0.5, %v3707_v19  ;;  %v6055_v49 = vmul.f32 0.5, %v3706_v27  ;;  %v6057_v57 = vmul.f32 0.5, %v3720_v62  ;;  %v4086_v16 = vsel %vm4000_vm6, %v3828_v40, %v4085_v12  ;;  %4474 = vadd.xlane.f32.xlu0 %v4473_v51 }
 0x2dc   : > { %v6062_v46 = vmul.f32 0.5, %v3710_v50  ;;  %v4087_v8 = vsel %vm4002_vm7, %v3829_v22, %v4086_v16  ;;  %v4380_v55 = vsel %vm4379_vm9, %v4363_v3, 0.0  ;;  %v1546_v23 = vmul.f32 %v1406_v47, %v506_v7  ;;  %v1350_v3 = vpop.permute.xlu0 %1349 }
 0x2dd   : > { %v3356_v19 = vrot.slane %v6046_v56, 1  ;;  %v6067_v27 = vmul.f32 %v2333_v15, %v2333_v15  ;;  %4665 = vmatmul.msk.f32.gmra.mxu2 %vm1549_vm0, %v4087_v8  ;;  %4381 = vadd.xlane.f32.xlu2 %v4380_v55  ;;  %v1536_v24 = vmul.f32 %v1336_v32, %v496_v11  ;;  %v1535_v4 = vmul.f32 %v1329_v31, %v495_v38  ;;  %v499_v32 = vld [vmem:[%s4817_s21 + $0x3b0] sm:$0xff]  ;;  %v498_v31 = vld [vmem:[%s4817_s21 + $0x3a8] sm:$0xff] }
 0x2de   : > { %v2425_v63 = vsel %vm1549_vm0, %v1546_v23, 0.0  ;;  %v2571_v44 = vmul.f32 %v1546_v23, %v1546_v23  ;;  %v4451_v45 = vmul.f32 %v4718_v52, %v4435_v36  ;;  %v4446_v40 = vmul.f32 %v4719_v60, %v4430_v41 }
 0x2df   : > { %v2426_v28 = vrot.slane %v2425_v63, 4  ;;  %v2355_v21 = vsel %vm1549_vm0, %v1536_v24, 0.0  ;;  %v2561_v53 = vmul.f32 %v1536_v24, %v1536_v24  ;;  %v2348_v2 = vsel %vm1549_vm0, %v1535_v4, 0.0 }
 0x2e0   : > { %v3449_v61 = vsel %vm1549_vm0, %v2571_v44, 0.0  ;;  %v2356_v10 = vrot.slane %v2355_v21, 4  ;;  %v2349_v13 = vrot.slane %v2348_v2, 4  ;;  %v2560_v22 = vmul.f32 %v1535_v4, %v1535_v4 }
 0x2e1   : > { %v2427_v35 = vadd.f32 %v2426_v28, %v2425_v63  ;;  %v3450_v25 = vrot.slane %v3449_v61, 4  ;;  %v3379_v29 = vsel %vm1549_vm0, %v2561_v53, 0.0  ;;  %v4482_v1 = vsel %vm4460_vm8, %v4451_v45, 0.0 }
 0x2e2   : > { %v2357_v54 = vadd.f32 %v2356_v10, %v2355_v21  ;;  %v3380_v0 = vrot.slane %v3379_v29, 4  ;;  %v2350_v18 = vadd.f32 %v2349_v13, %v2348_v2  ;;  %v3372_v9 = vsel %vm1549_vm0, %v2560_v22, 0.0 }
 0x2e3   : > { %v2428_v62 = vrot.slane %v2427_v35, 2  ;;  %v3451_v50 = vadd.f32 %v3450_v25, %v3449_v61  ;;  %v3373_v15 = vrot.slane %v3372_v9, 4  ;;  %4483 = vadd.xlane.f32.xlu0 %v4482_v1  ;;  %v4467_v26 = vsel %vm4460_vm8, %v4446_v40, 0.0 }
 0x2e4   : > { %v2358_v47 = vrot.slane %v2357_v54, 2  ;;  %v3381_v7 = vadd.f32 %v3380_v0, %v3379_v29  ;;  %v2351_v12 = vrot.slane %v2350_v18, 2  ;;  %4468 = vadd.xlane.f32.xlu1 %v4467_v26  ;;  %v1539_v51 = vmul.f32 %v1357_v37, %v499_v32 }
 0x2e5   : > { %v2429_v11 = vadd.f32 %v2428_v62, %v2427_v35  ;;  %v3452_v38 = vrot.slane %v3451_v50, 2  ;;  %v3374_v16 = vadd.f32 %v3373_v15, %v3372_v9  ;;  %v1538_v36 = vmul.f32 %v1350_v3, %v498_v31 }
 0x2e6   : > { %v2359_v41 = vadd.f32 %v2358_v47, %v2357_v54  ;;  %v3382_v8 = vrot.slane %v3381_v7, 2  ;;  %v2352_v55 = vadd.f32 %v2351_v12, %v2350_v18  ;;  %v2376_v23 = vsel %vm1549_vm0, %v1539_v51, 0.0  ;;  %v4179_v18 = vpop.f32.mrf.mxu0 }
 0x2e7   : > { %v2430_v24 = vrot.slane %v2429_v11, 1  ;;  %v3453_v4 = vadd.f32 %v3452_v38, %v3451_v50  ;;  %v3375_v63 = vrot.slane %v3374_v16, 2  ;;  %v2377_v44 = vrot.slane %v2376_v23, 4  ;;  %v4438_v38 = vld [vmem:[%s5854_s26 + $0x50] sm:$0xff] }
 0x2e8   : > { %v2360_v52 = vrot.slane %v2359_v41, 1  ;;  %v3383_v45 = vadd.f32 %v3382_v8, %v3381_v7  ;;  %v2353_v60 = vrot.slane %v2352_v55, 1  ;;  %v2564_v40 = vmul.f32 %v1539_v51, %v1539_v51 }
 0x2e9   : > { %v2431_v28 = vadd.f32 %v2430_v24, %v2429_v11  ;;  %v3454_v21 = vrot.slane %v3453_v4, 1  ;;  %v3376_v53 = vadd.f32 %v3375_v63, %v3374_v16  ;;  %v2378_v2 = vadd.f32 %v2377_v44, %v2376_v23  ;;  %v4298_v16 = vpop.f32.mrf.mxu1 }
 0x2ea   : > { %v2361_v61 = vadd.f32 %v2360_v52, %v2359_v41  ;;  %v3384_v10 = vrot.slane %v3383_v45, 1  ;;  %v2354_v13 = vadd.f32 %v2353_v60, %v2352_v55  ;;  %v3400_v22 = vsel %vm1549_vm0, %v2564_v40, 0.0  ;;  %v1378_v55 = vpop.permute.xlu1 %1377  ;;  %v4720_v52 = vld [vmem:[%s4805_s16 + $0x50] sm:$0xff] }
 0x2eb   : > { %v6084_v35 = vadd.f32 %v3454_v21, %v3453_v4  ;;  %v6086_v25 = vmul.f32 %v2431_v28, %v2431_v28  ;;  %v3377_v29 = vrot.slane %v3376_v53, 1  ;;  %v2379_v1 = vrot.slane %v2378_v2, 2 }
 0x2ec   : > { %v3385_v37 = vadd.f32 %v3384_v10, %v3383_v45  ;;  %v3585_v32 = vmul.f32 %v2361_v61, %v2361_v61  ;;  %v3584_v54 = vmul.f32 %v2354_v13, %v2354_v13  ;;  %v3401_v0 = vrot.slane %v3400_v22, 4  ;;  %v1371_v61 = vpop.permute.xlu0 %1370 }
 0x2ed   : > { %v6091_v9 = vsel %vm3990_vm1, %v5938_v34, %v6062_v46  ;;  %v3378_v3 = vadd.f32 %v3377_v29, %v3376_v53  ;;  %v2380_v31 = vadd.f32 %v2379_v1, %v2378_v2  ;;  %v2369_v62 = vsel %vm1549_vm0, %v1538_v36, 0.0  ;;  %v4433_v2 = vld [vmem:[%s5854_s26 + $0x28] sm:$0xff] }
 0x2ee   : > { %v3713_v50 = vsub.f32 %v3585_v32, %v3385_v37  ;;  %v3402_v15 = vadd.f32 %v3401_v0, %v3400_v22  ;;  %v2370_v26 = vrot.slane %v2369_v62, 4  ;;  %v2563_v47 = vmul.f32 %v1538_v36, %v1538_v36  ;;  %v502_v1 = vld [vmem:[%s4817_s21 + $0x3c8] sm:$0xff] }
 0x2ef   : > { %v3723_v7 = vsub.f32 %v6086_v25, %v6084_v35  ;;  %v3712_v12 = vsub.f32 %v3584_v54, %v3378_v3  ;;  %v2381_v51 = vrot.slane %v2380_v31, 1  ;;  %v4180_v11 = vadd.f32 %v5981_v42, %v4179_v18  ;;  %v4721_v18 = vld [vmem:[%s4805_s16 + $0x28] sm:$0xff] }
 0x2f0   : > { %v6098_v34 = vmul.f32 0.5, %v3713_v50  ;;  %v3403_v46 = vrot.slane %v3402_v15, 2  ;;  %v2371_v41 = vadd.f32 %v2370_v26, %v2369_v62  ;;  %v3393_v8 = vsel %vm1549_vm0, %v2563_v47, 0.0 }
 0x2f1   : > { %v6101_v23 = vmul.f32 0.5, %v3712_v12  ;;  %v2382_v36 = vadd.f32 %v2381_v51, %v2380_v31  ;;  %v3394_v24 = vrot.slane %v3393_v8, 4  ;;  %v4213_v4 = vmax.f32 %v4180_v11, 0.0  ;;  %v4436_v11 = vld [vmem:[%s5854_s26 + $0x40] sm:$0xff] }
 0x2f2   : > { %v3404_v63 = vadd.f32 %v3403_v46, %v3402_v15  ;;  %v2372_v44 = vrot.slane %v2371_v41, 2  ;;  %v4454_v45 = vmul.f32 %v4720_v52, %v4438_v38  ;;  %v4299_v60 = vadd.f32 %v5993_v17, %v4298_v16  ;;  %v4722_v52 = vld [vmem:[%s4805_s16 + $0x40] sm:$0xff] }
 0x2f3   : > { %v6105_v40 = vmul.f32 %v2382_v36, %v2382_v36  ;;  %v3395_v28 = vadd.f32 %v3394_v24, %v3393_v8  ;;  %v3357_v21 = vadd.f32 %v3356_v19, %v6046_v56  ;;  %v3708_v53 = vsub.f32 %v5908_v48, %v5900_v6  ;;  %4676 = vmatmul.msk.f32.gmra.mxu1 %vm1549_vm0, %v4213_v4  ;;  %v501_v48 = vld [vmem:[%s4817_s21 + $0x3c0] sm:$0xff] }
 0x2f4   : > { %v3405_v10 = vrot.slane %v3404_v63, 1  ;;  %v2373_v13 = vadd.f32 %v2372_v44, %v2371_v41  ;;  %v4491_v22 = vsel %vm4460_vm8, %v4454_v45, 0.0  ;;  %v4344_v29 = vmax.f32 %v4299_v60, 0.0  ;;  %v1399_v41 = vpop.permute.xlu1 %1398 }
 0x2f5   : > { %v3396_v37 = vrot.slane %v3395_v28, 2  ;;  %4492 = vadd.xlane.f32.xlu0 %v4491_v22  ;;  %v3709_v32 = vsub.f32 %v6067_v27, %v3357_v21  ;;  %v3836_v54 = vmul.f32 0.5, %v3708_v53  ;;  %v4089_v6 = vsel %vm3992_vm2, %v5984_v39, %v6004_v59 }
 0x2f6   : > { %v6121_v56 = vadd.f32 %v3405_v10, %v3404_v63  ;;  %v2374_v19 = vrot.slane %v2373_v13, 1  ;;  %v4090_v0 = vsel %vm3994_vm3, %v5889_v5, %v4089_v6  ;;  %v4449_v3 = vmul.f32 %v4721_v18, %v4433_v2  ;;  %v1392_v2 = vpop.permute.xlu0 %1391 }
 0x2f7   : > { %v3397_v31 = vadd.f32 %v3396_v37, %v3395_v28  ;;  %v3837_v62 = vmul.f32 0.5, %v3709_v32  ;;  %v4091_v27 = vsel %vm3996_vm4, %v6055_v49, %v4090_v0  ;;  %v1542_v50 = vmul.f32 %v1378_v55, %v502_v1  ;;  %v504_v1 = vld [vmem:[%s4817_s21 + $0x3d8] sm:$0xff] }
 0x2f8   : > { %v2375_v15 = vadd.f32 %v2374_v19, %v2373_v13  ;;  %v4092_v39 = vsel %vm3998_vm5, %v6053_v43, %v4091_v27  ;;  %v4476_v59 = vsel %vm4460_vm8, %v4449_v3, 0.0  ;;  %v1541_v26 = vmul.f32 %v1371_v61, %v501_v48  ;;  %v505_v43 = vld [vmem:[%s4817_s21 + $0x3e0] sm:$0xff]  ;;  %v4439_v37 = vld [vmem:[%s5854_s26 + $0x58] sm:$0xff] }
 0x2f9   : > { %v3398_v47 = vrot.slane %v3397_v31, 1  ;;  %v4093_v5 = vsel %vm4000_vm6, %v3836_v54, %v4092_v39  ;;  %4477 = vadd.xlane.f32.xlu1 %v4476_v59  ;;  %v2397_v12 = vsel %vm1549_vm0, %v1542_v50, 0.0  ;;  %v2567_v51 = vmul.f32 %v1542_v50, %v1542_v50  ;;  %v4723_v27 = vld [vmem:[%s4805_s16 + $0x58] sm:$0xff] }
 0x2fa   : > { %v3587_v38 = vmul.f32 %v2375_v15, %v2375_v15  ;;  %v4094_v49 = vsel %vm4002_vm7, %v3837_v62, %v4093_v5  ;;  %v2398_v16 = vrot.slane %v2397_v12, 4  ;;  %v2390_v46 = vsel %vm1549_vm0, %v1541_v26, 0.0 }
 0x2fb   : > { %v3399_v8 = vadd.f32 %v3398_v47, %v3397_v31  ;;  %4666 = vmatmul.msk.f32.gmra.mxu2 %vm1549_vm0, %v4094_v49  ;;  %v3421_v55 = vsel %vm1549_vm0, %v2567_v51, 0.0  ;;  %v2391_v36 = vrot.slane %v2390_v46, 4  ;;  %v2566_v24 = vmul.f32 %v1541_v26, %v1541_v26 }
 0x2fc   : > { %v2399_v4 = vadd.f32 %v2398_v16, %v2397_v12  ;;  %v3422_v63 = vrot.slane %v3421_v55, 4  ;;  %v4364_v44 = vmul.f32 %v6033_v14, %v4344_v29  ;;  %v4452_v45 = vmul.f32 %v4722_v52, %v4436_v11 }
 0x2fd   : > { %v3715_v60 = vsub.f32 %v3587_v38, %v3399_v8  ;;  %v2392_v28 = vadd.f32 %v2391_v36, %v2390_v46  ;;  %v3414_v21 = vsel %vm1549_vm0, %v2566_v24, 0.0  ;;  %v1545_v53 = vmul.f32 %v1399_v41, %v505_v43 }
 0x2fe   : > { %v2400_v61 = vrot.slane %v2399_v4, 2  ;;  %v3423_v10 = vadd.f32 %v3422_v63, %v3421_v55  ;;  %v3415_v13 = vrot.slane %v3414_v21, 4  ;;  %v4383_v22 = vsel %vm4379_vm9, %v4364_v44, 0.0  ;;  %v1420_v63 = vpop.permute.xlu1 %1419  ;;  %v508_v44 = vld [vmem:[%s4817_s21 + $0x3f8] sm:$0xff] }
 0x2ff   : > { %v6145_v32 = vmul.f32 0.5, %v3715_v60  ;;  %v2393_v54 = vrot.slane %v2392_v28, 2  ;;  %4384 = vadd.xlane.f32.xlu0 %v4383_v22  ;;  %v4485_v29 = vsel %vm4460_vm8, %v4452_v45, 0.0  ;;  %v2418_v6 = vsel %vm1549_vm0, %v1545_v53, 0.0 }
 0x300   : > { %v2401_v48 = vadd.f32 %v2400_v61, %v2399_v4  ;;  %v3424_v19 = vrot.slane %v3423_v10, 2  ;;  %v3416_v0 = vadd.f32 %v3415_v13, %v3414_v21  ;;  %v2419_v18 = vrot.slane %v2418_v6, 4  ;;  %v1413_v21 = vpop.permute.xlu0 %1412 }
 0x301   : > { %v2394_v3 = vadd.f32 %v2393_v54, %v2392_v28  ;;  %4486 = vadd.xlane.f32.xlu1 %v4485_v29  ;;  %v2570_v31 = vmul.f32 %v1545_v53, %v1545_v53  ;;  %v1544_v62 = vmul.f32 %v1392_v2, %v504_v1  ;;  %v4455_v50 = vmul.f32 %v4723_v27, %v4439_v37  ;;  %v507_v53 = vld [vmem:[%s4817_s21 + $0x3f0] sm:$0xff]  ;;  %s4525_s21 = sld [smem:[#allocation2]] }
 0x302   : > { %v2402_v15 = vrot.slane %v2401_v48, 1  ;;  %v3425_v39 = vadd.f32 %v3424_v19, %v3423_v10  ;;  %v3417_v59 = vrot.slane %v3416_v0, 2  ;;  %v2420_v26 = vadd.f32 %v2419_v18, %v2418_v6 }
 0x303   : > { %v2395_v47 = vrot.slane %v2394_v3, 1  ;;  %v3442_v5 = vsel %vm1549_vm0, %v2570_v31, 0.0  ;;  %v2411_v12 = vsel %vm1549_vm0, %v1544_v62, 0.0  ;;  %v2569_v51 = vmul.f32 %v1544_v62, %v1544_v62 }
 0x304   : > { %v2403_v11 = vadd.f32 %v2402_v15, %v2401_v48  ;;  %v3426_v38 = vrot.slane %v3425_v39, 1  ;;  %v3418_v49 = vadd.f32 %v3417_v59, %v3416_v0  ;;  %v2421_v16 = vrot.slane %v2420_v26, 2 }
 0x305   : > { %v2396_v46 = vadd.f32 %v2395_v47, %v2394_v3  ;;  %v3443_v41 = vrot.slane %v3442_v5, 4  ;;  %v2412_v43 = vrot.slane %v2411_v12, 4  ;;  %v3435_v8 = vsel %vm1549_vm0, %v2569_v51, 0.0 }
 0x306   : > { %v3427_v55 = vadd.f32 %v3426_v38, %v3425_v39  ;;  %v3591_v36 = vmul.f32 %v2403_v11, %v2403_v11  ;;  %v3419_v24 = vrot.slane %v3418_v49, 1  ;;  %v2422_v4 = vadd.f32 %v2421_v16, %v2420_v26 }
 0x307   : > { %v3590_v52 = vmul.f32 %v2396_v46, %v2396_v46  ;;  %v3444_v45 = vadd.f32 %v3443_v41, %v3442_v5  ;;  %v2413_v60 = vadd.f32 %v2412_v43, %v2411_v12  ;;  %v3436_v28 = vrot.slane %v3435_v8, 4  ;;  %v4301_v5 = vpop.f32.mrf.mxu1 }
 0x308   : > { %v3719_v2 = vsub.f32 %v3591_v36, %v3427_v55  ;;  %v3420_v61 = vadd.f32 %v3419_v24, %v3418_v49  ;;  %v2423_v10 = vrot.slane %v2422_v4, 1  ;;  %v4494_v13 = vsel %vm4460_vm8, %v4455_v50, 0.0  ;;  %v4182_v24 = vpop.f32.mrf.mxu2 }
 0x309   : > { %v3445_v22 = vrot.slane %v3444_v45, 2  ;;  %v2414_v1 = vrot.slane %v2413_v60, 2  ;;  %v3437_v37 = vadd.f32 %v3436_v28, %v3435_v8  ;;  %4495 = vadd.xlane.f32.xlu1 %v4494_v13  ;;  %v1548_v54 = vmul.f32 %v1420_v63, %v508_v44 }
 0x30a   : > { %v3847_v29 = vmul.f32 0.5, %v3719_v2  ;;  %v3718_v6 = vsub.f32 %v3590_v52, %v3420_v61  ;;  %v2424_v48 = vadd.f32 %v2423_v10, %v2422_v4  ;;  %v1547_v19 = vmul.f32 %v1413_v21, %v507_v53 }
 0x30b   : > { %v3446_v0 = vadd.f32 %v3445_v22, %v3444_v45  ;;  %v2415_v18 = vadd.f32 %v2414_v1, %v2413_v60  ;;  %v3438_v3 = vrot.slane %v3437_v37, 2  ;;  %v2439_v31 = vsel %vm1549_vm0, %v1548_v54, 0.0 }
 0x30c   : > { %v3846_v62 = vmul.f32 0.5, %v3718_v6  ;;  %v3594_v27 = vmul.f32 %v2424_v48, %v2424_v48  ;;  %v2440_v15 = vrot.slane %v2439_v31, 4  ;;  %v2573_v39 = vmul.f32 %v1548_v54, %v1548_v54 }
 0x30d   : > { %v3447_v59 = vrot.slane %v3446_v0, 1  ;;  %v2416_v50 = vrot.slane %v2415_v18, 1  ;;  %v3439_v26 = vadd.f32 %v3438_v3, %v3437_v37  ;;  %v2432_v47 = vsel %vm1549_vm0, %v1547_v19, 0.0 }
 0x30e   : > { %v4102_v12 = vsel %vm3990_vm1, %v3847_v29, %v3846_v62  ;;  %v2441_v51 = vadd.f32 %v2440_v15, %v2439_v31  ;;  %v3463_v11 = vsel %vm1549_vm0, %v2573_v39, 0.0  ;;  %v2433_v38 = vrot.slane %v2432_v47, 4 }
 0x30f   : > { %v3448_v49 = vadd.f32 %v3447_v59, %v3446_v0  ;;  %v2417_v16 = vadd.f32 %v2416_v50, %v2415_v18  ;;  %v3440_v46 = vrot.slane %v3439_v26, 1  ;;  %v3464_v41 = vrot.slane %v3463_v11, 4 }
 0x310   : > { %v2442_v43 = vrot.slane %v2441_v51, 2  ;;  %v2434_v8 = vadd.f32 %v2433_v38, %v2432_v47  ;;  %v2572_v55 = vmul.f32 %v1547_v19, %v1547_v19  ;;  %v4302_v36 = vadd.f32 %v5993_v17, %v4301_v5 }
 0x311   : > { %v3722_v4 = vsub.f32 %v3594_v27, %v3448_v49  ;;  %v3441_v63 = vadd.f32 %v3440_v46, %v3439_v26  ;;  %v3593_v44 = vmul.f32 %v2417_v16, %v2417_v16  ;;  %v3465_v52 = vadd.f32 %v3464_v41, %v3463_v11 }
 0x312   : > { %v2443_v45 = vadd.f32 %v2442_v43, %v2441_v51  ;;  %v2435_v60 = vrot.slane %v2434_v8, 2  ;;  %v3456_v28 = vsel %vm1549_vm0, %v2572_v55, 0.0  ;;  %v4345_v21 = vmax.f32 %v4302_v36, 0.0 }
 0x313   : > { %v3850_v53 = vmul.f32 0.5, %v3722_v4  ;;  %v3721_v2 = vsub.f32 %v3593_v44, %v3441_v63  ;;  %v3466_v61 = vrot.slane %v3465_v52, 2  ;;  %v3457_v10 = vrot.slane %v3456_v28, 4 }
 0x314   : > { %v2444_v13 = vrot.slane %v2443_v45, 1  ;;  %v2436_v22 = vadd.f32 %v2435_v60, %v2434_v8  ;;  %v3413_v1 = vadd.f32 %v3412_v58, %v5974_v33  ;;  %v3716_v37 = vsub.f32 %v6105_v40, %v6121_v56  ;;  %v4304_v40 = vpop.f32.mrf.mxu1  ;;  %v4463_v8 = vpop.xlane.xlu2 %4462 }
 0x315   : > { %v3849_v54 = vmul.f32 0.5, %v3721_v2  ;;  %v3467_v29 = vadd.f32 %v3466_v61, %v3465_v52  ;;  %v3458_v6 = vadd.f32 %v3457_v10, %v3456_v28  ;;  %v4096_v48 = vsel %vm3992_vm2, %v6101_v23, %v6091_v9  ;;  %v4185_v9 = vpop.f32.mrf.mxu2 }
 0x316   : > { %v2445_v19 = vadd.f32 %v2444_v13, %v2443_v45  ;;  %v2437_v0 = vrot.slane %v2436_v22, 1  ;;  %v3717_v18 = vsub.f32 %v5997_v30, %v3413_v1  ;;  %v3844_v3 = vmul.f32 0.5, %v3716_v37 }
 0x317   : > { %v3468_v31 = vrot.slane %v3467_v29, 1  ;;  %v3459_v62 = vrot.slane %v3458_v6, 2  ;;  %v4097_v33 = vsel %vm3994_vm3, %v6098_v34, %v4096_v48  ;;  %v4183_v58 = vadd.f32 %v5981_v42, %v4182_v24 }
 0x318   : > { %v3597_v56 = vmul.f32 %v2445_v19, %v2445_v19  ;;  %v2438_v27 = vadd.f32 %v2437_v0, %v2436_v22  ;;  %v3845_v15 = vmul.f32 0.5, %v3717_v18  ;;  %v4098_v39 = vsel %vm3996_vm4, %v5971_v20, %v4097_v33 }
 0x319   : > { %v3460_v23 = vadd.f32 %v3459_v62, %v3458_v6  ;;  %v4099_v30 = vsel %vm3998_vm5, %v6145_v32, %v4098_v39  ;;  %v4214_v59 = vmax.f32 %v4183_v58, 0.0  ;;  %v4365_v50 = vmul.f32 %v6033_v14, %v4345_v21 }
 0x31a   : > { %v3596_v26 = vmul.f32 %v2438_v27, %v2438_v27  ;;  %v4100_v34 = vsel %vm4000_vm6, %v3844_v3, %v4099_v30  ;;  %v4305_v47 = vadd.f32 %v5993_v17, %v4304_v40  ;;  %v3469_v5 = vadd.f32 %v3468_v31, %v3467_v29 }
 0x31b   : > { %v3461_v51 = vrot.slane %v3460_v23, 1  ;;  %v4101_v11 = vsel %vm4002_vm7, %v3845_v15, %v4100_v34  ;;  %v4386_v38 = vsel %vm4379_vm9, %v4365_v50, 0.0  ;;  %4677 = vmatmul.msk.f32.vlgmr.msra.gmra.mxu3 %vm1549_vm0, %v4214_v59  ;;  %v4103_v20 = vsel %vm3992_vm2, %v6057_v57, %v4102_v12 }
 0x31c   : > { %4667 = vmatmul.msk.f32.gmra.mxu2 %vm1549_vm0, %v4101_v11  ;;  %4387 = vadd.xlane.f32.xlu1 %v4386_v38  ;;  %v4346_v32 = vmax.f32 %v4305_v47, 0.0  ;;  %v3725_v49 = vsub.f32 %v3597_v56, %v3469_v5  ;;  %v4104_v16 = vsel %vm3994_vm3, %v3849_v54, %v4103_v20  ;;  %v4186_v46 = vadd.f32 %v5981_v42, %v4185_v9  ;;  %v4472_v25 = vpop.xlane.xlu2 %4471 }
 0x31d   : > { %v3462_v41 = vadd.f32 %v3461_v51, %v3460_v23  ;;  %v4105_v36 = vsel %vm3996_vm4, %v3850_v53, %v4104_v16  ;;  %v3851_v57 = vmul.f32 0.5, %v3723_v7  ;;  %v4188_v63 = vpop.f32.mrf.mxu2  ;;  %v6210_v22 = vstv %s4525_s21 }
 0x31e   : > { %v4366_v43 = vmul.f32 %v6033_v14, %v4346_v32  ;;  %v4215_v24 = vmax.f32 %v4186_v46, 0.0  ;;  %v3853_v12 = vmul.f32 0.5, %v3725_v49  ;;  %v4189_v60 = vadd.f32 %v5981_v42, %v4188_v63 }
 0x31f   : > { %v3724_v55 = vsub.f32 %v3596_v26, %v3462_v41  ;;  %v4106_v52 = vsel %vm3998_vm5, %v3851_v57, %v4105_v36 }
 0x320   : > { %v4389_v4 = vsel %vm4379_vm9, %v4366_v43, 0.0  ;;  %v4216_v35 = vmax.f32 %v4189_v60, 0.0 }
 0x321   : > { %v3852_v44 = vmul.f32 0.5, %v3724_v55  ;;  %4390 = vadd.xlane.f32.xlu2 %v4389_v4 }
 0x323   : > { %v4107_v45 = vsel %vm4000_vm6, %v3852_v44, %v4106_v52  ;;  %4678 = vmatmul.msk.f32.gmra.mxu3 %vm1549_vm0, %v4215_v24  ;;  %v4307_v24 = vpop.f32.mrf.mxu1 }
 0x324   : > { %v4108_v28 = vsel %vm4002_vm7, %v3853_v12, %v4107_v45  ;;  %v6202_v21 = vpop.xlane.xlu2 %4480  ;;  %v4308_v4 = vadd.f32 %v5993_v17, %v4307_v24 }
 0x325   : > { %4668 = vmatmul.msk.f32.gmra.mxu2 %vm1549_vm0, %v4108_v28 }
 0x326   : > { %v4347_v52 = vmax.f32 %v4308_v4, 0.0 }
 0x328   : > { %v4367_v45 = vmul.f32 %v6033_v14, %v4347_v52 }
 0x32b   : > { %4679 = vmatmul.msk.f32.gmra.mxu3 %vm1549_vm0, %v4216_v35  ;;  %v4310_v60 = vpop.f32.mrf.mxu1 }
 0x32c   : > { %v6206_v61 = vpop.xlane.xlu2 %4489 }
 0x331   : > { %v4191_v7 = vpop.f32.mrf.mxu2 }
 0x332   : > { %v4192_v53 = vadd.f32 %v5981_v42, %v4191_v7 }
 0x334   : > { %v4217_v2 = vmax.f32 %v4192_v53, 0.0  ;;  %v4392_v53 = vsel %vm4379_vm9, %v4367_v45, 0.0 }
 0x336   : > { %4680 = vmatmul.msk.f32.gmra.mxu3 %vm1549_vm0, %v4217_v2 }
 0x339   : > { %v4466_v13 = vpop.xlane.xlu0 %4465 }
 0x33c   : > { %v6208_v10 = vpop.xlane.xlu2 %4498 }
 0x34e   : > { %v6219_v29 = vpop.xlane.xlu0 %4474 }
 0x350   : > { %v4382_v1 = vpop.xlane.xlu2 %4381 }
 0x351   : > { %v4509_v37 = vadd.f32 %v4463_v8, %v4382_v1 }
 0x353   : > { %v4527_v54 = vadd.f32 %v6210_v22, %v4509_v37 }
 0x355   : > { %4544 = vst.msk [vmem:[%s6216_s15] sm:$0xff] %vm4543_vm10, %v4527_v54 }
 0x356   : > { %v6223_v6 = vpop.xlane.xlu0 %4483 }
 0x357   : > { %v4469_v18 = vpop.xlane.xlu1 %4468 }
 0x360   : > { %v4194_v48 = vpop.f32.mrf.mxu2 }
 0x361   : > { %v4195_v19 = vadd.f32 %v5981_v42, %v4194_v48  ;;  %v4313_v48 = vpop.f32.mrf.mxu1 }
 0x363   : > { %v4218_v0 = vmax.f32 %v4195_v19, 0.0 }
 0x365   : > { %4681 = vmatmul.msk.f32.gmra.mxu3 %vm1549_vm0, %v4218_v0 }
 0x368   : > { %v6227_v3 = vpop.xlane.xlu0 %4492 }
 0x36c   : > { %v6229_v31 = vpop.xlane.xlu1 %4477 }
 0x372   : > { %v4385_v62 = vpop.xlane.xlu0 %4384 }
 0x373   : > { %v4510_v33 = vadd.f32 %v4466_v13, %v4385_v62 }
 0x374   : > { %v6234_v40 = vpop.xlane.xlu1 %4486 }
 0x375   : > { %v4528_v58 = vadd.f32 %v6210_v22, %v4510_v33 }
 0x377   : > { %4545 = vst.msk [vmem:[%s6216_s15 + $0x8] sm:$0xff] %vm4543_vm10, %v4528_v58 }
 0x37c   : > { %v6238_v39 = vpop.xlane.xlu1 %4495 }
 0x37e   : > { %v4197_v56 = vpop.f32.mrf.mxu2 }
 0x37f   : > { %v4198_v27 = vadd.f32 %v5981_v42, %v4197_v56 }
 0x381   : > { %v4219_v15 = vmax.f32 %v4198_v27, 0.0 }
 0x383   : > { %4682 = vmatmul.msk.f32.gmra.mxu3 %vm1549_vm0, %v4219_v15 }
 0x38f   : > { %v4388_v9 = vpop.xlane.xlu1 %4387 }
 0x390   : > { %v4511_v23 = vadd.f32 %v4469_v18, %v4388_v9  ;;  %v4316_v9 = vpop.f32.mrf.mxu1 }
 0x392   : > { %v4529_v30 = vadd.f32 %v6210_v22, %v4511_v23 }
 0x394   : > { %4546 = vst.msk [vmem:[%s6216_s15 + $0x10] sm:$0xff] %vm4543_vm10, %v4529_v30  ;;  %v4391_v59 = vpop.xlane.xlu2 %4390 }
 0x395   : > { %v4512_v50 = vadd.f32 %v4472_v25, %v4391_v59  ;;  %v4311_v25 = vadd.f32 %v5993_v17, %v4310_v60 }
 0x397   : > { %v4530_v26 = vadd.f32 %v6210_v22, %v4512_v50  ;;  %v4348_v13 = vmax.f32 %v4311_v25, 0.0 }
 0x399   : > { %4547 = vst.msk [vmem:[%s6216_s15 + $0x18] sm:$0xff] %vm4543_vm10, %v4530_v26  ;;  %v4368_v37 = vmul.f32 %v6033_v14, %v4348_v13  ;;  %v4442_v13 = vld [vmem:[%s5854_s26 + $0x70] sm:$0xff] }
 0x39b   : > { %v4395_v54 = vsel %vm4379_vm9, %v4368_v37, 0.0  ;;  %v4727_v37 = vld [vmem:[%s4805_s16 + $0x70] sm:$0xff] }
 0x39e   : > { %v4319_v34 = vpop.f32.mrf.mxu3 }
 0x39f   : > { %v4200_v47 = vpop.f32.mrf.mxu2  ;;  %v4320_v5 = vadd.f32 %v5993_v17, %v4319_v34 }
 0x3a0   : > { %v4201_v51 = vadd.f32 %v5981_v42, %v4200_v47 }
 0x3a1   : > { %v4351_v11 = vmax.f32 %v4320_v5, 0.0 }
 0x3a2   : > { %v4220_v38 = vmax.f32 %v4201_v51, 0.0 }
 0x3a3   : > { %v4371_v20 = vmul.f32 %v6033_v14, %v4351_v11  ;;  %v4443_v11 = vld [vmem:[%s5854_s26 + $0x78] sm:$0xff] }
 0x3a4   : > { %4683 = vmatmul.msk.f32.gmra.mxu3 %vm1549_vm0, %v4220_v38 }
 0x3a5   : > { %v4404_v32 = vsel %vm4379_vm9, %v4371_v20, 0.0  ;;  %v4725_v20 = vld [vmem:[%s4805_s16 + $0x78] sm:$0xff] }
 0x3a6   : > { %4405 = vadd.xlane.f32.xlu0 %v4404_v32  ;;  %v4322_v49 = vpop.f32.mrf.mxu3  ;;  %v4459_v32 = vmul.f32 %v4725_v20, %v4443_v11 }
 0x3a7   : > { %v4323_v16 = vadd.f32 %v5993_v17, %v4322_v49 }
 0x3a8   : > { %v4203_v46 = vpop.f32.mrf.mxu2 }
 0x3a9   : > { %v4204_v41 = vadd.f32 %v5981_v42, %v4203_v46  ;;  %v4352_v43 = vmax.f32 %v4323_v16, 0.0  ;;  %v4506_v16 = vsel %vm4460_vm8, %v4459_v32, 0.0 }
 0x3ab   : > { %v4221_v8 = vmax.f32 %v4204_v41, 0.0  ;;  %v4372_v55 = vmul.f32 %v6033_v14, %v4352_v43 }
 0x3ad   : > { %4684 = vmatmul.msk.f32.gmra.mxu3 %vm1549_vm0, %v4221_v8  ;;  %v4407_v36 = vsel %vm4379_vm9, %v4372_v55, 0.0 }
 0x3ae   : > { %4408 = vadd.xlane.f32.xlu1 %v4407_v36  ;;  %v4325_v57 = vpop.f32.mrf.mxu3 }
 0x3af   : > { %v4326_v12 = vadd.f32 %v5993_v17, %v4325_v57 }
 0x3b1   : > { %v4353_v63 = vmax.f32 %v4326_v12, 0.0 }
 0x3b3   : > { %v4373_v44 = vmul.f32 %v6033_v14, %v4353_v63  ;;  %v4441_v63 = vld [vmem:[%s5854_s26 + $0x68] sm:$0xff] }
 0x3b5   : > { %v4410_v42 = vsel %vm4379_vm9, %v4373_v44, 0.0 }
 0x3b6   : > { %4411 = vadd.xlane.f32.xlu2 %v4410_v42 }
 0x3b9   : > { %v4328_v28 = vpop.f32.mrf.mxu3 }
 0x3ba   : > { %v4329_v35 = vadd.f32 %v5993_v17, %v4328_v28  ;;  %v4724_v17 = vld [vmem:[%s6346_s6] ss:$0 sm:$0xff] }
 0x3bb   : > { %v4314_v18 = vadd.f32 %v4724_v17, %v4313_v48  ;;  %v4317_v59 = vadd.f32 %v4724_v17, %v4316_v9 }
 0x3bc   : > { %v4354_v7 = vmax.f32 %v4329_v35, 0.0 }
 0x3bd   : > { %v4349_v58 = vmax.f32 %v4314_v18, 0.0  ;;  %v4350_v34 = vmax.f32 %v4317_v59, 0.0 }
 0x3be   : > { %4393 = vadd.xlane.f32.xlu2 %v4392_v53  ;;  %v4374_v2 = vmul.f32 %v6033_v14, %v4354_v7 }
 0x3bf   : > { %v4369_v27 = vmul.f32 %v6033_v14, %v4349_v58  ;;  %v4370_v5 = vmul.f32 %v6033_v14, %v4350_v34 }
 0x3c0   : > { %v4413_v1 = vsel %vm4379_vm9, %v4374_v2, 0.0 }
 0x3c1   : > { %4414 = vadd.xlane.f32.xlu0 %v4413_v1  ;;  %v4398_v15 = vsel %vm4379_vm9, %v4369_v27, 0.0  ;;  %v4401_v51 = vsel %vm4379_vm9, %v4370_v5, 0.0 }
 0x3c9   : > { %4396 = vadd.xlane.f32.xlu0 %v4395_v54  ;;  %v4458_v54 = vmul.f32 %v4727_v37, %v4442_v13 }
 0x3e8   : > { %v4331_v19 = vpop.f32.mrf.mxu3 }
 0x3e9   : > { %v4332_v0 = vadd.f32 %v4724_v17, %v4331_v19 }
 0x3eb   : > { %v4355_v62 = vmax.f32 %v4332_v0, 0.0 }
 0x3ed   : > { %v4375_v33 = vmul.f32 %v6033_v14, %v4355_v62 }
 0x3ef   : > { %v4416_v56 = vsel %vm4379_vm9, %v4375_v33, 0.0 }
 0x3f0   : > { %4417 = vadd.xlane.f32.xlu1 %v4416_v56 }
 0x3f8   : > { %4399 = vadd.xlane.f32.xlu1 %v4398_v15 }
 0x406   : > { %v4334_v23 = vpop.f32.mrf.mxu3 }
 0x407   : > { %v4335_v30 = vadd.f32 %v4724_v17, %v4334_v23 }
 0x409   : > { %v4356_v50 = vmax.f32 %v4335_v30, 0.0 }
 0x40b   : > { %v4376_v26 = vmul.f32 %v6033_v14, %v4356_v50 }
 0x40d   : > { %v4419_v47 = vsel %vm4379_vm9, %v4376_v26, 0.0 }
 0x40e   : > { %4420 = vadd.xlane.f32.xlu2 %v4419_v47 }
 0x416   : > { %4402 = vadd.xlane.f32.xlu2 %v4401_v51 }
 0x419   : > { %v4406_v38 = vpop.xlane.xlu0 %4405 }
 0x41a   : > { %v4517_v49 = vadd.f32 %v6234_v40, %v4406_v38 }
 0x41c   : > { %v4535_v46 = vadd.f32 %v6210_v22, %v4517_v49 }
 0x41e   : > { %4552 = vst.msk [vmem:[%s6216_s15 + $0x40] sm:$0xff] %vm4543_vm10, %v4535_v46  ;;  %4507 = vadd.xlane.f32.xlu2 %v4506_v16 }
 0x421   : > { %v4409_v41 = vpop.xlane.xlu1 %4408 }
 0x422   : > { %v4518_v43 = vadd.f32 %v6206_v61, %v4409_v41  ;;  %v4726_v61 = vld [vmem:[%s4805_s16 + $0x68] sm:$0xff] }
 0x423   : > { %v4457_v52 = vmul.f32 %v4726_v61, %v4441_v63 }
 0x424   : > { %v4536_v8 = vadd.f32 %v6210_v22, %v4518_v43 }
 0x425   : > { %v4500_v35 = vsel %vm4460_vm8, %v4457_v52, 0.0 }
 0x426   : > { %4553 = vst.msk [vmem:[%s6216_s15 + $0x48] sm:$0xff] %vm4543_vm10, %v4536_v8 }
 0x427   : > { %v4337_v55 = vpop.f32.mrf.mxu3 }
 0x428   : > { %v4338_v36 = vadd.f32 %v4724_v17, %v4337_v55 }
 0x429   : > { %v4412_v40 = vpop.xlane.xlu2 %4411 }
 0x42a   : > { %v4357_v24 = vmax.f32 %v4338_v36, 0.0  ;;  %v4519_v57 = vadd.f32 %v6227_v3, %v4412_v40 }
 0x42c   : > { %v4377_v12 = vmul.f32 %v6033_v14, %v4357_v24  ;;  %v4537_v4 = vadd.f32 %v6210_v22, %v4519_v57 }
 0x42e   : > { %v4422_v44 = vsel %vm4379_vm9, %v4377_v12, 0.0  ;;  %4554 = vst.msk [vmem:[%s6216_s15 + $0x50] sm:$0xff] %vm4543_vm10, %v4537_v4 }
 0x42f   : > { %4423 = vadd.xlane.f32.xlu0 %v4422_v44 }
 0x430   : > { %v4340_v42 = vpop.f32.mrf.mxu3 }
 0x431   : > { %v4341_v45 = vadd.f32 %v4724_v17, %v4340_v42  ;;  %v4394_v60 = vpop.xlane.xlu2 %4393 }
 0x432   : > { %v4513_v3 = vadd.f32 %v6219_v29, %v4394_v60 }
 0x433   : > { %v4358_v28 = vmax.f32 %v4341_v45, 0.0 }
 0x434   : > { %v4531_v25 = vadd.f32 %v6210_v22, %v4513_v3  ;;  %v4415_v7 = vpop.xlane.xlu0 %4414 }
 0x435   : > { %v4378_v53 = vmul.f32 %v6033_v14, %v4358_v28  ;;  %v4520_v2 = vadd.f32 %v6238_v39, %v4415_v7  ;;  %v4503_v14 = vsel %vm4460_vm8, %v4458_v54, 0.0 }
 0x436   : > { %4548 = vst.msk [vmem:[%s6216_s15 + $0x20] sm:$0xff] %vm4543_vm10, %v4531_v25 }
 0x437   : > { %4501 = vadd.xlane.f32.xlu0 %v4500_v35  ;;  %v4425_v1 = vsel %vm4379_vm9, %v4378_v53, 0.0  ;;  %v4538_v29 = vadd.f32 %v6210_v22, %v4520_v2 }
 0x438   : > { %4426 = vadd.xlane.f32.xlu1 %v4425_v1 }
 0x439   : > { %4555 = vst.msk [vmem:[%s6216_s15 + $0x58] sm:$0xff] %vm4543_vm10, %v4538_v29 }
 0x43c   : > { %v4397_v48 = vpop.xlane.xlu0 %4396 }
 0x43d   : > { %v4514_v39 = vadd.f32 %v6229_v31, %v4397_v48 }
 0x43f   : > { %v4532_v19 = vadd.f32 %v6210_v22, %v4514_v39 }
 0x440   : > { %4504 = vadd.xlane.f32.xlu1 %v4503_v14 }
 0x441   : > { %4549 = vst.msk [vmem:[%s6216_s15 + $0x28] sm:$0xff] %vm4543_vm10, %v4532_v19 }
 0x463   : > { %v4418_v17 = vpop.xlane.xlu1 %4417 }
 0x464   : > { %v4521_v0 = vadd.f32 %v6208_v10, %v4418_v17 }
 0x466   : > { %v4539_v18 = vadd.f32 %v6210_v22, %v4521_v0 }
 0x468   : > { %4556 = vst.msk [vmem:[%s6216_s15 + $0x60] sm:$0xff] %vm4543_vm10, %v4539_v18 }
 0x46b   : > { %v4400_v62 = vpop.xlane.xlu1 %4399 }
 0x46c   : > { %v4515_v33 = vadd.f32 %v6202_v21, %v4400_v62 }
 0x46e   : > { %v4533_v58 = vadd.f32 %v6210_v22, %v4515_v33 }
 0x470   : > { %4550 = vst.msk [vmem:[%s6216_s15 + $0x30] sm:$0xff] %vm4543_vm10, %v4533_v58 }
 0x481   : > { %v4421_v31 = vpop.xlane.xlu2 %4420 }
 0x489   : > { %v4403_v56 = vpop.xlane.xlu2 %4402 }
 0x48a   : > { %v4516_v27 = vadd.f32 %v6223_v6, %v4403_v56 }
 0x48c   : > { %v4534_v10 = vadd.f32 %v6210_v22, %v4516_v27 }
 0x48e   : > { %4551 = vst.msk [vmem:[%s6216_s15 + $0x38] sm:$0xff] %vm4543_vm10, %v4534_v10 }
 0x491   : > { %v4508_v9 = vpop.xlane.xlu2 %4507 }
 0x4a2   : > { %v4424_v15 = vpop.xlane.xlu0 %4423 }
 0x4aa   : > { %v4502_v23 = vpop.xlane.xlu0 %4501 }
 0x4ab   : > { %v4522_v30 = vadd.f32 %v4502_v23, %v4421_v31  ;;  %v4427_v21 = vpop.xlane.xlu1 %4426 }
 0x4ac   : > { %v4524_v59 = vadd.f32 %v4508_v9, %v4427_v21 }
 0x4ad   : > { %v4540_v50 = vadd.f32 %v6210_v22, %v4522_v30 }
 0x4ae   : > { %v4542_v26 = vadd.f32 %v6210_v22, %v4524_v59 }
 0x4af   : > { %4557 = vst.msk [vmem:[%s6216_s15 + $0x68] sm:$0xff] %vm4543_vm10, %v4540_v50 }
 0x4b0   : > { %4559 = vst.msk [vmem:[%s6216_s15 + $0x78] sm:$0xff] %vm4543_vm10, %v4542_v26 }
 0x4b3   : > { %v4505_v6 = vpop.xlane.xlu1 %4504 }
 0x4b4   : > { %v4523_v34 = vadd.f32 %v4505_v6, %v4424_v15 }
 0x4b6   : > { %v4541_v47 = vadd.f32 %v6210_v22, %v4523_v34 }
 0x4b8   : > { %4558 = vst.msk [vmem:[%s6216_s15 + $0x70] sm:$0xff] %vm4543_vm10, %v4541_v47 }
 0x4b9 PF: > { %s20_s11 = sadd.s32 1, %s4734_s11  }
 0x4ba   : > { %p17_p5 = scmp.ge.s32.totalorder %s20_s11, 6  }
 0x4bc   :  { %19 = sbr.rel (!%p17_p5) target bundleno = 2 (0x2), region = 92 }

</bundles_post_ra>
